<compile_context>
chip_gen: v5e
topology: v5e:2x2
jax: 0.10.0
libtpu: 0.0.40
codegen_flags: <defaults>
</compile_context>

<pallas_src>
import functools

import jax
import jax.numpy as jnp
from jax.experimental import pallas as pl
from jax.experimental.pallas import tpu as pltpu

# --- smooth-loss hyper-parameters (FlowStep3D KnnLoss defaults, synthetic) ---
K_NEIGHBORS = 4        # k nearest neighbours (includes self; self diff == 0)
W_KNN = 1.0            # SmoothnessLoss w_knn (radius cutoff is effectively inf)


def _pick_tile_and_vmem():
    """Pick the query-row tile TQ and scoped-VMEM limit per TPU generation.

    v5e/v6e: 128 MiB physical VMEM -> TQ=256, ~96 MiB scoped limit.
    v7x:      64 MiB per TensorCore -> TQ=128, 48 MiB scoped limit.
    """
    try:
        vmem = pltpu.get_tpu_info().vmem_capacity_bytes
    except Exception:  # unknown platform / API change -> conservative defaults
        vmem = 64 * 1024 * 1024
    if vmem >= 100 * 1024 * 1024:
        return 256, 96 * 1024 * 1024
    return 128, 48 * 1024 * 1024


def _loss_kernel(pc1_all_ref, pc1_q_ref, flow_all_ref, flow_q_ref, gt_q_ref,
                 out_ref, *, n_pad, n_real, tq, n_preds, k_neighbors):
    """One (batch b, query-row tile q) step: partial L1 + kNN-smoothness sums."""
    pc1_all = pc1_all_ref[0].astype(jnp.float32)            # (3, N_pad)  lane-dense
    pc1_q = pc1_q_ref[0].astype(jnp.float32)                # (TQ, 3)
    gt_q = gt_q_ref[0].astype(jnp.float32)                  # (TQ, 3)

    # Squared-distance tile (expanded form; one small MXU matmul + a few VPU
    # passes).  NOTE: the expanded form can misorder nearly-equidistant
    # neighbours vs the exact (q-p)^2 form for large-magnitude coordinates
    # (FP cancellation) -- acceptable for a kNN smoothness loss.
    sq_all = jnp.sum(pc1_all * pc1_all, axis=0, keepdims=True)        # (1, N)
    sq_q = jnp.sum(pc1_q * pc1_q, axis=1, keepdims=True)              # (TQ, 1)
    gram = jax.lax.dot_general(pc1_q, pc1_all, (((1,), (0,)), ((), ())),
                               preferred_element_type=jnp.float32)    # (TQ, N)
    d = jnp.maximum(sq_q + (sq_all - 2.0 * gram), 0.0)                # (TQ, N) >= 0

    # --- packed-key kNN: ONE lane reduction per k step -----------------------
    # d >= 0 so its f32 bit pattern is monotone in the value; fold the column
    # index into the idx_bits low mantissa bits, making (min, argmin) a single
    # jnp.min with a unique winner per row.  NOTE: this truncates idx_bits
    # mantissa bits of the distance, so exact near-ties may resolve to a
    # different (equally near) neighbour than a full top_k.
    idx_bits = max(1, (n_pad - 1).bit_length())
    col_ids = jax.lax.broadcasted_iota(jnp.int32, (tq, n_pad), 1)
    key_bits = ((pltpu.bitcast(d, jnp.int32) & jnp.int32(-(1 << idx_bits)))
                | col_ids)
    key = pltpu.bitcast(key_bits, jnp.float32)               # still >= 0, finite

    if n_real != n_pad:
        # Zero the padded query rows' one-hots once: padded rows then gather 0
        # and (with zero-padded flows / gt) contribute exactly 0 to both sums.
        rows = (pl.program_id(1) * tq
                + jax.lax.broadcasted_iota(jnp.int32, (tq, 1), 0))
        row_mask = (rows < n_real).astype(jnp.float32)        # (TQ, 1)
    else:
        row_mask = None

    one_hots = []                                             # k x (TQ, N) f32
    for _ in range(k_neighbors):
        kmin = jnp.min(key, axis=-1, keepdims=True)           # (TQ, 1)
        sel = key == kmin                                     # exactly one / row
        oh = sel.astype(jnp.float32)
        if row_mask is not None:
            oh = oh * row_mask
        one_hots.append(oh)
        key = jnp.where(sel, jnp.float32(jnp.inf), key)
    # TODO(synk): store one_hots as bf16 (0/1 exact) to halve their VMEM
    # footprint at N=8192 on v7x if the 48 MiB scoped budget ever gets tight.

    # --- per-prediction pass: L1 data term + MXU neighbour-flow gather -------
    tile_rows = 8 * pl.cdiv(n_preds, 8)
    row_iota = jax.lax.broadcasted_iota(jnp.int32, (tile_rows, 128), 0)
    zeros_tile = jnp.zeros((tile_rows, 128), jnp.float32)

    def pred_body(t, carry):
        data_tile, smooth_tile = carry
        flow_all_t = flow_all_ref[t, 0].astype(jnp.float32)   # (3, N_pad)
        flow_q_t = flow_q_ref[t, 0].astype(jnp.float32)       # (TQ, 3)

        # L1 data-loss partial sum (padded rows are |0 - 0| = 0).
        data_partial = jnp.sum(jnp.abs(flow_q_t - gt_q))

        # Neighbour-flow gather on the MXU: k tiny matmuls
        # (TQ, N) x (3, N)^T -> (TQ, 3) replace the per-prediction (TQ, N)
        # flow-difference VPU passes of the previous version.
        smooth_partial = jnp.float32(0.0)
        for oh in one_hots:
            nbr = jax.lax.dot_general(oh, flow_all_t, (((1,), (1,)), ((), ())),
                                      preferred_element_type=jnp.float32)
            smooth_partial = smooth_partial + jnp.sum(jnp.abs(flow_q_t - nbr))

        row_sel = row_iota == t
        return (jnp.where(row_sel, data_partial, data_tile),
                jnp.where(row_sel, smooth_partial, smooth_tile))

    # fori_loop (not a static unroll) keeps only one prediction's temporaries
    # live at a time (the per-t temporaries are now tiny (TQ, 3) tensors).
    data_tile, smooth_tile = jax.lax.fori_loop(
        0, n_preds, pred_body, (zeros_tile, zeros_tile))

    # Single merged lane-dense output block: row t holds prediction t's sums.
    out_ref[0, 0, 0] = data_tile
    out_ref[0, 0, 1] = smooth_tile


@jax.jit
def _loss_sums(pc1, flow_stack, flow_gt):
    """Returns per-prediction (sum |pred-gt|, sum_{b,i,k} ||f_i - f_knn||_1)."""
    T, B, N, C = flow_stack.shape
    assert C == 3 and pc1.shape == (B, N, 3) and flow_gt.shape == (B, N, 3)
    assert N >= K_NEIGHBORS

    tq, vmem_limit = _pick_tile_and_vmem()
    n_pad = tq * pl.cdiv(N, tq)          # always tiled; never a full (N,N) slab
    assert n_pad <= (1 << 23)            # column index must fit in the mantissa
    if n_pad != N:
        pad = n_pad - N
        # Far-away sentinel points (never selected by real queries); zero flows.
        pc1 = jnp.pad(pc1, ((0, 0), (0, pad), (0, 0)), constant_values=1e6)
        flow_stack = jnp.pad(flow_stack, ((0, 0), (0, 0), (0, pad), (0, 0)))
        flow_gt = jnp.pad(flow_gt, ((0, 0), (0, pad), (0, 0)))
    nq = n_pad // tq

    # Lane-dense "key" slabs (channels on sublanes, N on the 128 lanes).
    pc1_t = jnp.transpose(pc1, (0, 2, 1))                # (B, 3, N_pad)
    flow_t = jnp.transpose(flow_stack, (0, 1, 3, 2))     # (T, B, 3, N_pad)

    tile_rows = 8 * pl.cdiv(T, 8)
    kernel = functools.partial(_loss_kernel, n_pad=n_pad, n_real=N, tq=tq,
                               n_preds=T, k_neighbors=K_NEIGHBORS)

    out = pl.pallas_call(
        kernel,
        out_shape=jax.ShapeDtypeStruct((B, nq, 2, tile_rows, 128), jnp.float32),
        grid_spec=pltpu.PrefetchScalarGridSpec(
            num_scalar_prefetch=0,
            grid=(B, nq),
            in_specs=[
                pl.BlockSpec((1, 3, n_pad), lambda b, q: (b, 0, 0)),        # pc1 keys
                pl.BlockSpec((1, tq, 3), lambda b, q: (b, q, 0)),           # pc1 query
                pl.BlockSpec((T, 1, 3, n_pad), lambda b, q: (0, b, 0, 0)),  # flow keys
                pl.BlockSpec((T, 1, tq, 3), lambda b, q: (0, b, q, 0)),     # flow query
                pl.BlockSpec((1, tq, 3), lambda b, q: (b, q, 0)),           # gt query
            ],
            out_specs=pl.BlockSpec((1, 1, 2, tile_rows, 128),
                                   lambda b, q: (b, q, 0, 0, 0)),
        ),
        compiler_params=pltpu.CompilerParams(
            dimension_semantics=("parallel", "parallel"),
            vmem_limit_bytes=vmem_limit,
        ),
    )(pc1_t, pc1, flow_t, flow_stack, flow_gt)

    data_sums = jnp.sum(out[:, :, 0, :T, 0], axis=(0, 1))      # (T,)
    smooth_sums = jnp.sum(out[:, :, 1, :T, 0], axis=(0, 1))    # (T,)
    return data_sums, smooth_sums


class SupervisedFlowStep3DLoss:
    """JAX/Pallas port of losses/flow_loss_sup.py::SupervisedFlowStep3DLoss."""

    def __init__(self, weights=(0.75, 0.25), iters_w=(1.0,)):
        self.w_chamfer, self.w_smooth = weights
        self.iters_w = list(iters_w)

    def __call__(self, pc1, pc2, flow_preds, flow_gts):
        # pc2 is accepted for interface parity but unused (as in PyTorch).
        assert len(flow_preds) == len(self.iters_w)
        B, N, C = pc1.shape
        T = len(flow_preds)

        # All predictions share one kernel call so the N^2 kNN work on pc1 is
        # done once and reused across iterations.
        flow_stack = jnp.stack(flow_preds, axis=0)                 # (T, B, N, 3)
        data_sums, smooth_sums = _loss_sums(pc1, flow_stack, flow_gts)
        data_losses = data_sums / (B * N * C)                      # L1Loss mean
        smooth_losses = W_KNN * smooth_sums / (B * N * K_NEIGHBORS)

        loss = jnp.float32(0.0)
        for i in range(T):
            loss_i = (self.w_chamfer * data_losses[i]
                      + self.w_smooth * smooth_losses[i])
            loss = loss + self.iters_w[i] * loss_i

        # Single device->host sync at the end (PyTorch does per-iter .item()).
        data_h, smooth_h, loss_h = jax.device_get(
            (data_losses, smooth_losses, loss))
        loss_dict = {}
        for i in range(T):
            loss_dict['data_loss_#%d' % i] = float(data_h[i])
            loss_dict['smooth_loss_#%d' % i] = float(smooth_h[i])
        loss_dict['sum'] = float(loss_h)
        return loss, loss_dict


def _reference_loss(pc1, flow_preds, flow_gts, w_chamfer, w_smooth, iters_w):
    """Pure-JAX reference for validation."""
    d = jnp.sum((pc1[:, :, None, :] - pc1[:, None, :, :]) ** 2, axis=-1)
    _, idx = jax.lax.top_k(-d, K_NEIGHBORS)                            # (B,N,k)
    total = jnp.float32(0.0)
    for i, fp in enumerate(flow_preds):
        data_loss = jnp.mean(jnp.abs(fp - flow_gts))
        nflow = jnp.take_along_axis(fp[:, None, :, :],
                                    idx[..., None], axis=2)            # (B,N,k,3)
        smooth = jnp.mean(jnp.sum(jnp.abs(fp[:, :, None, :] - nflow), axis=-1))
        total = total + iters_w[i] * (w_chamfer * data_loss + W_KNN * w_smooth * smooth)
    return total


if __name__ == "__main__":
    key = jax.random.PRNGKey(0)
    ks = jax.random.split(key, 8)

    # --- Test 1: N multiple of 128, two flow predictions ---------------------
    B, N, T = 2, 256, 2
    pc1 = jax.random.normal(ks[0], (B, N, 3), dtype=jnp.float32)
    pc2 = jax.random.normal(ks[1], (B, N, 3), dtype=jnp.float32)
    flow_gts = 0.1 * jax.random.normal(ks[2], (B, N, 3), dtype=jnp.float32)
    flow_preds = [flow_gts + 0.05 * jax.random.normal(ks[3 + t], (B, N, 3),
                                                      dtype=jnp.float32)
                  for t in range(T)]
    iters_w = [0.8, 1.0]
    loss_fn = SupervisedFlowStep3DLoss(weights=(0.75, 0.25), iters_w=iters_w)
    loss, loss_dict = loss_fn(pc1, pc2, flow_preds, flow_gts)
    jax.block_until_ready(loss)
    ref = _reference_loss(pc1, flow_preds, flow_gts, 0.75, 0.25, iters_w)
    assert jnp.allclose(loss, ref, rtol=2e-3, atol=1e-5), (loss, ref)

    # --- Test 2: N not a multiple of 128 -> exercises the padded-N path ------
    B2, N2 = 1, 200
    pc1b = jax.random.normal(ks[5], (B2, N2, 3), dtype=jnp.float32)
    flow_gtb = 0.1 * jax.random.normal(ks[6], (B2, N2, 3), dtype=jnp.float32)
    flow_pb = [flow_gtb + 0.05 * jax.random.normal(ks[7], (B2, N2, 3),
                                                   dtype=jnp.float32)]
    loss_fn2 = SupervisedFlowStep3DLoss(weights=(0.75, 0.25), iters_w=[1.0])
    loss2, _ = loss_fn2(pc1b, pc1b, flow_pb, flow_gtb)
    jax.block_until_ready(loss2)
    ref2 = _reference_loss(pc1b, flow_pb, flow_gtb, 0.75, 0.25, [1.0])
    assert jnp.allclose(loss2, ref2, rtol=2e-3, atol=1e-5), (loss2, ref2)

    print("KERNEL_OK")
</pallas_src>

<mosaic_0001>
module attributes {stable_mosaic.version = 11 : i64} {
  func.func @_loss_kernel(%arg0: i32, %arg1: i32, %arg2: memref<1x3x256xf32, #tpu.memory_space<vmem>>, %arg3: memref<1x128x3xf32, #tpu.memory_space<vmem>>, %arg4: memref<2x1x3x256xf32, #tpu.memory_space<vmem>>, %arg5: memref<2x1x128x3xf32, #tpu.memory_space<vmem>>, %arg6: memref<1x128x3xf32, #tpu.memory_space<vmem>>, %arg7: memref<1x1x2x8x128xf32, #tpu.memory_space<vmem>>) attributes {dimension_semantics = [#tpu.dimension_semantics<parallel>, #tpu.dimension_semantics<parallel>], iteration_bounds = array<i64: 2, 2>, scalar_prefetch = 0 : i64, scratch_operands = 0 : i64, tpu.core_type = #tpu.core_type<tc>, window_params = [{transform_indices = @transform_0, window_bounds = array<i64: 1, 3, 256>}, {transform_indices = @transform_1, window_bounds = array<i64: 1, 128, 3>}, {transform_indices = @transform_2, window_bounds = array<i64: 2, 1, 3, 256>}, {transform_indices = @transform_3, window_bounds = array<i64: 2, 1, 128, 3>}, {transform_indices = @transform_4, window_bounds = array<i64: 1, 128, 3>}, {transform_indices = @transform_5, window_bounds = array<i64: 1, 1, 2, 8, 128>}]} {
    %c0 = arith.constant 0 : index
    %c0_0 = arith.constant 0 : index
    %c0_1 = arith.constant 0 : index
    %0 = vector.load %arg2[%c0, %c0_0, %c0_1] : memref<1x3x256xf32, #tpu.memory_space<vmem>>, vector<1x3x256xf32>
    %1 = vector.shape_cast %0 : vector<1x3x256xf32> to vector<3x256xf32>
    %c0_2 = arith.constant 0 : index
    %c0_3 = arith.constant 0 : index
    %c0_4 = arith.constant 0 : index
    %2 = vector.load %arg3[%c0_2, %c0_3, %c0_4] : memref<1x128x3xf32, #tpu.memory_space<vmem>>, vector<1x128x3xf32>
    %3 = vector.shape_cast %2 : vector<1x128x3xf32> to vector<128x3xf32>
    %c0_5 = arith.constant 0 : index
    %c0_6 = arith.constant 0 : index
    %c0_7 = arith.constant 0 : index
    %4 = vector.load %arg6[%c0_5, %c0_6, %c0_7] : memref<1x128x3xf32, #tpu.memory_space<vmem>>, vector<1x128x3xf32>
    %5 = vector.shape_cast %4 : vector<1x128x3xf32> to vector<128x3xf32>
    %6 = arith.mulf %1, %1 : vector<3x256xf32>
    %cst = arith.constant dense<0.000000e+00> : vector<256xf32>
    %7 = vector.multi_reduction <add>, %6, %cst [0] : vector<3x256xf32> to vector<256xf32>
    %8 = vector.shape_cast %7 : vector<256xf32> to vector<1x256xf32>
    %9 = arith.mulf %3, %3 : vector<128x3xf32>
    %cst_8 = arith.constant dense<0.000000e+00> : vector<128xf32>
    %10 = vector.multi_reduction <add>, %9, %cst_8 [1] : vector<128x3xf32> to vector<128xf32>
    %11 = vector.shape_cast %10 : vector<128xf32> to vector<128x1xf32>
    %cst_9 = arith.constant dense<0.000000e+00> : vector<128x256xf32>
    %12 = tpu.matmul %3, %1, %cst_9 {dimension_numbers = #tpu.dot_dimension_numbers<[1], [0], [0], [1], [0, 0, 1, 1], [], []>} : vector<128x3xf32>, vector<3x256xf32>, vector<128x256xf32> -> vector<128x256xf32>
    %cst_10 = arith.constant 2.000000e+00 : f32
    %13 = vector.broadcast %cst_10 : f32 to vector<128x256xf32>
    %14 = arith.mulf %13, %12 : vector<128x256xf32>
    %15 = vector.broadcast %8 : vector<1x256xf32> to vector<128x256xf32>
    %16 = arith.subf %15, %14 : vector<128x256xf32>
    %17 = vector.broadcast %11 : vector<128x1xf32> to vector<128x256xf32>
    %18 = arith.addf %17, %16 : vector<128x256xf32>
    %cst_11 = arith.constant 0.000000e+00 : f32
    %19 = vector.broadcast %cst_11 : f32 to vector<128x256xf32>
    %20 = arith.maximumf %18, %19 : vector<128x256xf32>
    %21 = tpu.iota {dimensions = array<i32: 1>} : vector<128x256xi32>
    %22 = tpu.bitcast %20 : vector<128x256xf32> -> vector<128x256xi32>
    %c-256_i32 = arith.constant -256 : i32
    %23 = vector.broadcast %c-256_i32 : i32 to vector<128x256xi32>
    %24 = arith.andi %22, %23 : vector<128x256xi32>
    %25 = arith.ori %24, %21 : vector<128x256xi32>
    %26 = tpu.bitcast %25 : vector<128x256xi32> -> vector<128x256xf32>
    %cst_12 = arith.constant dense<0x7F800000> : vector<128xf32>
    %27 = vector.multi_reduction <minimumf>, %26, %cst_12 [1] : vector<128x256xf32> to vector<128xf32>
    %28 = vector.shape_cast %27 : vector<128xf32> to vector<128x1xf32>
    %29 = vector.broadcast %28 : vector<128x1xf32> to vector<128x256xf32>
    %30 = arith.cmpf oeq, %26, %29 : vector<128x256xf32>
    %31 = arith.extui %30 : vector<128x256xi1> to vector<128x256xi32>
    %32 = arith.sitofp %31 : vector<128x256xi32> to vector<128x256xf32>
    %cst_13 = arith.constant 0x7F800000 : f32
    %33 = vector.broadcast %cst_13 : f32 to vector<128x256xf32>
    %34 = arith.select %30, %33, %26 : vector<128x256xi1>, vector<128x256xf32>
    %cst_14 = arith.constant dense<0x7F800000> : vector<128xf32>
    %35 = vector.multi_reduction <minimumf>, %34, %cst_14 [1] : vector<128x256xf32> to vector<128xf32>
    %36 = vector.shape_cast %35 : vector<128xf32> to vector<128x1xf32>
    %37 = vector.broadcast %36 : vector<128x1xf32> to vector<128x256xf32>
    %38 = arith.cmpf oeq, %34, %37 : vector<128x256xf32>
    %39 = arith.extui %38 : vector<128x256xi1> to vector<128x256xi32>
    %40 = arith.sitofp %39 : vector<128x256xi32> to vector<128x256xf32>
    %cst_15 = arith.constant 0x7F800000 : f32
    %41 = vector.broadcast %cst_15 : f32 to vector<128x256xf32>
    %42 = arith.select %38, %41, %34 : vector<128x256xi1>, vector<128x256xf32>
    %cst_16 = arith.constant dense<0x7F800000> : vector<128xf32>
    %43 = vector.multi_reduction <minimumf>, %42, %cst_16 [1] : vector<128x256xf32> to vector<128xf32>
    %44 = vector.shape_cast %43 : vector<128xf32> to vector<128x1xf32>
    %45 = vector.broadcast %44 : vector<128x1xf32> to vector<128x256xf32>
    %46 = arith.cmpf oeq, %42, %45 : vector<128x256xf32>
    %47 = arith.extui %46 : vector<128x256xi1> to vector<128x256xi32>
    %48 = arith.sitofp %47 : vector<128x256xi32> to vector<128x256xf32>
    %cst_17 = arith.constant 0x7F800000 : f32
    %49 = vector.broadcast %cst_17 : f32 to vector<128x256xf32>
    %50 = arith.select %46, %49, %42 : vector<128x256xi1>, vector<128x256xf32>
    %cst_18 = arith.constant dense<0x7F800000> : vector<128xf32>
    %51 = vector.multi_reduction <minimumf>, %50, %cst_18 [1] : vector<128x256xf32> to vector<128xf32>
    %52 = vector.shape_cast %51 : vector<128xf32> to vector<128x1xf32>
    %53 = vector.broadcast %52 : vector<128x1xf32> to vector<128x256xf32>
    %54 = arith.cmpf oeq, %50, %53 : vector<128x256xf32>
    %55 = arith.extui %54 : vector<128x256xi1> to vector<128x256xi32>
    %56 = arith.sitofp %55 : vector<128x256xi32> to vector<128x256xf32>
    %57 = tpu.iota {dimensions = array<i32: 0>} : vector<8x128xi32>
    %cst_19 = arith.constant 0.000000e+00 : f32
    %58 = vector.broadcast %cst_19 : f32 to vector<8x128xf32>
    %c0_i32 = arith.constant 0 : i32
    %c2_i32 = arith.constant 2 : i32
    %59 = arith.addi %c0_i32, %c2_i32 : i32
    %c1_i32 = arith.constant 1 : i32
    %60:2 = scf.for %arg8 = %c0_i32 to %59 step %c1_i32 iter_args(%arg9 = %58, %arg10 = %58) -> (vector<8x128xf32>, vector<8x128xf32>)  : i32 {
      %67 = arith.index_cast %arg8 : i32 to index
      %c0_30 = arith.constant 0 : index
      %c0_31 = arith.constant 0 : index
      %c0_32 = arith.constant 0 : index
      %68 = vector.load %arg4[%67, %c0_30, %c0_31, %c0_32] : memref<2x1x3x256xf32, #tpu.memory_space<vmem>>, vector<1x1x3x256xf32>
      %69 = vector.shape_cast %68 : vector<1x1x3x256xf32> to vector<3x256xf32>
      %70 = arith.index_cast %arg8 : i32 to index
      %c0_33 = arith.constant 0 : index
      %c0_34 = arith.constant 0 : index
      %c0_35 = arith.constant 0 : index
      %71 = vector.load %arg5[%70, %c0_33, %c0_34, %c0_35] : memref<2x1x128x3xf32, #tpu.memory_space<vmem>>, vector<1x1x128x3xf32>
      %72 = vector.shape_cast %71 : vector<1x1x128x3xf32> to vector<128x3xf32>
      %73 = arith.subf %72, %5 : vector<128x3xf32>
      %74 = math.absf %73 : vector<128x3xf32>
      %75 = vector.shape_cast %74 : vector<128x3xf32> to vector<1x128x3xf32>
      %cst_36 = arith.constant dense<0.000000e+00> : vector<1xf32>
      %76 = vector.multi_reduction <add>, %75, %cst_36 [1, 2] : vector<1x128x3xf32> to vector<1xf32>
      %77 = vector.shape_cast %76 : vector<1xf32> to vector<1x1x1xf32>
      %78 = vector.extract %77[0, 0, 0] : f32 from vector<1x1x1xf32>
      %cst_37 = arith.constant dense<0.000000e+00> : vector<128x3xf32>
      %79 = tpu.matmul %32, %69, %cst_37 {dimension_numbers = #tpu.dot_dimension_numbers<[1], [1], [0], [0], [0, 0, 1, 0], [], []>} : vector<128x256xf32>, vector<3x256xf32>, vector<128x3xf32> -> vector<128x3xf32>
      %80 = arith.subf %72, %79 : vector<128x3xf32>
      %81 = math.absf %80 : vector<128x3xf32>
      %82 = vector.shape_cast %81 : vector<128x3xf32> to vector<1x128x3xf32>
      %cst_38 = arith.constant dense<0.000000e+00> : vector<1xf32>
      %83 = vector.multi_reduction <add>, %82, %cst_38 [1, 2] : vector<1x128x3xf32> to vector<1xf32>
      %84 = vector.shape_cast %83 : vector<1xf32> to vector<1x1x1xf32>
      %85 = vector.extract %84[0, 0, 0] : f32 from vector<1x1x1xf32>
      %cst_39 = arith.constant 0.000000e+00 : f32
      %86 = arith.addf %cst_39, %85 : f32
      %cst_40 = arith.constant dense<0.000000e+00> : vector<128x3xf32>
      %87 = tpu.matmul %40, %69, %cst_40 {dimension_numbers = #tpu.dot_dimension_numbers<[1], [1], [0], [0], [0, 0, 1, 0], [], []>} : vector<128x256xf32>, vector<3x256xf32>, vector<128x3xf32> -> vector<128x3xf32>
      %88 = arith.subf %72, %87 : vector<128x3xf32>
      %89 = math.absf %88 : vector<128x3xf32>
      %90 = vector.shape_cast %89 : vector<128x3xf32> to vector<1x128x3xf32>
      %cst_41 = arith.constant dense<0.000000e+00> : vector<1xf32>
      %91 = vector.multi_reduction <add>, %90, %cst_41 [1, 2] : vector<1x128x3xf32> to vector<1xf32>
      %92 = vector.shape_cast %91 : vector<1xf32> to vector<1x1x1xf32>
      %93 = vector.extract %92[0, 0, 0] : f32 from vector<1x1x1xf32>
      %94 = arith.addf %86, %93 : f32
      %cst_42 = arith.constant dense<0.000000e+00> : vector<128x3xf32>
      %95 = tpu.matmul %48, %69, %cst_42 {dimension_numbers = #tpu.dot_dimension_numbers<[1], [1], [0], [0], [0, 0, 1, 0], [], []>} : vector<128x256xf32>, vector<3x256xf32>, vector<128x3xf32> -> vector<128x3xf32>
      %96 = arith.subf %72, %95 : vector<128x3xf32>
      %97 = math.absf %96 : vector<128x3xf32>
      %98 = vector.shape_cast %97 : vector<128x3xf32> to vector<1x128x3xf32>
      %cst_43 = arith.constant dense<0.000000e+00> : vector<1xf32>
      %99 = vector.multi_reduction <add>, %98, %cst_43 [1, 2] : vector<1x128x3xf32> to vector<1xf32>
      %100 = vector.shape_cast %99 : vector<1xf32> to vector<1x1x1xf32>
      %101 = vector.extract %100[0, 0, 0] : f32 from vector<1x1x1xf32>
      %102 = arith.addf %94, %101 : f32
      %cst_44 = arith.constant dense<0.000000e+00> : vector<128x3xf32>
      %103 = tpu.matmul %56, %69, %cst_44 {dimension_numbers = #tpu.dot_dimension_numbers<[1], [1], [0], [0], [0, 0, 1, 0], [], []>} : vector<128x256xf32>, vector<3x256xf32>, vector<128x3xf32> -> vector<128x3xf32>
      %104 = arith.subf %72, %103 : vector<128x3xf32>
      %105 = math.absf %104 : vector<128x3xf32>
      %106 = vector.shape_cast %105 : vector<128x3xf32> to vector<1x128x3xf32>
      %cst_45 = arith.constant dense<0.000000e+00> : vector<1xf32>
      %107 = vector.multi_reduction <add>, %106, %cst_45 [1, 2] : vector<1x128x3xf32> to vector<1xf32>
      %108 = vector.shape_cast %107 : vector<1xf32> to vector<1x1x1xf32>
      %109 = vector.extract %108[0, 0, 0] : f32 from vector<1x1x1xf32>
      %110 = arith.addf %102, %109 : f32
      %111 = vector.broadcast %arg8 : i32 to vector<8x128xi32>
      %112 = arith.cmpi eq, %57, %111 : vector<8x128xi32>
      %113 = vector.broadcast %78 : f32 to vector<8x128xf32>
      %114 = arith.select %112, %113, %arg9 : vector<8x128xi1>, vector<8x128xf32>
      %115 = vector.broadcast %110 : f32 to vector<8x128xf32>
      %116 = arith.select %112, %115, %arg10 : vector<8x128xi1>, vector<8x128xf32>
      scf.yield %114, %116 : vector<8x128xf32>, vector<8x128xf32>
    }
    %c2_i32_20 = arith.constant 2 : i32
    %c0_21 = arith.constant 0 : index
    %c0_22 = arith.constant 0 : index
    %c0_23 = arith.constant 0 : index
    %c0_24 = arith.constant 0 : index
    %c0_25 = arith.constant 0 : index
    %61 = vector.load %arg7[%c0_21, %c0_22, %c0_23, %c0_24, %c0_25] : memref<1x1x2x8x128xf32, #tpu.memory_space<vmem>>, vector<1x1x1x8x128xf32>
    %62 = vector.shape_cast %61 : vector<1x1x1x8x128xf32> to vector<8x128xf32>
    %63 = vector.shape_cast %60#0 : vector<8x128xf32> to vector<1x1x1x8x128xf32>
    tpu.vector_store %arg7[%c0_21, %c0_22, %c0_23, %c0_24, %c0_25], %63 {strides = array<i32>} : memref<1x1x2x8x128xf32, #tpu.memory_space<vmem>>, vector<1x1x1x8x128xf32>,
    %c0_26 = arith.constant 0 : index
    %c0_27 = arith.constant 0 : index
    %c1 = arith.constant 1 : index
    %c0_28 = arith.constant 0 : index
    %c0_29 = arith.constant 0 : index
    %64 = vector.load %arg7[%c0_26, %c0_27, %c1, %c0_28, %c0_29] : memref<1x1x2x8x128xf32, #tpu.memory_space<vmem>>, vector<1x1x1x8x128xf32>
    %65 = vector.shape_cast %64 : vector<1x1x1x8x128xf32> to vector<8x128xf32>
    %66 = vector.shape_cast %60#1 : vector<8x128xf32> to vector<1x1x1x8x128xf32>
    tpu.vector_store %arg7[%c0_26, %c0_27, %c1, %c0_28, %c0_29], %66 {strides = array<i32>} : memref<1x1x2x8x128xf32, #tpu.memory_space<vmem>>, vector<1x1x1x8x128xf32>,
    return
  }
  func.func @transform_0(%arg0: i32, %arg1: i32) -> (i32, i32, i32) {
    %c0_i32 = arith.constant 0 : i32
    %c0_i32_0 = arith.constant 0 : i32
    %c0_i32_1 = arith.constant 0 : i32
    return %arg0, %c0_i32, %c0_i32_0 : i32, i32, i32
  }
  func.func @transform_1(%arg0: i32, %arg1: i32) -> (i32, i32, i32) {
    %c0_i32 = arith.constant 0 : i32
    %c0_i32_0 = arith.constant 0 : i32
    return %arg0, %arg1, %c0_i32 : i32, i32, i32
  }
  func.func @transform_2(%arg0: i32, %arg1: i32) -> (i32, i32, i32, i32) {
    %c0_i32 = arith.constant 0 : i32
    %c0_i32_0 = arith.constant 0 : i32
    %c0_i32_1 = arith.constant 0 : i32
    %c0_i32_2 = arith.constant 0 : i32
    return %c0_i32, %arg0, %c0_i32_0, %c0_i32_1 : i32, i32, i32, i32
  }
  func.func @transform_3(%arg0: i32, %arg1: i32) -> (i32, i32, i32, i32) {
    %c0_i32 = arith.constant 0 : i32
    %c0_i32_0 = arith.constant 0 : i32
    %c0_i32_1 = arith.constant 0 : i32
    return %c0_i32, %arg0, %arg1, %c0_i32_0 : i32, i32, i32, i32
  }
  func.func @transform_4(%arg0: i32, %arg1: i32) -> (i32, i32, i32) {
    %c0_i32 = arith.constant 0 : i32
    %c0_i32_0 = arith.constant 0 : i32
    return %arg0, %arg1, %c0_i32 : i32, i32, i32
  }
  func.func @transform_5(%arg0: i32, %arg1: i32) -> (i32, i32, i32, i32, i32) {
    %c0_i32 = arith.constant 0 : i32
    %c0_i32_0 = arith.constant 0 : i32
    %c0_i32_1 = arith.constant 0 : i32
    %c0_i32_2 = arith.constant 0 : i32
    return %arg0, %arg1, %c0_i32, %c0_i32_0, %c0_i32_1 : i32, i32, i32, i32, i32
  }
}

</mosaic_0001>

<bundles_post_ra>
// kernel: _loss_sums.1
= control target key start
LH: loop header
LB: loop body
LE: loop exit
PB: predicated region body
PF: predicated region fallthrough
CT: control target
= control target key end

     0   :  { %s3483_s18 = smov 0   ;;  %s3485_s19 = smov 0   ;;  %s6005_s0 = inlined_call_operand.vmem [shape: f32[2,3,256], index: 0, kind: input, shape index: {}]   ;;  %s6006_s1 = inlined_call_operand.vmem [shape: f32[2,256,3], index: 1, kind: input, shape index: {}]   ;;  %s6007_s2 = inlined_call_operand.vmem [shape: f32[2,2,3,256], index: 2, kind: input, shape index: {}]   ;;  %s6008_s3 = inlined_call_operand.vmem [shape: f32[2,2,256,3], index: 3, kind: input, shape index: {}]   ;;  %s6009_s4 = inlined_call_operand.vmem [shape: f32[2,256,3], index: 4, kind: input, shape index: {}]   ;;  %s6010_s5 = inlined_call_operand.vmem [shape: f32[2,2,2,8,128], index: 5, kind: output, shape index: {}]  }
   0x1   :  { %s3487_s20 = smov 0   ;;  %s3489_s21 = smov 0  }
   0x2   :  { %s3491_s22 = smov 0   ;;  %s3493_s23 = smov 0  }
   0x3   :  { %s3495_s24 = smov 0   ;;  %s3497_s25 = smov 0  }
   0x4   :  { %s3499_s26 = smov 0  }
   0x5 LB: > { %s24_s27 = sadd.s32 1, %s3430_s24  ;;  %s27_s28 = sadd.s32 1, %s3434_s25  ;;  %s3438_s26 = sphi %s3499_s26, %s15_s26   ;;  %s3434_s25 = sphi %s3497_s25, %s7024_s25   ;;  %s3430_s24 = sphi %s3495_s24, %s7023_s24   ;;  %s3426_s23 = sphi %s3493_s23, %s7022_s23   ;;  %s3422_s22 = sphi %s3491_s22, %s7021_s22   ;;  %s3418_s21 = sphi %s3489_s21, %s7020_s21   ;;  %s3414_s20 = sphi %s3487_s20, %s7019_s20   ;;  %s3410_s19 = sphi %s3485_s19, %s7018_s19   ;;  %s3406_s18 = sphi %s3483_s18, %s7017_s18  }
   0x6   : > { %p25_p0 = scmp.ge.s32.totalorder %s24_s27, 2  ;;  %p95_p1 = scmp.ne.s32.totalorder %s3418_s21, %s3414_s20 }
   0x7   : > { %p96_p2 = scmp.eq.s32.totalorder %s3438_s26, 0  ;;  %p123_p5 = scmp.ne.s32.totalorder %s3410_s19, %s3406_s18 }
   0x8   : > { %s7026_s27 = smov (%p25_p0, %s24_s27), 0  ;;  %s7028_s28 = smov (!%p25_p0, %s27_s28), %s3434_s25 }
   0x9   : > { %p3536_p3 = por %p96_p2, %p95_p1  ;;  %p29_p4 = scmp.ge.s32.totalorder %s7028_s28, 2 }
   0xa   : > { %s112_s30 = ssub.s32 %s3430_s24, %s7026_s27  ;;  %s88_s6 = sadd.s32 1, %s3418_s21 }
   0xb   : > { %s7030_s28 = smov (%p29_p4, %s7028_s28), 0  ;;  %p3547_p6 = por %p123_p5, %p96_p2 }
   0xc   : > { %6400 = sst [smem:[#allocation4_spill]] %s7030_s28  ;;  %s85_s8 = ssub.s32 %s3434_s25, %s7030_s28 }
   0xd   : > { %s116_s9 = sadd.s32 1, %s3410_s19  ;;  %p86_p7 = scmp.eq.s32.totalorder %s85_s8, 0 }
   0xe   : > { %s113_s10 = sor.u32 %s112_s30, %s85_s8  ;;  %p2926_p9 = scmp.ge.s32.totalorder %s3438_s26, 4 }
   0xf   : > { %p114_p8 = scmp.eq.s32.totalorder %s113_s10, 0 }
  0x10   : > { %s3555_s11 = scalar_select %p86_p7, %s3418_s21, %s88_s6  }
  0x11   : > { %s3558_s12 = scalar_select %p114_p8, %s3410_s19, %s116_s9  }
  0x12   : > { %205 = sbr.rel (%p2926_p9) target bundleno = 68 (0x44), region = 16 }
  0x17   : > { %229 = sbr.rel (!%p3536_p3) target bundleno = 29 (0x1d), region = 28  ;;  %s231_s13 = sand.u32 (%p3536_p3), 1, %s3418_s21  }
  0x18   : > { %s3244_s14 = sshll.u32 (%p3536_p3), %s3434_s25, 3  ;;  %s2927_s15 = sshll.u32 (%p3536_p3), %s231_s13, 4 }
  0x19   : > { %s236_s30 = scalar_lea.vmem (%p3536_p3), %s6007_s2, %s3244_s14  ;;  %s233_s6 = scalar_lea.vmem (%p3536_p3), [#allocation2], %s2927_s15 }
  0x1a   : > { %v267_v0 = vld [vmem:[%s236_s30] sm:$0xff] (%p3536_p3)  ;;  %v269_v1 = vld [vmem:[%s236_s30 + $0x10] sm:$0xff] (%p3536_p3) }
  0x1b   : > { %268 = vst [vmem:[%s233_s6] sm:$0xff] (%p3536_p3), %v267_v0 }
  0x1c   : > { %270 = vst [vmem:[%s233_s6 + $0x8] sm:$0xff] %v269_v1 }
  0x1d PF: > { %276 = sbr.rel (!%p3547_p6) target bundleno = 68 (0x44), region = 66  ;;  %s278_s29 = sand.u32 (%p3547_p6), 1, %s3410_s19  }
  0x1e   : > { %s2931_s8 = sshll.u32 (%p3547_p6), %s3430_s24, 4  ;;  %s2930_s9 = sshll.u32 (%p3547_p6), %s278_s29, 8 }
  0x1f   : > { %s2932_s10 = sshll.u32 (%p3547_p6), %s3434_s25, 5  ;;  %s3581_s7 = scalar_lea.vmem (%p3547_p6), [#allocation3], %s2930_s9 }
  0x20   : > { %s283_s13 = sadd.s32 (%p3547_p6), %s2932_s10, %s2931_s8 }
  0x21   : > { %s2933_s28 = sshll.u32 (%p3547_p6), %s283_s13, 3 }
  0x22   : > { %s3576_s17 = scalar_lea.vmem %s6008_s3, %s2933_s28 }
  0x23   : > { %v376_v2 = vld [vmem:[%s3576_s17] sm:$0xff]  ;;  %v378_v3 = vld [vmem:[%s3576_s17 + $0x8] sm:$0xff]  ;;  %v380_v4 = vld [vmem:[%s3576_s17 + $0x10] sm:$0xff] }
  0x24   : > { %377 = vst [vmem:[%s3581_s7] sm:$0xff] %v376_v2  ;;  %v382_v5 = vld [vmem:[%s3576_s17 + $0x18] sm:$0xff]  ;;  %v384_v6 = vld [vmem:[%s3576_s17 + $0x20] sm:$0xff]  ;;  %v386_v7 = vld [vmem:[%s3576_s17 + $0x28] sm:$0xff] }
  0x25   : > { %379 = vst [vmem:[%s3581_s7 + $0x8] sm:$0xff] %v378_v3  ;;  %v388_v8 = vld [vmem:[%s3576_s17 + $0x30] sm:$0xff]  ;;  %v390_v9 = vld [vmem:[%s3576_s17 + $0x38] sm:$0xff]  ;;  %v392_v10 = vld [vmem:[%s3576_s17 + $0x40] sm:$0xff] }
  0x26   : > { %381 = vst [vmem:[%s3581_s7 + $0x10] sm:$0xff] %v380_v4  ;;  %v394_v11 = vld [vmem:[%s3576_s17 + $0x48] sm:$0xff]  ;;  %v396_v12 = vld [vmem:[%s3576_s17 + $0x50] sm:$0xff]  ;;  %v398_v13 = vld [vmem:[%s3576_s17 + $0x58] sm:$0xff] }
  0x27   : > { %383 = vst [vmem:[%s3581_s7 + $0x18] sm:$0xff] %v382_v5  ;;  %v400_v14 = vld [vmem:[%s3576_s17 + $0x60] sm:$0xff]  ;;  %v402_v15 = vld [vmem:[%s3576_s17 + $0x68] sm:$0xff]  ;;  %v404_v16 = vld [vmem:[%s3576_s17 + $0x70] sm:$0xff] }
  0x28   : > { %385 = vst [vmem:[%s3581_s7 + $0x20] sm:$0xff] %v384_v6  ;;  %v406_v17 = vld [vmem:[%s3576_s17 + $0x78] sm:$0xff]  ;;  %v408_v18 = vld [vmem:[%s3576_s17 + $0x200] sm:$0xff]  ;;  %v410_v19 = vld [vmem:[%s3576_s17 + $0x208] sm:$0xff] }
  0x29   : > { %387 = vst [vmem:[%s3581_s7 + $0x28] sm:$0xff] %v386_v7  ;;  %v412_v20 = vld [vmem:[%s3576_s17 + $0x210] sm:$0xff]  ;;  %v414_v21 = vld [vmem:[%s3576_s17 + $0x218] sm:$0xff]  ;;  %v416_v22 = vld [vmem:[%s3576_s17 + $0x220] sm:$0xff] }
  0x2a   : > { %389 = vst [vmem:[%s3581_s7 + $0x30] sm:$0xff] %v388_v8  ;;  %v418_v23 = vld [vmem:[%s3576_s17 + $0x228] sm:$0xff]  ;;  %v420_v24 = vld [vmem:[%s3576_s17 + $0x230] sm:$0xff]  ;;  %v422_v25 = vld [vmem:[%s3576_s17 + $0x238] sm:$0xff] }
  0x2b   : > { %391 = vst [vmem:[%s3581_s7 + $0x38] sm:$0xff] %v390_v9  ;;  %v424_v26 = vld [vmem:[%s3576_s17 + $0x240] sm:$0xff]  ;;  %v426_v27 = vld [vmem:[%s3576_s17 + $0x248] sm:$0xff]  ;;  %v428_v28 = vld [vmem:[%s3576_s17 + $0x250] sm:$0xff] }
  0x2c   : > { %393 = vst [vmem:[%s3581_s7 + $0x40] sm:$0xff] %v392_v10  ;;  %v430_v29 = vld [vmem:[%s3576_s17 + $0x258] sm:$0xff]  ;;  %v432_v30 = vld [vmem:[%s3576_s17 + $0x260] sm:$0xff]  ;;  %v434_v31 = vld [vmem:[%s3576_s17 + $0x268] sm:$0xff] }
  0x2d   : > { %395 = vst [vmem:[%s3581_s7 + $0x48] sm:$0xff] %v394_v11  ;;  %v436_v32 = vld [vmem:[%s3576_s17 + $0x270] sm:$0xff]  ;;  %v438_v33 = vld [vmem:[%s3576_s17 + $0x278] sm:$0xff] }
  0x2e   : > { %397 = vst [vmem:[%s3581_s7 + $0x50] sm:$0xff] %v396_v12 }
  0x2f   : > { %399 = vst [vmem:[%s3581_s7 + $0x58] sm:$0xff] %v398_v13 }
  0x30   : > { %401 = vst [vmem:[%s3581_s7 + $0x60] sm:$0xff] %v400_v14 }
  0x31   : > { %403 = vst [vmem:[%s3581_s7 + $0x68] sm:$0xff] %v402_v15 }
  0x32   : > { %405 = vst [vmem:[%s3581_s7 + $0x70] sm:$0xff] %v404_v16 }
  0x33   : > { %407 = vst [vmem:[%s3581_s7 + $0x78] sm:$0xff] %v406_v17 }
  0x34   : > { %409 = vst [vmem:[%s3581_s7 + $0x80] sm:$0xff] %v408_v18 }
  0x35   : > { %411 = vst [vmem:[%s3581_s7 + $0x88] sm:$0xff] %v410_v19 }
  0x36   : > { %413 = vst [vmem:[%s3581_s7 + $0x90] sm:$0xff] %v412_v20 }
  0x37   : > { %415 = vst [vmem:[%s3581_s7 + $0x98] sm:$0xff] %v414_v21 }
  0x38   : > { %417 = vst [vmem:[%s3581_s7 + $0xa0] sm:$0xff] %v416_v22 }
  0x39   : > { %419 = vst [vmem:[%s3581_s7 + $0xa8] sm:$0xff] %v418_v23 }
  0x3a   : > { %421 = vst [vmem:[%s3581_s7 + $0xb0] sm:$0xff] %v420_v24 }
  0x3b   : > { %423 = vst [vmem:[%s3581_s7 + $0xb8] sm:$0xff] %v422_v25 }
  0x3c   : > { %425 = vst [vmem:[%s3581_s7 + $0xc0] sm:$0xff] %v424_v26 }
  0x3d   : > { %427 = vst [vmem:[%s3581_s7 + $0xc8] sm:$0xff] %v426_v27 }
  0x3e   : > { %429 = vst [vmem:[%s3581_s7 + $0xd0] sm:$0xff] %v428_v28 }
  0x3f   : > { %431 = vst [vmem:[%s3581_s7 + $0xd8] sm:$0xff] %v430_v29 }
  0x40   : > { %433 = vst [vmem:[%s3581_s7 + $0xe0] sm:$0xff] %v432_v30 }
  0x41   : > { %435 = vst [vmem:[%s3581_s7 + $0xe8] sm:$0xff] %v434_v31 }
  0x42   : > { %437 = vst [vmem:[%s3581_s7 + $0xf0] sm:$0xff] %v436_v32 }
  0x43   : > { %439 = vst [vmem:[%s3581_s7 + $0xf8] sm:$0xff] %v438_v33 }
  0x44 PF: > { %p2934_p10 = scmp.ge.s32.totalorder %s3438_s26, 1  ;;  %p457_p11 = scmp.lt.s32.totalorder %s3438_s26, 5 }
  0x46   : > { %p458_p12 = pnand %p2934_p10, %p457_p11 }
  0x48   : > { %461 = sbr.rel (%p458_p12) target bundleno = 1395 (0x573), region = 108 }
  0x4d   : > { %s464_s28 = sand.u32 1, %s3414_s20   ;;  %s471_s15 = sand.u32 1, %s3406_s18   ;;  %vm604_vm0 = vcmask 1042432   ;;  %vm6012_vm1 = vcmask 23552  }
  0x4e   : > { %s3648_s30 = sshll.u32 %s464_s28, 4  ;;  %s3650_s6 = sshll.u32 %s471_s15, 8 }
  0x4f   : > { %p529_p13 = scmp.lt.s32.totalorder %s3426_s23, 1  ;;  %s2939_s29 = sshll.u32 %s3422_s22, 4 }
  0x50   : > { %p537_p0 = scmp.lt.s32.totalorder %s2939_s29, 31  ;;  %p557_p1 = scmp.lt.s32.totalorder %s3422_s22, 1 }
  0x51   : > { %s7032_s23 = smov (!%p529_p13, %s3426_s23), 1  ;;  %s5064_s18 = smov 0  }
  0x52   : > { %s7034_s29 = smov (!%p537_p0, %s2939_s29), 31  ;;  %s3245_s8 = sshll.u32 %s7032_s23, 3 }
  0x53   : > { %s2940_s9 = sshll.u32 %s7032_s23, 5  ;;  %s533_s16 = scalar_lea.vmem %s6005_s0, %s3245_s8 }
  0x54   : > { %s540_s14 = sadd.s32 %s2940_s9, %s7034_s29  ;;  %v564_v34 = vld [vmem:[%s533_s16] sm:$0x77]  ;;  %s2946_s28 = sshll.u32 %s7032_s23, 2 }
  0x55   : > { %s2941_s20 = sshll.u32 %s540_s14, 3  ;;  %v597_v35 = vmul.f32 %v564_v34, %v564_v34  ;;  %s7036_s22 = smov (!%p557_p1, %s3422_s22), 1 }
  0x56   : > { %s553_s7 = scalar_lea.vmem %s6009_s4, %s2941_s20  ;;  %s3678_s8 = scalar_lea.vmem %s6006_s1, %s2941_s20 }
  0x57   : > { %v3663_v36 = vld [vmem:[%s553_s7] sm:$0xff]  ;;  %v3665_v37 = vld [vmem:[%s553_s7 + $0x8] sm:$0xff]  ;;  %v3667_v38 = vld [vmem:[%s553_s7 + $0x10] sm:$0xff]  ;;  %599 = vst [vmem:[#allocation1] ss:$2 sm:$0xff] %v597_v35  ;;  %s2945_s23 = sshll.u32 %s7036_s22, 1 }
  0x58   : > { %6402 = vst [vmem:[#allocation5_spill] sm:$0xff] %v3663_v36  ;;  %v3669_v39 = vld [vmem:[%s553_s7 + $0x18] sm:$0xff]  ;;  %v3671_v40 = vld [vmem:[%s553_s7 + $0x20] sm:$0xff]  ;;  %v3673_v41 = vld [vmem:[%s553_s7 + $0x28] sm:$0xff]  ;;  %s561_s9 = sadd.s32 %s2946_s28, %s2945_s23  ;;  %s466_s14 = scalar_lea.vmem [#allocation2], %s3648_s30 }
  0x59   : > { %6403 = vst [vmem:[#allocation6_spill] sm:$0xff] %v3665_v37  ;;  %v3680_v42 = vld [vmem:[%s553_s7 + $0x30] sm:$0xff]  ;;  %v3682_v43 = vld [vmem:[%s553_s7 + $0x38] sm:$0xff]  ;;  %v3684_v44 = vld [vmem:[%s553_s7 + $0x40] sm:$0xff]  ;;  %s2947_s10 = sshll.u32 %s561_s9, 3  ;;  %s473_s20 = scalar_lea.vmem [#allocation3], %s3650_s6 }
  0x5a   : > { %6404 = vst [vmem:[#allocation7_spill] sm:$0xff] %v3667_v38  ;;  %v3686_v45 = vld [vmem:[%s553_s7 + $0x48] sm:$0xff]  ;;  %v3688_v46 = vld [vmem:[%s553_s7 + $0x50] sm:$0xff]  ;;  %v3690_v47 = vld [vmem:[%s553_s7 + $0x58] sm:$0xff]  ;;  %s3701_s16 = scalar_lea.vmem %s6010_s5, %s2947_s10 }
  0x5b   : > { %6405 = vst [vmem:[#allocation8_spill] sm:$0xff] %v3669_v39  ;;  %v3692_v48 = vld [vmem:[%s553_s7 + $0x60] sm:$0xff]  ;;  %v3694_v49 = vld [vmem:[%s553_s7 + $0x68] sm:$0xff]  ;;  %v3696_v50 = vld [vmem:[%s553_s7 + $0x70] sm:$0xff] }
  0x5c   : > { %6406 = vst [vmem:[#allocation9_spill] sm:$0xff] %v3671_v40  ;;  %v3703_v51 = vld [vmem:[%s553_s7 + $0x78] sm:$0xff]  ;;  %v565_v52 = vld [vmem:[%s3678_s8] sm:$0xff]  ;;  %v567_v56 = vld [vmem:[%s3678_s8 + $0x10] sm:$0xff] }
  0x5d   : > { %6407 = vst [vmem:[#allocation10_spill] sm:$0xff] %v3673_v41  ;;  %v3707_v53 = vld [vmem:[%s3678_s8 + $0x20] sm:$0xff]  ;;  %v619_v54 = vmul.f32 %v565_v52, %v565_v52  ;;  %v621_v59 = vmul.f32 %v567_v56, %v567_v56  ;;  %v566_v1 = vld [vmem:[%s3678_s8 + $0x8] sm:$0xff]  ;;  %v568_v3 = vld [vmem:[%s3678_s8 + $0x18] sm:$0xff] }
  0x5e   : > { %6408 = vst [vmem:[#allocation11_spill] sm:$0xff] %v3680_v42  ;;  %v623_v55 = vmul.f32 %v3707_v53, %v3707_v53  ;;  %v600_v57 = vld.sshfl [vmem:[#allocation1] sm:$0xff pattern:$0x75316420]  ;;  %v3723_v2 = vld [vmem:[%s3678_s8 + $0x28] sm:$0xff]  ;;  %v620_v5 = vmul.f32 %v566_v1, %v566_v1  ;;  %v622_v7 = vmul.f32 %v568_v3, %v568_v3  ;;  %v3739_v13 = vld [vmem:[%s3678_s8 + $0x30] sm:$0xff] }
  0x5f   : > { %6409 = vst [vmem:[#allocation12_spill] sm:$0xff] %v3682_v43  ;;  %v601_v58 = vld.sshfl [vmem:[#allocation1 + $0x8] sm:$0xff pattern:$0x75316420]  ;;  %v3713_v60 = vsel %vm604_vm0, %v600_v57, 0.0  ;;  %v636_v63 = vsel %vm6012_vm1, %v619_v54, 0.0  ;;  %v624_v4 = vmul.f32 %v3723_v2, %v3723_v2  ;;  %v625_v16 = vmul.f32 %v3739_v13, %v3739_v13 }
  0x60   : > { %6410 = vst [vmem:[#allocation13_spill] sm:$0xff] %v3684_v44  ;;  %v3716_v61 = vsel %vm604_vm0, %v601_v58, 0.0  ;;  %v648_v62 = vsel %vm6012_vm1, %v623_v55, 0.0  ;;  %637 = vadd.xlane.f32.xlu0 %v636_v63  ;;  %v642_v0 = vsel %vm6012_vm1, %v621_v59, 0.0  ;;  %v573_v6 = vld [vmem:[%s3678_s8 + $0x40] sm:$0xff]  ;;  %v639_v11 = vsel %vm6012_vm1, %v620_v5, 0.0 }
  0x61   : > { %6411 = vst [vmem:[#allocation14_spill] sm:$0xff] %v3686_v45  ;;  %649 = vadd.xlane.f32.xlu2 %v648_v62  ;;  %643 = vadd.xlane.f32.xlu1 %v642_v0  ;;  %v651_v10 = vsel %vm6012_vm1, %v624_v4, 0.0  ;;  %v645_v12 = vsel %vm6012_vm1, %v622_v7, 0.0  ;;  %v3744_v14 = vld [vmem:[%s3678_s8 + $0x38] sm:$0xff]  ;;  %v627_v15 = vmul.f32 %v573_v6, %v573_v6  ;;  %v574_v18 = vld [vmem:[%s3678_s8 + $0x48] sm:$0xff]  ;;  %v654_v20 = vsel %vm6012_vm1, %v625_v16, 0.0 }
  0x62   : > { %6412 = vst [vmem:[#allocation15_spill] sm:$0xff] %v3688_v46  ;;  %v626_v17 = vmul.f32 %v3744_v14, %v3744_v14  ;;  %v576_v22 = vld [vmem:[%s3678_s8 + $0x58] sm:$0xff]  ;;  %v575_v23 = vld [vmem:[%s3678_s8 + $0x50] sm:$0xff]  ;;  %v628_v24 = vmul.f32 %v574_v18, %v574_v18  ;;  %v577_v30 = vld [vmem:[%s3678_s8 + $0x60] sm:$0xff]  ;;  %v613_v59 = vrot.slane %v3716_v61, 4  ;;  %v998_v0 = vlaneseq }
  0x63   : > { %6413 = vst [vmem:[#allocation16_spill] sm:$0xff] %v3690_v47  ;;  %v660_v19 = vsel %vm6012_vm1, %v627_v15, 0.0  ;;  %v630_v25 = vmul.f32 %v576_v22, %v576_v22  ;;  %v629_v26 = vmul.f32 %v575_v23, %v575_v23  ;;  %v631_v31 = vmul.f32 %v577_v30, %v577_v30  ;;  %v578_v33 = vld [vmem:[%s3678_s8 + $0x68] sm:$0xff]  ;;  %v580_v54 = vld [vmem:[%s3678_s8 + $0x78] sm:$0xff] }
  0x64   : > { %6414 = vst [vmem:[#allocation17_spill] sm:$0xff] %v3692_v48  ;;  %v657_v21 = vsel %vm6012_vm1, %v626_v17, 0.0  ;;  %v663_v27 = vsel %vm6012_vm1, %v628_v24, 0.0  ;;  %v632_v35 = vmul.f32 %v578_v33, %v578_v33  ;;  %v634_v57 = vmul.f32 %v580_v54, %v580_v54 }
  0x65   : > { %6415 = vst [vmem:[#allocation18_spill] sm:$0xff] %v3694_v49  ;;  %v669_v28 = vsel %vm6012_vm1, %v630_v25, 0.0  ;;  %v666_v29 = vsel %vm6012_vm1, %v629_v26, 0.0  ;;  %v672_v32 = vsel %vm6012_vm1, %v631_v31, 0.0  ;;  %v614_v63 = vadd.f32 %v613_v59, %v3716_v61 }
  0x66   : > { %6416 = vst [vmem:[#allocation19_spill] sm:$0xff] %v3696_v50  ;;  %v675_v55 = vsel %vm6012_vm1, %v632_v35, 0.0  ;;  %v681_v58 = vsel %vm6012_vm1, %v634_v57, 0.0 }
  0x67   : > { %6417 = vst [vmem:[#allocation20_spill] sm:$0xff] %v3703_v51  ;;  %v615_v4 = vrot.slane %v614_v63, 2 }
  0x68   : > { %685 = vst [vmem:[#allocation1] ss:$2 sm:$0xff] %v564_v34  ;;  %640 = vadd.xlane.f32.xlu0 %v639_v11  ;;  %v579_v34 = vld [vmem:[%s3678_s8 + $0x70] sm:$0xff] }
  0x69   : > { %652 = vadd.xlane.f32.xlu2 %v651_v10  ;;  %646 = vadd.xlane.f32.xlu1 %v645_v12  ;;  %v616_v7 = vadd.f32 %v615_v4, %v614_v63 }
  0x6b   : > { %v617_v10 = vrot.slane %v616_v7, 1 }
  0x6d   : > { %v3817_v61 = vadd.f32 %v617_v10, %v616_v7 }
  0x6f   : > { %v686_v8 = vld.sshfl [vmem:[#allocation1] sm:$0xff pattern:$0x75316420]  ;;  %v687_v9 = vld.sshfl [vmem:[#allocation1 + $0x8] sm:$0xff pattern:$0x75316420] }
  0x70   : > { %2948 = vmatpush.msk.msra.mxu0 %vm604_vm0, %v686_v8  ;;  %3247 = vmatpush.msk.msra.mxu2 %vm604_vm0, %v686_v8 }
  0x71   : > { %2965 = vmatpush.msk.msra.mxu1 %vm604_vm0, %v687_v9  ;;  %3248 = vmatpush.msk.msra.mxu3 %vm604_vm0, %v687_v9 }
  0x72   : > { %2949 = vmatmul.msk.f32.vlgmr.msra.gmra.mxu0 %vm6012_vm1, %v565_v52  ;;  %2957 = vmatmul.msk.f32.vlgmr.msra.gmra.mxu2 %vm6012_vm1, %v573_v6 }
  0x73   : > { %2966 = vmatmul.msk.f32.vlgmr.msra.gmra.mxu1 %vm6012_vm1, %v565_v52  ;;  %2974 = vmatmul.msk.f32.vlgmr.msra.gmra.mxu3 %vm6012_vm1, %v573_v6  ;;  %v633_v52 = vmul.f32 %v579_v34, %v579_v34 }
  0x74   : > { %661 = vadd.xlane.f32.xlu2 %v660_v19  ;;  %655 = vadd.xlane.f32.xlu0 %v654_v20  ;;  %v3821_v19 = vand.u32 127, %v998_v0 }
  0x75   : > { %658 = vadd.xlane.f32.xlu1 %v657_v21 }
  0x76   : > { %v3828_v31 = vadd.s32 128, %v3821_v19 }
  0x7a   : > { %2950 = vmatmul.msk.f32.gmra.mxu0 %vm6012_vm1, %v566_v1  ;;  %2958 = vmatmul.msk.f32.gmra.mxu2 %vm6012_vm1, %v574_v18 }
  0x7b   : > { %2967 = vmatmul.msk.f32.gmra.mxu1 %vm6012_vm1, %v566_v1  ;;  %2975 = vmatmul.msk.f32.gmra.mxu3 %vm6012_vm1, %v574_v18 }
  0x7c   : > { %664 = vadd.xlane.f32.xlu0 %v663_v27  ;;  %670 = vadd.xlane.f32.xlu2 %v669_v28 }
  0x7d   : > { %667 = vadd.xlane.f32.xlu1 %v666_v29 }
  0x82   : > { %2951 = vmatmul.msk.f32.gmra.mxu0 %vm6012_vm1, %v567_v56  ;;  %2959 = vmatmul.msk.f32.gmra.mxu2 %vm6012_vm1, %v575_v23 }
  0x83   : > { %2968 = vmatmul.msk.f32.gmra.mxu1 %vm6012_vm1, %v567_v56  ;;  %2976 = vmatmul.msk.f32.gmra.mxu3 %vm6012_vm1, %v575_v23  ;;  %v678_v56 = vsel %vm6012_vm1, %v633_v52, 0.0 }
  0x84   : > { %673 = vadd.xlane.f32.xlu0 %v672_v32  ;;  %679 = vadd.xlane.f32.xlu2 %v678_v56 }
  0x85   : > { %676 = vadd.xlane.f32.xlu1 %v675_v55 }
  0x8a   : > { %2952 = vmatmul.msk.f32.gmra.mxu0 %vm6012_vm1, %v568_v3  ;;  %2960 = vmatmul.msk.f32.gmra.mxu2 %vm6012_vm1, %v576_v22 }
  0x8b   : > { %2969 = vmatmul.msk.f32.gmra.mxu1 %vm6012_vm1, %v568_v3  ;;  %2977 = vmatmul.msk.f32.gmra.mxu3 %vm6012_vm1, %v576_v22 }
  0x8c   : > { %682 = vadd.xlane.f32.xlu0 %v681_v58 }
  0x92   : > { %2953 = vmatmul.msk.f32.gmra.mxu0 %vm6012_vm1, %v3707_v53  ;;  %2961 = vmatmul.msk.f32.gmra.mxu2 %vm6012_vm1, %v577_v30 }
  0x93   : > { %2970 = vmatmul.msk.f32.gmra.mxu1 %vm6012_vm1, %v3707_v53  ;;  %2978 = vmatmul.msk.f32.gmra.mxu3 %vm6012_vm1, %v577_v30  ;;  %v606_v53 = vrot.slane %v3713_v60, 4 }
  0x95   : > { %v607_v62 = vadd.f32 %v606_v53, %v3713_v60 }
  0x97   : > { %v608_v3 = vrot.slane %v607_v62, 2 }
  0x99   : > { %v609_v6 = vadd.f32 %v608_v3, %v607_v62 }
  0x9a   : > { %2954 = vmatmul.msk.f32.gmra.mxu0 %vm6012_vm1, %v3723_v2  ;;  %2962 = vmatmul.msk.f32.gmra.mxu2 %vm6012_vm1, %v578_v33 }
  0x9b   : > { %2971 = vmatmul.msk.f32.gmra.mxu1 %vm6012_vm1, %v3723_v2  ;;  %2979 = vmatmul.msk.f32.gmra.mxu3 %vm6012_vm1, %v578_v33  ;;  %v3807_v2 = vshrl.u32 %v998_v0, 7  ;;  %v610_v9 = vrot.slane %v609_v6, 1 }
  0x9d   : > { %6418 = vst [vmem:[#allocation21_spill] sm:$0xff] %v3807_v2  ;;  %v3815_v60 = vadd.f32 %v610_v9, %v609_v6 }
  0xa2   : > { %2955 = vmatmul.msk.f32.gmra.mxu0 %vm6012_vm1, %v3739_v13  ;;  %2963 = vmatmul.msk.f32.gmra.mxu2 %vm6012_vm1, %v579_v34 }
  0xa3   : > { %2972 = vmatmul.msk.f32.gmra.mxu1 %vm6012_vm1, %v3739_v13  ;;  %2980 = vmatmul.msk.f32.gmra.mxu3 %vm6012_vm1, %v579_v34 }
  0xaa   : > { %2956 = vmatmul.msk.f32.gmra.mxu0 %vm6012_vm1, %v3744_v14  ;;  %2964 = vmatmul.msk.f32.gmra.mxu2 %vm6012_vm1, %v580_v54 }
  0xab   : > { %2973 = vmatmul.msk.f32.gmra.mxu1 %vm6012_vm1, %v3744_v14  ;;  %2981 = vmatmul.msk.f32.gmra.mxu3 %vm6012_vm1, %v580_v54 }
  0xd3   : > { %v638_v1 = vpop.xlane.xlu0 %637 }
  0xd4   : > { %v3809_v5 = vpop.xlane.xlu2 %649  ;;  %v3811_v8 = vpop.xlane.xlu1 %643 }
  0xdb   : > { %v641_v11 = vpop.xlane.xlu0 %640 }
  0xdc   : > { %v3813_v12 = vpop.xlane.xlu2 %652  ;;  %v3823_v20 = vpop.xlane.xlu1 %646 }
  0xe7   : > { %v3825_v24 = vpop.xlane.xlu0 %655  ;;  %v662_v32 = vpop.xlane.xlu2 %661 }
  0xe8   : > { %v3842_v9 = vpop.xlane.xlu1 %658 }
  0xef   : > { %v757_v13 = vpop.f32.mrf.mxu0 }
  0xf0   : > { %v870_v14 = vmul.f32 2.0, %v757_v13  ;;  %v822_v15 = vpop.f32.mrf.mxu1 }
  0xf1   : > { %v871_v16 = vmul.f32 2.0, %v822_v15 }
  0xf2   : > { %v902_v17 = vsub.f32 %v3815_v60, %v870_v14 }
  0xf3   : > { %v903_v18 = vsub.f32 %v3817_v61, %v871_v16 }
  0xf4   : > { %v934_v21 = vadd.f32 %v902_v17, %v638_v1 }
  0xf5   : > { %v935_v22 = vadd.f32 %v903_v18, %v638_v1  ;;  %v781_v23 = vpop.f32.mrf.mxu2 }
  0xf6   : > { %v966_v25 = vmax.f32 %v934_v21, 0.0  ;;  %v886_v26 = vmul.f32 2.0, %v781_v23  ;;  %v846_v27 = vpop.f32.mrf.mxu3 }
  0xf7   : > { %v967_v28 = vmax.f32 %v935_v22, 0.0  ;;  %v887_v29 = vmul.f32 2.0, %v846_v27  ;;  %v760_v30 = vpop.f32.mrf.mxu0  ;;  %v665_v22 = vpop.xlane.xlu0 %664 }
  0xf8   : > { %v1033_v33 = vand.u32 4294967040, %v966_v25  ;;  %v918_v34 = vsub.f32 %v3815_v60, %v886_v26  ;;  %v872_v35 = vmul.f32 2.0, %v760_v30  ;;  %v825_v52 = vpop.f32.mrf.mxu1 }
  0xf9   : > { %v1034_v54 = vand.u32 4294967040, %v967_v28  ;;  %v919_v55 = vsub.f32 %v3817_v61, %v887_v29  ;;  %v873_v56 = vmul.f32 2.0, %v825_v52 }
  0xfa   : > { %v904_v57 = vsub.f32 %v3815_v60, %v872_v35  ;;  %v950_v58 = vadd.f32 %v918_v34, %v662_v32  ;;  %v3834_v53 = vor.u32 %v1033_v33, %v3821_v19 }
  0xfb   : > { %v905_v59 = vsub.f32 %v3817_v61, %v873_v56  ;;  %v951_v62 = vadd.f32 %v919_v55, %v662_v32  ;;  %v3838_v63 = vor.u32 %v1034_v54, %v3828_v31 }
  0xfc   : > { %6419 = vst [vmem:[#allocation22_spill] sm:$0xff] %v3834_v53  ;;  %v936_v0 = vadd.f32 %v904_v57, %v641_v11  ;;  %v982_v1 = vmax.f32 %v950_v58, 0.0 }
  0xfd   : > { %6420 = vst [vmem:[#allocation23_spill] sm:$0xff] %v3838_v63  ;;  %v937_v3 = vadd.f32 %v905_v59, %v641_v11  ;;  %v983_v4 = vmax.f32 %v951_v62, 0.0  ;;  %v784_v6 = vpop.f32.mrf.mxu2  ;;  %v1129_v7 = vmin.f32 %v3834_v53, %v3838_v63 }
  0xfe   : > { %v968_v10 = vmax.f32 %v936_v0, 0.0  ;;  %v1049_v13 = vand.u32 4294967040, %v982_v1  ;;  %v888_v14 = vmul.f32 2.0, %v784_v6  ;;  %v849_v15 = vpop.f32.mrf.mxu3 }
  0xff   : > { %v969_v16 = vmax.f32 %v937_v3, 0.0  ;;  %v1050_v17 = vand.u32 4294967040, %v983_v4  ;;  %v889_v18 = vmul.f32 2.0, %v849_v15  ;;  %1130 = vmin.xlane.f32.xlu1 %v1129_v7  ;;  %v763_v21 = vpop.f32.mrf.mxu0 }
 0x100   : > { %v1035_v23 = vand.u32 4294967040, %v968_v10  ;;  %v3845_v11 = vor.u32 %v1049_v13, %v3821_v19  ;;  %v920_v25 = vsub.f32 %v3815_v60, %v888_v14  ;;  %v874_v26 = vmul.f32 2.0, %v763_v21  ;;  %v828_v27 = vpop.f32.mrf.mxu1 }
 0x101   : > { %v1036_v28 = vand.u32 4294967040, %v969_v16  ;;  %v3849_v29 = vor.u32 %v1050_v17, %v3828_v31  ;;  %v921_v30 = vsub.f32 %v3817_v61, %v889_v18  ;;  %v875_v32 = vmul.f32 2.0, %v828_v27  ;;  %v668_v16 = vpop.xlane.xlu1 %667 }
 0x102   : > { %6421 = vst [vmem:[#allocation24_spill] sm:$0xff] %v3845_v11  ;;  %v906_v33 = vsub.f32 %v3815_v60, %v874_v26  ;;  %v952_v34 = vadd.f32 %v920_v25, %v665_v22  ;;  %v3854_v35 = vor.u32 %v1035_v23, %v3821_v19 }
 0x103   : > { %6422 = vst [vmem:[#allocation25_spill] sm:$0xff] %v3849_v29  ;;  %v907_v52 = vsub.f32 %v3817_v61, %v875_v32  ;;  %v953_v54 = vadd.f32 %v921_v30, %v665_v22  ;;  %v1153_v55 = vmin.f32 %v3845_v11, %v3849_v29  ;;  %v3860_v56 = vor.u32 %v1036_v28, %v3828_v31 }
 0x104   : > { %6423 = vst [vmem:[#allocation26_spill] sm:$0xff] %v3854_v35  ;;  %v938_v57 = vadd.f32 %v906_v33, %v3811_v8  ;;  %v984_v58 = vmax.f32 %v952_v34, 0.0 }
 0x105   : > { %6424 = vst [vmem:[#allocation27_spill] sm:$0xff] %v3860_v56  ;;  %v939_v59 = vadd.f32 %v907_v52, %v3811_v8  ;;  %v985_v62 = vmax.f32 %v953_v54, 0.0  ;;  %1154 = vmin.xlane.f32.xlu0 %v1153_v55  ;;  %v787_v0 = vpop.f32.mrf.mxu2  ;;  %v1132_v1 = vmin.f32 %v3854_v35, %v3860_v56 }
 0x106   : > { %v970_v3 = vmax.f32 %v938_v57, 0.0  ;;  %v1051_v4 = vand.u32 4294967040, %v984_v58  ;;  %v890_v6 = vmul.f32 2.0, %v787_v0  ;;  %v852_v7 = vpop.f32.mrf.mxu3 }
 0x107   : > { %v971_v10 = vmax.f32 %v939_v59, 0.0  ;;  %v1052_v13 = vand.u32 4294967040, %v985_v62  ;;  %v891_v14 = vmul.f32 2.0, %v852_v7  ;;  %1133 = vmin.xlane.f32.xlu2 %v1132_v1  ;;  %v766_v15 = vpop.f32.mrf.mxu0 }
 0x108   : > { %v1037_v17 = vand.u32 4294967040, %v970_v3  ;;  %v3867_v18 = vor.u32 %v1051_v4, %v3821_v19  ;;  %v922_v8 = vsub.f32 %v3815_v60, %v890_v6  ;;  %v876_v21 = vmul.f32 2.0, %v766_v15  ;;  %v831_v22 = vpop.f32.mrf.mxu1  ;;  %v671_v15 = vpop.xlane.xlu2 %670 }
 0x109   : > { %v1038_v23 = vand.u32 4294967040, %v971_v10  ;;  %v3871_v25 = vor.u32 %v1052_v13, %v3828_v31  ;;  %v923_v26 = vsub.f32 %v3817_v61, %v891_v14  ;;  %v877_v27 = vmul.f32 2.0, %v831_v22 }
 0x10a   : > { %6425 = vst [vmem:[#allocation28_spill] sm:$0xff] %v3867_v18  ;;  %v908_v28 = vsub.f32 %v3815_v60, %v876_v21  ;;  %v954_v30 = vadd.f32 %v922_v8, %v668_v16  ;;  %v3876_v32 = vor.u32 %v1037_v17, %v3821_v19 }
 0x10b   : > { %6426 = vst [vmem:[#allocation29_spill] sm:$0xff] %v3871_v25  ;;  %v909_v33 = vsub.f32 %v3817_v61, %v877_v27  ;;  %v955_v34 = vadd.f32 %v923_v26, %v668_v16  ;;  %v1156_v52 = vmin.f32 %v3867_v18, %v3871_v25  ;;  %v3882_v54 = vor.u32 %v1038_v23, %v3828_v31 }
 0x10c   : > { %6427 = vst [vmem:[#allocation30_spill] sm:$0xff] %v3876_v32  ;;  %v940_v55 = vadd.f32 %v908_v28, %v3823_v20  ;;  %v986_v57 = vmax.f32 %v954_v30, 0.0 }
 0x10d   : > { %6428 = vst [vmem:[#allocation31_spill] sm:$0xff] %v3882_v54  ;;  %v941_v58 = vadd.f32 %v909_v33, %v3823_v20  ;;  %v987_v59 = vmax.f32 %v955_v34, 0.0  ;;  %1157 = vmin.xlane.f32.xlu1 %v1156_v52  ;;  %v790_v62 = vpop.f32.mrf.mxu2  ;;  %v1135_v0 = vmin.f32 %v3876_v32, %v3882_v54 }
 0x10e   : > { %v972_v1 = vmax.f32 %v940_v55, 0.0  ;;  %v1053_v3 = vand.u32 4294967040, %v986_v57  ;;  %v892_v4 = vmul.f32 2.0, %v790_v62  ;;  %v855_v6 = vpop.f32.mrf.mxu3 }
 0x10f   : > { %v973_v7 = vmax.f32 %v941_v58, 0.0  ;;  %v1054_v10 = vand.u32 4294967040, %v987_v59  ;;  %v893_v13 = vmul.f32 2.0, %v855_v6  ;;  %1136 = vmin.xlane.f32.xlu0 %v1135_v0  ;;  %v769_v14 = vpop.f32.mrf.mxu0 }
 0x110   : > { %v1039_v16 = vand.u32 4294967040, %v972_v1  ;;  %v3889_v17 = vor.u32 %v1053_v3, %v3821_v19  ;;  %v924_v20 = vsub.f32 %v3815_v60, %v892_v4  ;;  %v878_v8 = vmul.f32 2.0, %v769_v14  ;;  %v834_v21 = vpop.f32.mrf.mxu1  ;;  %v680_v2 = vpop.xlane.xlu2 %679 }
 0x111   : > { %v1040_v22 = vand.u32 4294967040, %v973_v7  ;;  %v3893_v23 = vor.u32 %v1054_v10, %v3828_v31  ;;  %v925_v26 = vsub.f32 %v3817_v61, %v893_v13  ;;  %v879_v27 = vmul.f32 2.0, %v834_v21 }
 0x112   : > { %6429 = vst [vmem:[#allocation32_spill] sm:$0xff] %v3889_v17  ;;  %v910_v28 = vsub.f32 %v3815_v60, %v878_v8  ;;  %v956_v30 = vadd.f32 %v924_v20, %v671_v15  ;;  %v3898_v33 = vor.u32 %v1039_v16, %v3821_v19  ;;  %v674_v20 = vpop.xlane.xlu0 %673 }
 0x113   : > { %6430 = vst [vmem:[#allocation33_spill] sm:$0xff] %v3893_v23  ;;  %v911_v34 = vsub.f32 %v3817_v61, %v879_v27  ;;  %v957_v52 = vadd.f32 %v925_v26, %v671_v15  ;;  %v1159_v55 = vmin.f32 %v3889_v17, %v3893_v23  ;;  %v3904_v57 = vor.u32 %v1040_v22, %v3828_v31 }
 0x114   : > { %6431 = vst [vmem:[#allocation34_spill] sm:$0xff] %v3898_v33  ;;  %v942_v58 = vadd.f32 %v910_v28, %v3809_v5  ;;  %v988_v59 = vmax.f32 %v956_v30, 0.0 }
 0x115   : > { %6432 = vst [vmem:[#allocation35_spill] sm:$0xff] %v3904_v57  ;;  %v943_v62 = vadd.f32 %v911_v34, %v3809_v5  ;;  %v989_v0 = vmax.f32 %v957_v52, 0.0  ;;  %1160 = vmin.xlane.f32.xlu2 %v1159_v55  ;;  %v793_v1 = vpop.f32.mrf.mxu2  ;;  %v1138_v3 = vmin.f32 %v3898_v33, %v3904_v57 }
 0x116   : > { %v974_v4 = vmax.f32 %v942_v58, 0.0  ;;  %v1055_v6 = vand.u32 4294967040, %v988_v59  ;;  %v894_v7 = vmul.f32 2.0, %v793_v1  ;;  %v858_v10 = vpop.f32.mrf.mxu3 }
 0x117   : > { %v975_v13 = vmax.f32 %v943_v62, 0.0  ;;  %v1056_v14 = vand.u32 4294967040, %v989_v0  ;;  %v895_v15 = vmul.f32 2.0, %v858_v10  ;;  %1139 = vmin.xlane.f32.xlu1 %v1138_v3  ;;  %v772_v16 = vpop.f32.mrf.mxu0 }
 0x118   : > { %v1041_v8 = vand.u32 4294967040, %v974_v4  ;;  %v3911_v21 = vor.u32 %v1055_v6, %v3821_v19  ;;  %v926_v5 = vsub.f32 %v3815_v60, %v894_v7  ;;  %v880_v22 = vmul.f32 2.0, %v772_v16  ;;  %v837_v26 = vpop.f32.mrf.mxu1 }
 0x119   : > { %v1042_v27 = vand.u32 4294967040, %v975_v13  ;;  %v3915_v28 = vor.u32 %v1056_v14, %v3828_v31  ;;  %v927_v30 = vsub.f32 %v3817_v61, %v895_v15  ;;  %v881_v34 = vmul.f32 2.0, %v837_v26 }
 0x11a   : > { %6433 = vst [vmem:[#allocation36_spill] sm:$0xff] %v3911_v21  ;;  %v912_v52 = vsub.f32 %v3815_v60, %v880_v22  ;;  %v958_v55 = vadd.f32 %v926_v5, %v674_v20  ;;  %v3920_v58 = vor.u32 %v1041_v8, %v3821_v19 }
 0x11b   : > { %6434 = vst [vmem:[#allocation37_spill] sm:$0xff] %v3915_v28  ;;  %v913_v59 = vsub.f32 %v3817_v61, %v881_v34  ;;  %v959_v62 = vadd.f32 %v927_v30, %v674_v20  ;;  %v1162_v0 = vmin.f32 %v3911_v21, %v3915_v28  ;;  %v3926_v1 = vor.u32 %v1042_v27, %v3828_v31  ;;  %v677_v27 = vpop.xlane.xlu1 %676 }
 0x11c   : > { %6435 = vst [vmem:[#allocation38_spill] sm:$0xff] %v3920_v58  ;;  %v944_v3 = vadd.f32 %v912_v52, %v3813_v12  ;;  %v990_v4 = vmax.f32 %v958_v55, 0.0 }
 0x11d   : > { %6436 = vst [vmem:[#allocation39_spill] sm:$0xff] %v3926_v1  ;;  %v945_v6 = vadd.f32 %v913_v59, %v3813_v12  ;;  %v991_v7 = vmax.f32 %v959_v62, 0.0  ;;  %1163 = vmin.xlane.f32.xlu0 %v1162_v0  ;;  %v796_v10 = vpop.f32.mrf.mxu2  ;;  %v1141_v13 = vmin.f32 %v3920_v58, %v3926_v1 }
 0x11e   : > { %v976_v14 = vmax.f32 %v944_v3, 0.0  ;;  %v1057_v15 = vand.u32 4294967040, %v990_v4  ;;  %v896_v16 = vmul.f32 2.0, %v796_v10  ;;  %v861_v20 = vpop.f32.mrf.mxu3 }
 0x11f   : > { %v977_v8 = vmax.f32 %v945_v6, 0.0  ;;  %v1058_v5 = vand.u32 4294967040, %v991_v7  ;;  %v897_v22 = vmul.f32 2.0, %v861_v20  ;;  %1142 = vmin.xlane.f32.xlu2 %v1141_v13  ;;  %v775_v26 = vpop.f32.mrf.mxu0 }
 0x120   : > { %v1043_v30 = vand.u32 4294967040, %v976_v14  ;;  %v3933_v34 = vor.u32 %v1057_v15, %v3821_v19  ;;  %v928_v12 = vsub.f32 %v3815_v60, %v896_v16  ;;  %v882_v52 = vmul.f32 2.0, %v775_v26  ;;  %v840_v55 = vpop.f32.mrf.mxu1 }
 0x121   : > { %v1044_v59 = vand.u32 4294967040, %v977_v8  ;;  %v3937_v62 = vor.u32 %v1058_v5, %v3828_v31  ;;  %v929_v0 = vsub.f32 %v3817_v61, %v897_v22  ;;  %v883_v3 = vmul.f32 2.0, %v840_v55 }
 0x122   : > { %6437 = vst [vmem:[#allocation40_spill] sm:$0xff] %v3933_v34  ;;  %v914_v4 = vsub.f32 %v3815_v60, %v882_v52  ;;  %v960_v6 = vadd.f32 %v928_v12, %v677_v27  ;;  %v3942_v7 = vor.u32 %v1043_v30, %v3821_v19 }
 0x123   : > { %6438 = vst [vmem:[#allocation41_spill] sm:$0xff] %v3937_v62  ;;  %v915_v10 = vsub.f32 %v3817_v61, %v883_v3  ;;  %v961_v13 = vadd.f32 %v929_v0, %v677_v27  ;;  %v1165_v14 = vmin.f32 %v3933_v34, %v3937_v62  ;;  %v3948_v15 = vor.u32 %v1044_v59, %v3828_v31 }
 0x124   : > { %6439 = vst [vmem:[#allocation42_spill] sm:$0xff] %v3942_v7  ;;  %v946_v16 = vadd.f32 %v914_v4, %v3825_v24  ;;  %v992_v20 = vmax.f32 %v960_v6, 0.0 }
 0x125   : > { %6440 = vst [vmem:[#allocation43_spill] sm:$0xff] %v3948_v15  ;;  %v947_v8 = vadd.f32 %v915_v10, %v3825_v24  ;;  %v993_v5 = vmax.f32 %v961_v13, 0.0  ;;  %1166 = vmin.xlane.f32.xlu1 %v1165_v14  ;;  %v799_v22 = vpop.f32.mrf.mxu2  ;;  %v1144_v26 = vmin.f32 %v3942_v7, %v3948_v15 }
 0x126   : > { %v978_v30 = vmax.f32 %v946_v16, 0.0  ;;  %v1059_v12 = vand.u32 4294967040, %v992_v20  ;;  %v898_v27 = vmul.f32 2.0, %v799_v22  ;;  %v864_v52 = vpop.f32.mrf.mxu3 }
 0x127   : > { %v979_v55 = vmax.f32 %v947_v8, 0.0  ;;  %v1060_v0 = vand.u32 4294967040, %v993_v5  ;;  %v899_v3 = vmul.f32 2.0, %v864_v52  ;;  %1145 = vmin.xlane.f32.xlu0 %v1144_v26  ;;  %v778_v59 = vpop.f32.mrf.mxu0 }
 0x128   : > { %v1045_v4 = vand.u32 4294967040, %v978_v30  ;;  %v3955_v6 = vor.u32 %v1059_v12, %v3821_v19  ;;  %v930_v24 = vsub.f32 %v3815_v60, %v898_v27  ;;  %v884_v10 = vmul.f32 2.0, %v778_v59  ;;  %v843_v13 = vpop.f32.mrf.mxu1 }
 0x129   : > { %v1046_v14 = vand.u32 4294967040, %v979_v55  ;;  %v3959_v16 = vor.u32 %v1060_v0, %v3828_v31  ;;  %v931_v20 = vsub.f32 %v3817_v61, %v899_v3  ;;  %v885_v8 = vmul.f32 2.0, %v843_v13 }
 0x12a   : > { %6441 = vst [vmem:[#allocation44_spill] sm:$0xff] %v3955_v6  ;;  %v916_v5 = vsub.f32 %v3815_v60, %v884_v10  ;;  %v962_v22 = vadd.f32 %v930_v24, %v680_v2  ;;  %v3964_v26 = vor.u32 %v1045_v4, %v3821_v19 }
 0x12b   : > { %6442 = vst [vmem:[#allocation45_spill] sm:$0xff] %v3959_v16  ;;  %v917_v30 = vsub.f32 %v3817_v61, %v885_v8  ;;  %v963_v12 = vadd.f32 %v931_v20, %v680_v2  ;;  %v1168_v27 = vmin.f32 %v3955_v6, %v3959_v16  ;;  %v3970_v52 = vor.u32 %v1046_v14, %v3828_v31  ;;  %v683_v14 = vpop.xlane.xlu0 %682 }
 0x12c   : > { %6443 = vst [vmem:[#allocation46_spill] sm:$0xff] %v3964_v26  ;;  %v948_v55 = vadd.f32 %v916_v5, %v3842_v9  ;;  %v994_v0 = vmax.f32 %v962_v22, 0.0 }
 0x12d   : > { %6444 = vst [vmem:[#allocation47_spill] sm:$0xff] %v3970_v52  ;;  %v949_v3 = vadd.f32 %v917_v30, %v3842_v9  ;;  %v995_v59 = vmax.f32 %v963_v12, 0.0  ;;  %1169 = vmin.xlane.f32.xlu2 %v1168_v27  ;;  %v802_v24 = vpop.f32.mrf.mxu2  ;;  %v1147_v4 = vmin.f32 %v3964_v26, %v3970_v52 }
 0x12e   : > { %v980_v10 = vmax.f32 %v948_v55, 0.0  ;;  %v1061_v13 = vand.u32 4294967040, %v994_v0  ;;  %v900_v2 = vmul.f32 2.0, %v802_v24  ;;  %v867_v20 = vpop.f32.mrf.mxu3 }
 0x12f   : > { %v981_v8 = vmax.f32 %v949_v3, 0.0  ;;  %v1062_v51 = vand.u32 4294967040, %v995_v59  ;;  %v901_v50 = vmul.f32 2.0, %v867_v20  ;;  %1148 = vmin.xlane.f32.xlu1 %v1147_v4 }
 0x130   : > { %v1047_v49 = vand.u32 4294967040, %v980_v10  ;;  %v3977_v5 = vor.u32 %v1061_v13, %v3821_v19  ;;  %v932_v9 = vsub.f32 %v3815_v60, %v900_v2 }
 0x131   : > { %v1048_v22 = vand.u32 4294967040, %v981_v8  ;;  %v3981_v30 = vor.u32 %v1062_v51, %v3828_v31  ;;  %v933_v12 = vsub.f32 %v3817_v61, %v901_v50 }
 0x132   : > { %6445 = vst [vmem:[#allocation48_spill] sm:$0xff] %v3977_v5  ;;  %v964_v27 = vadd.f32 %v932_v9, %v683_v14  ;;  %v3985_v55 = vor.u32 %v1047_v49, %v3821_v19 }
 0x133   : > { %6446 = vst [vmem:[#allocation49_spill] sm:$0xff] %v3981_v30  ;;  %v965_v0 = vadd.f32 %v933_v12, %v683_v14  ;;  %v1171_v3 = vmin.f32 %v3977_v5, %v3981_v30  ;;  %v3990_v59 = vor.u32 %v1048_v22, %v3828_v31 }
 0x134   : > { %6447 = vst [vmem:[#allocation50_spill] sm:$0xff] %v3985_v55  ;;  %v996_v24 = vmax.f32 %v964_v27, 0.0 }
 0x135   : > { %6448 = vst [vmem:[#allocation51_spill] sm:$0xff] %v3990_v59  ;;  %v997_v4 = vmax.f32 %v965_v0, 0.0  ;;  %1172 = vmin.xlane.f32.xlu0 %v1171_v3  ;;  %v1150_v51 = vmin.f32 %v3985_v55, %v3990_v59 }
 0x136   : > { %v1063_v60 = vand.u32 4294967040, %v996_v24 }
 0x137   : > { %v1064_v10 = vand.u32 4294967040, %v997_v4  ;;  %1151 = vmin.xlane.f32.xlu2 %v1150_v51 }
 0x138   : > { %v3995_v50 = vor.u32 %v1063_v60, %v3821_v19 }
 0x139   : > { %v3998_v49 = vor.u32 %v1064_v10, %v3828_v31 }
 0x13a   : > { %6449 = vst [vmem:[#allocation52_spill] sm:$0xff] %v3995_v50 }
 0x13b   : > { %6450 = vst [vmem:[#allocation53_spill] sm:$0xff] %v3998_v49  ;;  %v1174_v61 = vmin.f32 %v3995_v50, %v3998_v49 }
 0x13d   : > { %1175 = vmin.xlane.f32.xlu1 %v1174_v61 }
 0x172   : > { %v4002_v13 = vpop.xlane.xlu1 %1130 }
 0x173   : > { %6451 = vst [vmem:[#allocation54_spill] sm:$0xff] %v4002_v13  ;;  %vm6276_vm2 = vcmp.eq.f32.partialorder %v3834_v53, %v4002_v13  ;;  %vm6277_vm3 = vcmp.eq.f32.partialorder %v3838_v63, %v4002_v13 }
 0x174   : > { %v4012_v19 = vsel %vm6276_vm2, inf, %v3834_v53  ;;  %v4018_v31 = vsel %vm6277_vm3, inf, %v3838_v63 }
 0x175   : > { %6452 = vst [vmem:[#allocation55_spill] sm:$0xff] %v4012_v19  ;;  %v1305_v2 = vmin.f32 %v4012_v19, %v4018_v31 }
 0x176   : > { %6453 = vst [vmem:[#allocation56_spill] sm:$0xff] %v4018_v31 }
 0x177   : > { %1306 = vmin.xlane.f32.xlu2 %v1305_v2 }
 0x178   : > { %v4022_v20 = vpop.xlane.xlu0 %1154 }
 0x179   : > { %6454 = vst [vmem:[#allocation57_spill] sm:$0xff] %v4022_v20  ;;  %vm6029_vm4 = vcmp.eq.f32.partialorder %v3845_v11, %v4022_v20  ;;  %vm6028_vm5 = vcmp.eq.f32.partialorder %v3849_v29, %v4022_v20 }
 0x17a   : > { %v4032_v8 = vsel %vm6029_vm4, inf, %v3845_v11  ;;  %v4038_v14 = vsel %vm6028_vm5, inf, %v3849_v29  ;;  %v4040_v9 = vpop.xlane.xlu2 %1133 }
 0x17b   : > { %6455 = vst [vmem:[#allocation58_spill] sm:$0xff] %v4032_v8  ;;  %vm6280_vm6 = vcmp.eq.f32.partialorder %v3854_v35, %v4040_v9  ;;  %vm6328_vm7 = vcmp.eq.f32.partialorder %v3860_v56, %v4040_v9  ;;  %v1329_v22 = vmin.f32 %v4032_v8, %v4038_v14 }
 0x17c   : > { %6456 = vst [vmem:[#allocation59_spill] sm:$0xff] %v4038_v14  ;;  %v4052_v12 = vsel %vm6280_vm6, inf, %v3854_v35  ;;  %v4058_v27 = vsel %vm6328_vm7, inf, %v3860_v56 }
 0x17d   : > { %6457 = vst [vmem:[#allocation60_spill] sm:$0xff] %v4040_v9  ;;  %1330 = vmin.xlane.f32.xlu1 %v1329_v22  ;;  %v1308_v0 = vmin.f32 %v4052_v12, %v4058_v27 }
 0x17e   : > { %6458 = vst [vmem:[#allocation61_spill] sm:$0xff] %v4052_v12 }
 0x17f   : > { %6459 = vst [vmem:[#allocation62_spill] sm:$0xff] %v4058_v27  ;;  %1309 = vmin.xlane.f32.xlu0 %v1308_v0 }
 0x180   : > { %v4062_v3 = vpop.xlane.xlu1 %1157 }
 0x181   : > { %6460 = vst [vmem:[#allocation63_spill] sm:$0xff] %v4062_v3  ;;  %vm6018_vm8 = vcmp.eq.f32.partialorder %v3867_v18, %v4062_v3  ;;  %vm6017_vm9 = vcmp.eq.f32.partialorder %v3871_v25, %v4062_v3 }
 0x182   : > { %v4072_v24 = vsel %vm6018_vm8, inf, %v3867_v18  ;;  %v4078_v4 = vsel %vm6017_vm9, inf, %v3871_v25  ;;  %v4080_v51 = vpop.xlane.xlu0 %1136 }
 0x183   : > { %6461 = vst [vmem:[#allocation64_spill] sm:$0xff] %v4072_v24  ;;  %vm1181_vm10 = vcmp.eq.f32.partialorder %v3876_v32, %v4080_v51  ;;  %vm1182_vm11 = vcmp.eq.f32.partialorder %v3882_v54, %v4080_v51  ;;  %v1332_v60 = vmin.f32 %v4072_v24, %v4078_v4 }
 0x184   : > { %6462 = vst [vmem:[#allocation65_spill] sm:$0xff] %v4078_v4  ;;  %v4092_v10 = vsel %vm1181_vm10, inf, %v3876_v32  ;;  %v4098_v61 = vsel %vm1182_vm11, inf, %v3882_v54 }
 0x185   : > { %6463 = vst [vmem:[#allocation66_spill] sm:$0xff] %v4080_v51  ;;  %1333 = vmin.xlane.f32.xlu2 %v1332_v60  ;;  %v1311_v2 = vmin.f32 %v4092_v10, %v4098_v61 }
 0x186   : > { %6464 = vst [vmem:[#allocation67_spill] sm:$0xff] %v4092_v10 }
 0x187   : > { %6465 = vst [vmem:[#allocation68_spill] sm:$0xff] %v4098_v61  ;;  %1312 = vmin.xlane.f32.xlu1 %v1311_v2 }
 0x188   : > { %v4102_v22 = vpop.xlane.xlu2 %1160 }
 0x189   : > { %6466 = vst [vmem:[#allocation69_spill] sm:$0xff] %v4102_v22  ;;  %vm6014_vm12 = vcmp.eq.f32.partialorder %v3889_v17, %v4102_v22  ;;  %vm6013_vm13 = vcmp.eq.f32.partialorder %v3893_v23, %v4102_v22 }
 0x18a   : > { %v4112_v0 = vsel %vm6014_vm12, inf, %v3889_v17  ;;  %v4118_v60 = vsel %vm6013_vm13, inf, %v3893_v23  ;;  %v4120_v2 = vpop.xlane.xlu1 %1139 }
 0x18b   : > { %6467 = vst [vmem:[#allocation70_spill] sm:$0xff] %v4112_v0  ;;  %vm6253_vm14 = vcmp.eq.f32.partialorder %v3898_v33, %v4120_v2  ;;  %vm6252_vm15 = vcmp.eq.f32.partialorder %v3904_v57, %v4120_v2  ;;  %v1335_v48 = vmin.f32 %v4112_v0, %v4118_v60 }
 0x18c   : > { %6468 = vst [vmem:[#allocation71_spill] sm:$0xff] %v4118_v60  ;;  %v4132_v47 = vsel %vm6253_vm14, inf, %v3898_v33  ;;  %v4138_v46 = vsel %vm6252_vm15, inf, %v3904_v57 }
 0x18d   : > { %6469 = vst [vmem:[#allocation72_spill] sm:$0xff] %v4120_v2  ;;  %1336 = vmin.xlane.f32.xlu0 %v1335_v48  ;;  %v1314_v45 = vmin.f32 %v4132_v47, %v4138_v46 }
 0x18e   : > { %6470 = vst [vmem:[#allocation73_spill] sm:$0xff] %v4132_v47 }
 0x18f   : > { %6471 = vst [vmem:[#allocation74_spill] sm:$0xff] %v4138_v46  ;;  %1315 = vmin.xlane.f32.xlu2 %v1314_v45 }
 0x190   : > { %v4142_v44 = vpop.xlane.xlu0 %1163 }
 0x191   : > { %6472 = vst [vmem:[#allocation75_spill] sm:$0xff] %v4142_v44  ;;  %vm6016_vm0 = vcmp.eq.f32.partialorder %v3911_v21, %v4142_v44  ;;  %vm6015_vm1 = vcmp.eq.f32.partialorder %v3915_v28, %v4142_v44 }
 0x192   : > { %v4152_v43 = vsel %vm6016_vm0, inf, %v3911_v21  ;;  %v4158_v48 = vsel %vm6015_vm1, inf, %v3915_v28  ;;  %v4160_v45 = vpop.xlane.xlu2 %1142 }
 0x193   : > { %6473 = vst [vmem:[#allocation76_spill] sm:$0xff] %v4152_v43  ;;  %vm6077_vm13 = vcmp.eq.f32.partialorder %v3920_v58, %v4160_v45  ;;  %vm6076_vm12 = vcmp.eq.f32.partialorder %v3926_v1, %v4160_v45  ;;  %v1338_v42 = vmin.f32 %v4152_v43, %v4158_v48 }
 0x194   : > { %6474 = vst [vmem:[#allocation77_spill] sm:$0xff] %v4158_v48  ;;  %v4172_v41 = vsel %vm6077_vm13, inf, %v3920_v58  ;;  %v4178_v40 = vsel %vm6076_vm12, inf, %v3926_v1 }
 0x195   : > { %6475 = vst [vmem:[#allocation78_spill] sm:$0xff] %v4160_v45  ;;  %1339 = vmin.xlane.f32.xlu1 %v1338_v42  ;;  %v1317_v39 = vmin.f32 %v4172_v41, %v4178_v40 }
 0x196   : > { %6476 = vst [vmem:[#allocation79_spill] sm:$0xff] %v4172_v41 }
 0x197   : > { %6477 = vst [vmem:[#allocation80_spill] sm:$0xff] %v4178_v40  ;;  %1318 = vmin.xlane.f32.xlu0 %v1317_v39 }
 0x198   : > { %v4182_v38 = vpop.xlane.xlu1 %1166 }
 0x199   : > { %6478 = vst [vmem:[#allocation81_spill] sm:$0xff] %v4182_v38  ;;  %vm6025_vm1 = vcmp.eq.f32.partialorder %v3933_v34, %v4182_v38  ;;  %vm6024_vm0 = vcmp.eq.f32.partialorder %v3937_v62, %v4182_v38 }
 0x19a   : > { %v4192_v37 = vsel %vm6025_vm1, inf, %v3933_v34  ;;  %v4198_v42 = vsel %vm6024_vm0, inf, %v3937_v62  ;;  %v4200_v39 = vpop.xlane.xlu0 %1145 }
 0x19b   : > { %6479 = vst [vmem:[#allocation82_spill] sm:$0xff] %v4192_v37  ;;  %vm6065_vm9 = vcmp.eq.f32.partialorder %v3942_v7, %v4200_v39  ;;  %vm6064_vm8 = vcmp.eq.f32.partialorder %v3948_v15, %v4200_v39  ;;  %v1341_v36 = vmin.f32 %v4192_v37, %v4198_v42 }
 0x19c   : > { %6480 = vst [vmem:[#allocation83_spill] sm:$0xff] %v4198_v42  ;;  %v4212_v34 = vsel %vm6065_vm9, inf, %v3942_v7  ;;  %v4218_v62 = vsel %vm6064_vm8, inf, %v3948_v15 }
 0x19d   : > { %6481 = vst [vmem:[#allocation84_spill] sm:$0xff] %v4200_v39  ;;  %1342 = vmin.xlane.f32.xlu2 %v1341_v36  ;;  %v1320_v38 = vmin.f32 %v4212_v34, %v4218_v62 }
 0x19e   : > { %6482 = vst [vmem:[#allocation85_spill] sm:$0xff] %v4212_v34 }
 0x19f   : > { %6483 = vst [vmem:[#allocation86_spill] sm:$0xff] %v4218_v62  ;;  %1321 = vmin.xlane.f32.xlu1 %v1320_v38 }
 0x1a0   : > { %v4222_v28 = vpop.xlane.xlu2 %1169 }
 0x1a1   : > { %6484 = vst [vmem:[#allocation87_spill] sm:$0xff] %v4222_v28  ;;  %vm6037_vm0 = vcmp.eq.f32.partialorder %v3955_v6, %v4222_v28  ;;  %vm6036_vm1 = vcmp.eq.f32.partialorder %v3959_v16, %v4222_v28 }
 0x1a2   : > { %v4232_v44 = vsel %vm6037_vm0, inf, %v3955_v6  ;;  %v4238_v36 = vsel %vm6036_vm1, inf, %v3959_v16  ;;  %v4240_v38 = vpop.xlane.xlu1 %1148 }
 0x1a3   : > { %6485 = vst [vmem:[#allocation88_spill] sm:$0xff] %v4232_v44  ;;  %vm6041_vm5 = vcmp.eq.f32.partialorder %v3964_v26, %v4240_v38  ;;  %vm6040_vm4 = vcmp.eq.f32.partialorder %v3970_v52, %v4240_v38  ;;  %v1344_v21 = vmin.f32 %v4232_v44, %v4238_v36 }
 0x1a4   : > { %6486 = vst [vmem:[#allocation89_spill] sm:$0xff] %v4238_v36  ;;  %v4252_v6 = vsel %vm6041_vm5, inf, %v3964_v26  ;;  %v4258_v16 = vsel %vm6040_vm4, inf, %v3970_v52 }
 0x1a5   : > { %6487 = vst [vmem:[#allocation90_spill] sm:$0xff] %v4240_v38  ;;  %1345 = vmin.xlane.f32.xlu0 %v1344_v21  ;;  %v1323_v28 = vmin.f32 %v4252_v6, %v4258_v16 }
 0x1a6   : > { %6488 = vst [vmem:[#allocation91_spill] sm:$0xff] %v4252_v6 }
 0x1a7   : > { %6489 = vst [vmem:[#allocation92_spill] sm:$0xff] %v4258_v16  ;;  %1324 = vmin.xlane.f32.xlu2 %v1323_v28 }
 0x1a8   : > { %v4262_v23 = vpop.xlane.xlu0 %1172 }
 0x1a9   : > { %6490 = vst [vmem:[#allocation93_spill] sm:$0xff] %v4262_v23  ;;  %vm6049_vm1 = vcmp.eq.f32.partialorder %v3977_v5, %v4262_v23  ;;  %vm6048_vm0 = vcmp.eq.f32.partialorder %v3981_v30, %v4262_v23 }
 0x1aa   : > { %v4272_v22 = vsel %vm6049_vm1, inf, %v3977_v5  ;;  %v4278_v21 = vsel %vm6048_vm0, inf, %v3981_v30  ;;  %v4280_v28 = vpop.xlane.xlu2 %1151 }
 0x1ab   : > { %6491 = vst [vmem:[#allocation94_spill] sm:$0xff] %v4272_v22  ;;  %vm6054_vm4 = vcmp.eq.f32.partialorder %v3985_v55, %v4280_v28  ;;  %vm6053_vm5 = vcmp.eq.f32.partialorder %v3990_v59, %v4280_v28  ;;  %v1347_v17 = vmin.f32 %v4272_v22, %v4278_v21 }
 0x1ac   : > { %6492 = vst [vmem:[#allocation95_spill] sm:$0xff] %v4278_v21  ;;  %v4292_v5 = vsel %vm6054_vm4, inf, %v3985_v55  ;;  %v4298_v30 = vsel %vm6053_vm5, inf, %v3990_v59 }
 0x1ad   : > { %6493 = vst [vmem:[#allocation96_spill] sm:$0xff] %v4280_v28  ;;  %1348 = vmin.xlane.f32.xlu1 %v1347_v17  ;;  %v1326_v23 = vmin.f32 %v4292_v5, %v4298_v30 }
 0x1ae   : > { %6494 = vst [vmem:[#allocation97_spill] sm:$0xff] %v4292_v5 }
 0x1af   : > { %6495 = vst [vmem:[#allocation98_spill] sm:$0xff] %v4298_v30  ;;  %1327 = vmin.xlane.f32.xlu0 %v1326_v23 }
 0x1b0   : > { %v4302_v25 = vpop.xlane.xlu1 %1175 }
 0x1b1   : > { %6496 = vst [vmem:[#allocation99_spill] sm:$0xff] %v4302_v25  ;;  %vm6060_vm0 = vcmp.eq.f32.partialorder %v3995_v50, %v4302_v25  ;;  %vm6059_vm1 = vcmp.eq.f32.partialorder %v3998_v49, %v4302_v25 }
 0x1b2   : > { %v4312_v3 = vsel %vm6060_vm0, inf, %v3995_v50  ;;  %v4318_v17 = vsel %vm6059_vm1, inf, %v3998_v49 }
 0x1b3   : > { %6497 = vst [vmem:[#allocation100_spill] sm:$0xff] %v4312_v3  ;;  %v1350_v23 = vmin.f32 %v4312_v3, %v4318_v17 }
 0x1b4   : > { %6498 = vst [vmem:[#allocation101_spill] sm:$0xff] %v4318_v17 }
 0x1b5   : > { %1351 = vmin.xlane.f32.xlu2 %v1350_v23 }
 0x1ea   : > { %v4322_v18 = vpop.xlane.xlu2 %1306 }
 0x1eb   : > { %6499 = vst [vmem:[#allocation102_spill] sm:$0xff] %v4322_v18  ;;  %vm6279_vm5 = vcmp.eq.f32.partialorder %v4012_v19, %v4322_v18  ;;  %vm6278_vm4 = vcmp.eq.f32.partialorder %v4018_v31, %v4322_v18 }
 0x1ec   : > { %v4332_v50 = vsel %vm6279_vm5, inf, %v4012_v19  ;;  %v4338_v49 = vsel %vm6278_vm4, inf, %v4018_v31 }
 0x1ed   : > { %6500 = vst [vmem:[#allocation103_spill] sm:$0xff] %v4332_v50  ;;  %v1481_v23 = vmin.f32 %v4332_v50, %v4338_v49 }
 0x1ee   : > { %6501 = vst [vmem:[#allocation104_spill] sm:$0xff] %v4338_v49 }
 0x1ef   : > { %1482 = vmin.xlane.f32.xlu0 %v1481_v23 }
 0x1f0   : > { %v4342_v25 = vpop.xlane.xlu1 %1330 }
 0x1f1   : > { %6502 = vst [vmem:[#allocation105_spill] sm:$0xff] %v4342_v25  ;;  %vm6073_vm1 = vcmp.eq.f32.partialorder %v4032_v8, %v4342_v25  ;;  %vm6072_vm0 = vcmp.eq.f32.partialorder %v4038_v14, %v4342_v25 }
 0x1f2   : > { %v4352_v29 = vsel %vm6073_vm1, inf, %v4032_v8  ;;  %v4358_v20 = vsel %vm6072_vm0, inf, %v4038_v14  ;;  %v4360_v23 = vpop.xlane.xlu0 %1309 }
 0x1f3   : > { %6503 = vst [vmem:[#allocation106_spill] sm:$0xff] %v4352_v29  ;;  %vm1355_vm8 = vcmp.eq.f32.partialorder %v4052_v12, %v4360_v23  ;;  %vm1356_vm9 = vcmp.eq.f32.partialorder %v4058_v27, %v4360_v23  ;;  %v1505_v11 = vmin.f32 %v4352_v29, %v4358_v20 }
 0x1f4   : > { %6504 = vst [vmem:[#allocation107_spill] sm:$0xff] %v4358_v20  ;;  %v4372_v8 = vsel %vm1355_vm8, inf, %v4052_v12  ;;  %v4378_v14 = vsel %vm1356_vm9, inf, %v4058_v27 }
 0x1f5   : > { %6505 = vst [vmem:[#allocation108_spill] sm:$0xff] %v4360_v23  ;;  %1506 = vmin.xlane.f32.xlu2 %v1505_v11  ;;  %v1484_v25 = vmin.f32 %v4372_v8, %v4378_v14 }
 0x1f6   : > { %6506 = vst [vmem:[#allocation109_spill] sm:$0xff] %v4372_v8 }
 0x1f7   : > { %6507 = vst [vmem:[#allocation110_spill] sm:$0xff] %v4378_v14  ;;  %1485 = vmin.xlane.f32.xlu1 %v1484_v25 }
 0x1f8   : > { %v4382_v59 = vpop.xlane.xlu2 %1333 }
 0x1f9   : > { %6508 = vst [vmem:[#allocation111_spill] sm:$0xff] %v4382_v59  ;;  %vm6085_vm0 = vcmp.eq.f32.partialorder %v4072_v24, %v4382_v59  ;;  %vm6084_vm1 = vcmp.eq.f32.partialorder %v4078_v4, %v4382_v59 }
 0x1fa   : > { %v4392_v28 = vsel %vm6085_vm0, inf, %v4072_v24  ;;  %v4398_v11 = vsel %vm6084_vm1, inf, %v4078_v4  ;;  %v4400_v25 = vpop.xlane.xlu1 %1312 }
 0x1fb   : > { %6509 = vst [vmem:[#allocation112_spill] sm:$0xff] %v4392_v28  ;;  %vm6089_vm12 = vcmp.eq.f32.partialorder %v4092_v10, %v4400_v25  ;;  %vm6088_vm13 = vcmp.eq.f32.partialorder %v4098_v61, %v4400_v25  ;;  %v1508_v55 = vmin.f32 %v4392_v28, %v4398_v11 }
 0x1fc   : > { %6510 = vst [vmem:[#allocation113_spill] sm:$0xff] %v4398_v11  ;;  %v4412_v24 = vsel %vm6089_vm12, inf, %v4092_v10  ;;  %v4418_v4 = vsel %vm6088_vm13, inf, %v4098_v61 }
 0x1fd   : > { %6511 = vst [vmem:[#allocation114_spill] sm:$0xff] %v4400_v25  ;;  %1509 = vmin.xlane.f32.xlu0 %v1508_v55  ;;  %v1487_v59 = vmin.f32 %v4412_v24, %v4418_v4 }
 0x1fe   : > { %6512 = vst [vmem:[#allocation115_spill] sm:$0xff] %v4412_v24 }
 0x1ff   : > { %6513 = vst [vmem:[#allocation116_spill] sm:$0xff] %v4418_v4  ;;  %1488 = vmin.xlane.f32.xlu2 %v1487_v59 }
 0x200   : > { %v4422_v52 = vpop.xlane.xlu0 %1336 }
 0x201   : > { %6514 = vst [vmem:[#allocation117_spill] sm:$0xff] %v4422_v52  ;;  %vm6097_vm1 = vcmp.eq.f32.partialorder %v4112_v0, %v4422_v52  ;;  %vm6096_vm0 = vcmp.eq.f32.partialorder %v4118_v60, %v4422_v52 }
 0x202   : > { %v4432_v38 = vsel %vm6097_vm1, inf, %v4112_v0  ;;  %v4438_v55 = vsel %vm6096_vm0, inf, %v4118_v60  ;;  %v4440_v59 = vpop.xlane.xlu2 %1315 }
 0x203   : > { %6515 = vst [vmem:[#allocation118_spill] sm:$0xff] %v4432_v38  ;;  %vm6101_vm13 = vcmp.eq.f32.partialorder %v4132_v47, %v4440_v59  ;;  %vm6100_vm12 = vcmp.eq.f32.partialorder %v4138_v46, %v4440_v59  ;;  %v1511_v26 = vmin.f32 %v4432_v38, %v4438_v55 }
 0x204   : > { %6516 = vst [vmem:[#allocation119_spill] sm:$0xff] %v4438_v55  ;;  %v4452_v0 = vsel %vm6101_vm13, inf, %v4132_v47  ;;  %v4458_v60 = vsel %vm6100_vm12, inf, %v4138_v46 }
 0x205   : > { %6517 = vst [vmem:[#allocation120_spill] sm:$0xff] %v4440_v59  ;;  %1512 = vmin.xlane.f32.xlu1 %v1511_v26  ;;  %v1490_v52 = vmin.f32 %v4452_v0, %v4458_v60 }
 0x206   : > { %6518 = vst [vmem:[#allocation121_spill] sm:$0xff] %v4452_v0 }
 0x207   : > { %6519 = vst [vmem:[#allocation122_spill] sm:$0xff] %v4458_v60  ;;  %1491 = vmin.xlane.f32.xlu0 %v1490_v52 }
 0x208   : > { %v4462_v15 = vpop.xlane.xlu1 %1339 }
 0x209   : > { %6520 = vst [vmem:[#allocation123_spill] sm:$0xff] %v4462_v15  ;;  %vm6109_vm0 = vcmp.eq.f32.partialorder %v4152_v43, %v4462_v15  ;;  %vm6108_vm1 = vcmp.eq.f32.partialorder %v4158_v48, %v4462_v15 }
 0x20a   : > { %v4472_v39 = vsel %vm6109_vm0, inf, %v4152_v43  ;;  %v4478_v26 = vsel %vm6108_vm1, inf, %v4158_v48  ;;  %v4480_v52 = vpop.xlane.xlu0 %1318 }
 0x20b   : > { %6521 = vst [vmem:[#allocation124_spill] sm:$0xff] %v4472_v39  ;;  %vm6113_vm12 = vcmp.eq.f32.partialorder %v4172_v41, %v4480_v52  ;;  %vm6112_vm13 = vcmp.eq.f32.partialorder %v4178_v40, %v4480_v52  ;;  %v1514_v7 = vmin.f32 %v4472_v39, %v4478_v26 }
 0x20c   : > { %6522 = vst [vmem:[#allocation125_spill] sm:$0xff] %v4478_v26  ;;  %v4492_v43 = vsel %vm6113_vm12, inf, %v4172_v41  ;;  %v4498_v48 = vsel %vm6112_vm13, inf, %v4178_v40 }
 0x20d   : > { %6523 = vst [vmem:[#allocation126_spill] sm:$0xff] %v4480_v52  ;;  %1515 = vmin.xlane.f32.xlu2 %v1514_v7  ;;  %v1493_v15 = vmin.f32 %v4492_v43, %v4498_v48 }
 0x20e   : > { %6524 = vst [vmem:[#allocation127_spill] sm:$0xff] %v4492_v43 }
 0x20f   : > { %6525 = vst [vmem:[#allocation128_spill] sm:$0xff] %v4498_v48  ;;  %1494 = vmin.xlane.f32.xlu1 %v1493_v15 }
 0x210   : > { %v4502_v46 = vpop.xlane.xlu2 %1342 }
 0x211   : > { %6526 = vst [vmem:[#allocation129_spill] sm:$0xff] %v4502_v46  ;;  %vm6121_vm1 = vcmp.eq.f32.partialorder %v4192_v37, %v4502_v46  ;;  %vm6120_vm0 = vcmp.eq.f32.partialorder %v4198_v42, %v4502_v46 }
 0x212   : > { %v4512_v52 = vsel %vm6121_vm1, inf, %v4192_v37  ;;  %v4518_v7 = vsel %vm6120_vm0, inf, %v4198_v42  ;;  %v4520_v15 = vpop.xlane.xlu1 %1321 }
 0x213   : > { %6527 = vst [vmem:[#allocation130_spill] sm:$0xff] %v4512_v52  ;;  %vm6125_vm13 = vcmp.eq.f32.partialorder %v4212_v34, %v4520_v15  ;;  %vm6124_vm12 = vcmp.eq.f32.partialorder %v4218_v62, %v4520_v15  ;;  %v1517_v40 = vmin.f32 %v4512_v52, %v4518_v7 }
 0x214   : > { %6528 = vst [vmem:[#allocation131_spill] sm:$0xff] %v4518_v7  ;;  %v4532_v37 = vsel %vm6125_vm13, inf, %v4212_v34  ;;  %v4538_v42 = vsel %vm6124_vm12, inf, %v4218_v62 }
 0x215   : > { %6529 = vst [vmem:[#allocation132_spill] sm:$0xff] %v4520_v15  ;;  %1518 = vmin.xlane.f32.xlu0 %v1517_v40  ;;  %v1496_v46 = vmin.f32 %v4532_v37, %v4538_v42 }
 0x216   : > { %6530 = vst [vmem:[#allocation133_spill] sm:$0xff] %v4532_v37 }
 0x217   : > { %6531 = vst [vmem:[#allocation134_spill] sm:$0xff] %v4538_v42  ;;  %1497 = vmin.xlane.f32.xlu2 %v1496_v46 }
 0x218   : > { %v4542_v41 = vpop.xlane.xlu0 %1345 }
 0x219   : > { %6532 = vst [vmem:[#allocation135_spill] sm:$0xff] %v4542_v41  ;;  %vm6133_vm0 = vcmp.eq.f32.partialorder %v4232_v44, %v4542_v41  ;;  %vm6132_vm1 = vcmp.eq.f32.partialorder %v4238_v36, %v4542_v41 }
 0x21a   : > { %v4552_v15 = vsel %vm6133_vm0, inf, %v4232_v44  ;;  %v4558_v40 = vsel %vm6132_vm1, inf, %v4238_v36  ;;  %v4560_v46 = vpop.xlane.xlu2 %1324 }
 0x21b   : > { %6533 = vst [vmem:[#allocation136_spill] sm:$0xff] %v4552_v15  ;;  %vm6137_vm12 = vcmp.eq.f32.partialorder %v4252_v6, %v4560_v46  ;;  %vm6136_vm13 = vcmp.eq.f32.partialorder %v4258_v16, %v4560_v46  ;;  %v1520_v62 = vmin.f32 %v4552_v15, %v4558_v40 }
 0x21c   : > { %6534 = vst [vmem:[#allocation137_spill] sm:$0xff] %v4558_v40  ;;  %v4572_v44 = vsel %vm6137_vm12, inf, %v4252_v6  ;;  %v4578_v36 = vsel %vm6136_vm13, inf, %v4258_v16 }
 0x21d   : > { %6535 = vst [vmem:[#allocation138_spill] sm:$0xff] %v4560_v46  ;;  %1521 = vmin.xlane.f32.xlu1 %v1520_v62  ;;  %v1499_v41 = vmin.f32 %v4572_v44, %v4578_v36 }
 0x21e   : > { %6536 = vst [vmem:[#allocation139_spill] sm:$0xff] %v4572_v44 }
 0x21f   : > { %6537 = vst [vmem:[#allocation140_spill] sm:$0xff] %v4578_v36  ;;  %1500 = vmin.xlane.f32.xlu0 %v1499_v41 }
 0x220   : > { %v4582_v34 = vpop.xlane.xlu1 %1348 }
 0x221   : > { %6538 = vst [vmem:[#allocation141_spill] sm:$0xff] %v4582_v34  ;;  %vm6145_vm1 = vcmp.eq.f32.partialorder %v4272_v22, %v4582_v34  ;;  %vm6144_vm0 = vcmp.eq.f32.partialorder %v4278_v21, %v4582_v34 }
 0x222   : > { %v4592_v46 = vsel %vm6145_vm1, inf, %v4272_v22  ;;  %v4598_v62 = vsel %vm6144_vm0, inf, %v4278_v21  ;;  %v4600_v41 = vpop.xlane.xlu0 %1327 }
 0x223   : > { %6539 = vst [vmem:[#allocation142_spill] sm:$0xff] %v4592_v46  ;;  %vm6150_vm13 = vcmp.eq.f32.partialorder %v4292_v5, %v4600_v41  ;;  %vm6149_vm12 = vcmp.eq.f32.partialorder %v4298_v30, %v4600_v41  ;;  %v1523_v16 = vmin.f32 %v4592_v46, %v4598_v62 }
 0x224   : > { %6540 = vst [vmem:[#allocation143_spill] sm:$0xff] %v4598_v62  ;;  %v4612_v22 = vsel %vm6150_vm13, inf, %v4292_v5  ;;  %v4618_v21 = vsel %vm6149_vm12, inf, %v4298_v30 }
 0x225   : > { %6541 = vst [vmem:[#allocation144_spill] sm:$0xff] %v4600_v41  ;;  %1524 = vmin.xlane.f32.xlu2 %v1523_v16  ;;  %v1502_v34 = vmin.f32 %v4612_v22, %v4618_v21 }
 0x226   : > { %6542 = vst [vmem:[#allocation145_spill] sm:$0xff] %v4612_v22 }
 0x227   : > { %6543 = vst [vmem:[#allocation146_spill] sm:$0xff] %v4618_v21  ;;  %1503 = vmin.xlane.f32.xlu1 %v1502_v34 }
 0x228   : > { %v4622_v6 = vpop.xlane.xlu2 %1351 }
 0x229   : > { %6544 = vst [vmem:[#allocation147_spill] sm:$0xff] %v4622_v6  ;;  %vm6156_vm0 = vcmp.eq.f32.partialorder %v4312_v3, %v4622_v6  ;;  %vm6155_vm1 = vcmp.eq.f32.partialorder %v4318_v17, %v4622_v6 }
 0x22a   : > { %v4632_v41 = vsel %vm6156_vm0, inf, %v4312_v3  ;;  %v4638_v16 = vsel %vm6155_vm1, inf, %v4318_v17 }
 0x22b   : > { %6545 = vst [vmem:[#allocation148_spill] sm:$0xff] %v4632_v41  ;;  %v1526_v34 = vmin.f32 %v4632_v41, %v4638_v16 }
 0x22c   : > { %6546 = vst [vmem:[#allocation149_spill] sm:$0xff] %v4638_v16 }
 0x22d   : > { %1527 = vmin.xlane.f32.xlu0 %v1526_v34 }
 0x262   : > { %v4642_v30 = vpop.xlane.xlu0 %1482 }
 0x263   : > { %6547 = vst [vmem:[#allocation150_spill] sm:$0xff] %v4642_v30  ;;  %vm6160_vm12 = vcmp.eq.f32.partialorder %v4332_v50, %v4642_v30  ;;  %vm6159_vm13 = vcmp.eq.f32.partialorder %v4338_v49, %v4642_v30 }
 0x264   : > { %v4652_v3 = vsel %vm6160_vm12, inf, %v4332_v50  ;;  %v4658_v17 = vsel %vm6159_vm13, inf, %v4338_v49 }
 0x265   : > { %6548 = vst [vmem:[#allocation151_spill] sm:$0xff] %v4652_v3  ;;  %v1657_v34 = vmin.f32 %v4652_v3, %v4658_v17 }
 0x266   : > { %6549 = vst [vmem:[#allocation152_spill] sm:$0xff] %v4658_v17 }
 0x267   : > { %1658 = vmin.xlane.f32.xlu1 %v1657_v34 }
 0x268   : > { %v4662_v6 = vpop.xlane.xlu2 %1506 }
 0x269   : > { %6550 = vst [vmem:[#allocation153_spill] sm:$0xff] %v4662_v6  ;;  %vm6169_vm1 = vcmp.eq.f32.partialorder %v4352_v29, %v4662_v6  ;;  %vm6168_vm0 = vcmp.eq.f32.partialorder %v4358_v20, %v4662_v6 }
 0x26a   : > { %v4668_v50 = vpop.xlane.xlu1 %1485  ;;  %v4674_v49 = vsel %vm6169_vm1, inf, %v4352_v29  ;;  %v4680_v34 = vsel %vm6168_vm0, inf, %v4358_v20 }
 0x26b   : > { %6551 = vst [vmem:[#allocation154_spill] sm:$0xff] %v4668_v50  ;;  %vm6173_vm13 = vcmp.eq.f32.partialorder %v4372_v8, %v4668_v50  ;;  %vm6172_vm12 = vcmp.eq.f32.partialorder %v4378_v14, %v4668_v50  ;;  %v1681_v30 = vmin.f32 %v4674_v49, %v4680_v34 }
 0x26c   : > { %6552 = vst [vmem:[#allocation155_spill] sm:$0xff] %v4674_v49  ;;  %v4692_v29 = vsel %vm6173_vm13, inf, %v4372_v8  ;;  %v4698_v20 = vsel %vm6172_vm12, inf, %v4378_v14 }
 0x26d   : > { %6553 = vst [vmem:[#allocation156_spill] sm:$0xff] %v4680_v34  ;;  %1682 = vmin.xlane.f32.xlu0 %v1681_v30  ;;  %v1660_v6 = vmin.f32 %v4692_v29, %v4698_v20 }
 0x26e   : > { %6554 = vst [vmem:[#allocation157_spill] sm:$0xff] %v4692_v29 }
 0x26f   : > { %6555 = vst [vmem:[#allocation158_spill] sm:$0xff] %v4698_v20  ;;  %1661 = vmin.xlane.f32.xlu2 %v1660_v6 }
 0x270   : > { %v4702_v5 = vpop.xlane.xlu0 %1509 }
 0x271   : > { %6556 = vst [vmem:[#allocation159_spill] sm:$0xff] %v4702_v5  ;;  %vm6181_vm0 = vcmp.eq.f32.partialorder %v4392_v28, %v4702_v5  ;;  %vm6180_vm1 = vcmp.eq.f32.partialorder %v4398_v11, %v4702_v5 }
 0x272   : > { %v4708_v8 = vpop.xlane.xlu2 %1488  ;;  %v4714_v14 = vsel %vm6181_vm0, inf, %v4392_v28  ;;  %v4720_v6 = vsel %vm6180_vm1, inf, %v4398_v11 }
 0x273   : > { %6557 = vst [vmem:[#allocation160_spill] sm:$0xff] %v4708_v8  ;;  %vm6185_vm12 = vcmp.eq.f32.partialorder %v4412_v24, %v4708_v8  ;;  %vm6184_vm13 = vcmp.eq.f32.partialorder %v4418_v4, %v4708_v8  ;;  %v1684_v30 = vmin.f32 %v4714_v14, %v4720_v6 }
 0x274   : > { %6558 = vst [vmem:[#allocation161_spill] sm:$0xff] %v4714_v14  ;;  %v4732_v28 = vsel %vm6185_vm12, inf, %v4412_v24  ;;  %v4738_v11 = vsel %vm6184_vm13, inf, %v4418_v4 }
 0x275   : > { %6559 = vst [vmem:[#allocation162_spill] sm:$0xff] %v4720_v6  ;;  %1685 = vmin.xlane.f32.xlu1 %v1684_v30  ;;  %v1663_v5 = vmin.f32 %v4732_v28, %v4738_v11 }
 0x276   : > { %6560 = vst [vmem:[#allocation163_spill] sm:$0xff] %v4732_v28 }
 0x277   : > { %6561 = vst [vmem:[#allocation164_spill] sm:$0xff] %v4738_v11  ;;  %1664 = vmin.xlane.f32.xlu0 %v1663_v5 }
 0x278   : > { %v4742_v50 = vpop.xlane.xlu1 %1512 }
 0x279   : > { %6562 = vst [vmem:[#allocation165_spill] sm:$0xff] %v4742_v50  ;;  %vm6193_vm1 = vcmp.eq.f32.partialorder %v4432_v38, %v4742_v50  ;;  %vm6192_vm0 = vcmp.eq.f32.partialorder %v4438_v55, %v4742_v50 }
 0x27a   : > { %v4748_v24 = vpop.xlane.xlu0 %1491  ;;  %v4754_v4 = vsel %vm6193_vm1, inf, %v4432_v38  ;;  %v4760_v5 = vsel %vm6192_vm0, inf, %v4438_v55 }
 0x27b   : > { %6563 = vst [vmem:[#allocation166_spill] sm:$0xff] %v4748_v24  ;;  %vm6197_vm13 = vcmp.eq.f32.partialorder %v4452_v0, %v4748_v24  ;;  %vm6196_vm12 = vcmp.eq.f32.partialorder %v4458_v60, %v4748_v24  ;;  %v1687_v30 = vmin.f32 %v4754_v4, %v4760_v5 }
 0x27c   : > { %6564 = vst [vmem:[#allocation167_spill] sm:$0xff] %v4754_v4  ;;  %v4772_v38 = vsel %vm6197_vm13, inf, %v4452_v0  ;;  %v4778_v55 = vsel %vm6196_vm12, inf, %v4458_v60 }
 0x27d   : > { %6565 = vst [vmem:[#allocation168_spill] sm:$0xff] %v4760_v5  ;;  %1688 = vmin.xlane.f32.xlu2 %v1687_v30  ;;  %v1666_v50 = vmin.f32 %v4772_v38, %v4778_v55 }
 0x27e   : > { %6566 = vst [vmem:[#allocation169_spill] sm:$0xff] %v4772_v38 }
 0x27f   : > { %6567 = vst [vmem:[#allocation170_spill] sm:$0xff] %v4778_v55  ;;  %1667 = vmin.xlane.f32.xlu1 %v1666_v50 }
 0x280   : > { %v4782_v8 = vpop.xlane.xlu2 %1515 }
 0x281   : > { %6568 = vst [vmem:[#allocation171_spill] sm:$0xff] %v4782_v8  ;;  %vm6205_vm0 = vcmp.eq.f32.partialorder %v4472_v39, %v4782_v8  ;;  %vm6204_vm1 = vcmp.eq.f32.partialorder %v4478_v26, %v4782_v8 }
 0x282   : > { %v4788_v0 = vpop.xlane.xlu1 %1494  ;;  %v4794_v60 = vsel %vm6205_vm0, inf, %v4472_v39  ;;  %v4800_v50 = vsel %vm6204_vm1, inf, %v4478_v26 }
 0x283   : > { %6569 = vst [vmem:[#allocation172_spill] sm:$0xff] %v4788_v0  ;;  %vm6209_vm12 = vcmp.eq.f32.partialorder %v4492_v43, %v4788_v0  ;;  %vm6208_vm13 = vcmp.eq.f32.partialorder %v4498_v48, %v4788_v0  ;;  %v1690_v30 = vmin.f32 %v4794_v60, %v4800_v50 }
 0x284   : > { %6570 = vst [vmem:[#allocation173_spill] sm:$0xff] %v4794_v60  ;;  %v4812_v39 = vsel %vm6209_vm12, inf, %v4492_v43  ;;  %v4818_v26 = vsel %vm6208_vm13, inf, %v4498_v48 }
 0x285   : > { %6571 = vst [vmem:[#allocation174_spill] sm:$0xff] %v4800_v50  ;;  %1691 = vmin.xlane.f32.xlu0 %v1690_v30  ;;  %v1669_v8 = vmin.f32 %v4812_v39, %v4818_v26 }
 0x286   : > { %6572 = vst [vmem:[#allocation175_spill] sm:$0xff] %v4812_v39 }
 0x287   : > { %6573 = vst [vmem:[#allocation176_spill] sm:$0xff] %v4818_v26  ;;  %1670 = vmin.xlane.f32.xlu2 %v1669_v8 }
 0x288   : > { %v4822_v24 = vpop.xlane.xlu0 %1518 }
 0x289   : > { %6574 = vst [vmem:[#allocation177_spill] sm:$0xff] %v4822_v24  ;;  %vm6219_vm1 = vcmp.eq.f32.partialorder %v4512_v52, %v4822_v24  ;;  %vm6218_vm0 = vcmp.eq.f32.partialorder %v4518_v7, %v4822_v24 }
 0x28a   : > { %v4828_v43 = vpop.xlane.xlu2 %1497  ;;  %v4834_v48 = vsel %vm6219_vm1, inf, %v4512_v52  ;;  %v4840_v8 = vsel %vm6218_vm0, inf, %v4518_v7 }
 0x28b   : > { %6575 = vst [vmem:[#allocation178_spill] sm:$0xff] %v4828_v43  ;;  %vm6224_vm13 = vcmp.eq.f32.partialorder %v4532_v37, %v4828_v43  ;;  %vm6223_vm12 = vcmp.eq.f32.partialorder %v4538_v42, %v4828_v43  ;;  %v1693_v30 = vmin.f32 %v4834_v48, %v4840_v8 }
 0x28c   : > { %6576 = vst [vmem:[#allocation179_spill] sm:$0xff] %v4834_v48  ;;  %v4852_v52 = vsel %vm6224_vm13, inf, %v4532_v37  ;;  %v4858_v7 = vsel %vm6223_vm12, inf, %v4538_v42 }
 0x28d   : > { %6577 = vst [vmem:[#allocation180_spill] sm:$0xff] %v4840_v8  ;;  %1694 = vmin.xlane.f32.xlu1 %v1693_v30  ;;  %v1672_v24 = vmin.f32 %v4852_v52, %v4858_v7 }
 0x28e   : > { %6578 = vst [vmem:[#allocation181_spill] sm:$0xff] %v4852_v52 }
 0x28f   : > { %6579 = vst [vmem:[#allocation182_spill] sm:$0xff] %v4858_v7  ;;  %1673 = vmin.xlane.f32.xlu0 %v1672_v24 }
 0x290   : > { %v4862_v0 = vpop.xlane.xlu1 %1521 }
 0x291   : > { %6580 = vst [vmem:[#allocation183_spill] sm:$0xff] %v4862_v0 }
 0x292   : > { %v4864_v59 = vpop.xlane.xlu0 %1500 }
 0x293   : > { %6581 = vst [vmem:[#allocation184_spill] sm:$0xff] %v4864_v59  ;;  %vm6228_vm0 = vcmp.eq.f32.partialorder %v4572_v44, %v4864_v59  ;;  %vm6227_vm1 = vcmp.eq.f32.partialorder %v4578_v36, %v4864_v59 }
 0x294   : > { %v4874_v42 = vsel %vm6228_vm0, inf, %v4572_v44  ;;  %v4880_v24 = vsel %vm6227_vm1, inf, %v4578_v36 }
 0x295   : > { %6582 = vst [vmem:[#allocation185_spill] sm:$0xff] %v4874_v42  ;;  %v1675_v30 = vmin.f32 %v4874_v42, %v4880_v24 }
 0x296   : > { %6583 = vst [vmem:[#allocation186_spill] sm:$0xff] %v4880_v24 }
 0x297   : > { %1676 = vmin.xlane.f32.xlu1 %v1675_v30 }
 0x298   : > { %v4884_v43 = vpop.xlane.xlu2 %1524 }
 0x299   : > { %6584 = vst [vmem:[#allocation187_spill] sm:$0xff] %v4884_v43  ;;  %vm6236_vm12 = vcmp.eq.f32.partialorder %v4592_v46, %v4884_v43  ;;  %vm6235_vm13 = vcmp.eq.f32.partialorder %v4598_v62, %v4884_v43 }
 0x29a   : > { %v4890_v44 = vpop.xlane.xlu1 %1503  ;;  %v4896_v36 = vsel %vm6236_vm12, inf, %v4592_v46  ;;  %v4902_v30 = vsel %vm6235_vm13, inf, %v4598_v62  ;;  %vm6251_vm13 = vcmp.eq.f32.partialorder %v4552_v15, %v4862_v0  ;;  %vm6250_vm12 = vcmp.eq.f32.partialorder %v4558_v40, %v4862_v0 }
 0x29b   : > { %6585 = vst [vmem:[#allocation188_spill] sm:$0xff] %v4890_v44  ;;  %vm6238_vm1 = vcmp.eq.f32.partialorder %v4612_v22, %v4890_v44  ;;  %vm6239_vm0 = vcmp.eq.f32.partialorder %v4618_v21, %v4890_v44  ;;  %v1699_v59 = vmin.f32 %v4896_v36, %v4902_v30  ;;  %v4956_v44 = vsel %vm6250_vm12, inf, %v4558_v40 }
 0x29c   : > { %6586 = vst [vmem:[#allocation189_spill] sm:$0xff] %v4896_v36  ;;  %v4914_v46 = vsel %vm6238_vm1, inf, %v4612_v22  ;;  %v4920_v62 = vsel %vm6239_vm0, inf, %v4618_v21 }
 0x29d   : > { %6587 = vst [vmem:[#allocation190_spill] sm:$0xff] %v4902_v30  ;;  %1700 = vmin.xlane.f32.xlu0 %v1699_v59  ;;  %v1678_v43 = vmin.f32 %v4914_v46, %v4920_v62  ;;  %v5060_v30 = vmov 0.0  }
 0x29e   : > { %6588 = vst [vmem:[#allocation191_spill] sm:$0xff] %v4914_v46 }
 0x29f   : > { %6589 = vst [vmem:[#allocation192_spill] sm:$0xff] %v4920_v62  ;;  %1679 = vmin.xlane.f32.xlu2 %v1678_v43  ;;  %v4950_v43 = vsel %vm6251_vm13, inf, %v4552_v15 }
 0x2a0   : > { %v4928_v37 = vpop.xlane.xlu0 %1527  ;;  %6593 = vst [vmem:[#allocation196_spill] sm:$0xff] %v4950_v43 }
 0x2a1   : > { %6590 = vst [vmem:[#allocation193_spill] sm:$0xff] %v4928_v37  ;;  %vm6248_vm1 = vcmp.eq.f32.partialorder %v4632_v41, %v4928_v37  ;;  %vm6247_vm0 = vcmp.eq.f32.partialorder %v4638_v16, %v4928_v37 }
 0x2a2   : > { %v4938_v59 = vsel %vm6248_vm1, inf, %v4632_v41  ;;  %v4944_v21 = vsel %vm6247_vm0, inf, %v4638_v16  ;;  %6594 = vst [vmem:[#allocation197_spill] sm:$0xff] %v4956_v44  ;;  %v1696_v16 = vmin.f32 %v4950_v43, %v4956_v44 }
 0x2a3   : > { %6591 = vst [vmem:[#allocation194_spill] sm:$0xff] %v4938_v59  ;;  %v1702_v41 = vmin.f32 %v4938_v59, %v4944_v21 }
 0x2a4   : > { %6592 = vst [vmem:[#allocation195_spill] sm:$0xff] %v4944_v21 }
 0x2a5   : > { %1703 = vmin.xlane.f32.xlu1 %v1702_v41 }
 0x2a7   : > { %1697 = vmin.xlane.f32.xlu2 %v1696_v16 }
 0x2da   : > { %v4962_v37 = vpop.xlane.xlu1 %1658 }
 0x2db   : > { %6595 = vst [vmem:[#allocation198_spill] sm:$0xff] %v4962_v37 }
 0x2e0   : > { %v4968_v15 = vpop.xlane.xlu0 %1682 }
 0x2e1   : > { %6596 = vst [vmem:[#allocation199_spill] sm:$0xff] %v4968_v15 }
 0x2e2   : > { %v4974_v41 = vpop.xlane.xlu2 %1661 }
 0x2e3   : > { %6597 = vst [vmem:[#allocation200_spill] sm:$0xff] %v4974_v41 }
 0x2e8   : > { %v4980_v16 = vpop.xlane.xlu1 %1685 }
 0x2e9   : > { %6598 = vst [vmem:[#allocation201_spill] sm:$0xff] %v4980_v16 }
 0x2ea   : > { %v4986_v40 = vpop.xlane.xlu0 %1664 }
 0x2eb   : > { %6599 = vst [vmem:[#allocation202_spill] sm:$0xff] %v4986_v40 }
 0x2f0   : > { %v4992_v0 = vpop.xlane.xlu2 %1688 }
 0x2f1   : > { %6600 = vst [vmem:[#allocation203_spill] sm:$0xff] %v4992_v0 }
 0x2f2   : > { %v4998_v14 = vpop.xlane.xlu1 %1667 }
 0x2f3   : > { %6601 = vst [vmem:[#allocation204_spill] sm:$0xff] %v4998_v14 }
 0x2f8   : > { %v5004_v6 = vpop.xlane.xlu0 %1691 }
 0x2f9   : > { %6602 = vst [vmem:[#allocation205_spill] sm:$0xff] %v5004_v6 }
 0x2fa   : > { %v5010_v4 = vpop.xlane.xlu2 %1670 }
 0x2fb   : > { %6603 = vst [vmem:[#allocation206_spill] sm:$0xff] %v5010_v4 }
 0x300   : > { %v5016_v5 = vpop.xlane.xlu1 %1694 }
 0x301   : > { %6604 = vst [vmem:[#allocation207_spill] sm:$0xff] %v5016_v5 }
 0x302   : > { %v5022_v60 = vpop.xlane.xlu0 %1673 }
 0x303   : > { %6605 = vst [vmem:[#allocation208_spill] sm:$0xff] %v5022_v60 }
 0x30a   : > { %v5028_v50 = vpop.xlane.xlu1 %1676 }
 0x30b   : > { %6606 = vst [vmem:[#allocation209_spill] sm:$0xff] %v5028_v50 }
 0x310   : > { %v5034_v48 = vpop.xlane.xlu0 %1700 }
 0x311   : > { %6607 = vst [vmem:[#allocation210_spill] sm:$0xff] %v5034_v48  ;;  %v5062_v48 = vmov 0.0  }
 0x312   : > { %v5040_v8 = vpop.xlane.xlu2 %1679 }
 0x313   : > { %6608 = vst [vmem:[#allocation211_spill] sm:$0xff] %v5040_v8  ;;  %vm1719_vm12 = vcmp.eq.f32.partialorder %v4914_v46, %v5040_v8  ;;  %vm1720_vm15 = vcmp.eq.f32.partialorder %v4920_v62, %v5040_v8 }
 0x318   : > { %v5046_v5 = vpop.xlane.xlu1 %1703 }
 0x319   : > { %6609 = vst [vmem:[#allocation212_spill] sm:$0xff] %v5046_v5  ;;  %vm1735_vm1 = vcmp.eq.f32.partialorder %v4938_v59, %v5046_v5  ;;  %vm1736_vm14 = vcmp.eq.f32.partialorder %v4944_v21, %v5046_v5 }
 0x31a   : > { %v5052_v36 = vpop.xlane.xlu2 %1697 }
 0x31b   : > { %6610 = vst [vmem:[#allocation213_spill] sm:$0xff] %v5052_v36  ;;  %vm1731_vm13 = vcmp.eq.f32.partialorder %v4950_v43, %v5052_v36  ;;  %vm1732_vm0 = vcmp.eq.f32.partialorder %v4956_v44, %v5052_v36 }
 0x31c LB: >> { %v6611_v6 = vld [vmem:[#allocation205_spill] sm:$0xff]  ;;  %v6612_v0 = vld [vmem:[#allocation203_spill] sm:$0xff]  ;;  %v6615_v60 = vld [vmem:[#allocation208_spill] sm:$0xff]  ;;  %6631 = vst [vmem:[#allocation214_spill] sm:$0xff] %v3442_v30  ;;  %s3246_s17 = sshll.u32 %s3450_s18, 3  ;;  %v6339_v44 = vmov 1.0   ;;  %v3446_v48 = vphi %v5062_v48, %v7015_v48   ;;  %v3442_v30 = vphi %v5060_v30, %v7014_v30   ;;  %s3450_s18 = sphi %s5064_s18, %s1808_s18  }
 0x31d   : >> { %v6613_v16 = vld [vmem:[#allocation201_spill] sm:$0xff]  ;;  %v6614_v15 = vld [vmem:[#allocation199_spill] sm:$0xff]  ;;  %v6619_v4 = vld [vmem:[#allocation206_spill] sm:$0xff]  ;;  %6632 = vst [vmem:[#allocation215_spill] sm:$0xff] %v3446_v48  ;;  %s1813_s7 = scalar_lea.vmem %s466_s14, %s3246_s17 [#allocation2]  ;;  %s3112_s28 = sshll.u32 %s3450_s18, 7 }
 0x31e   : >> { %v6617_v50 = vld [vmem:[#allocation209_spill] sm:$0xff]  ;;  %v6620_v45 = vld [vmem:[#allocation78_spill] sm:$0xff]  ;;  %v6621_v41 = vld [vmem:[#allocation200_spill] sm:$0xff]  ;;  %s5373_s15 = scalar_lea.vmem %s473_s20, %s3112_s28 [#allocation3] }
 0x31f   : >> { %v6622_v40 = vld [vmem:[#allocation202_spill] sm:$0xff]  ;;  %v6623_v14 = vld [vmem:[#allocation204_spill] sm:$0xff]  ;;  %v6635_v63 = vld [vmem:[#allocation23_spill] sm:$0xff] }
 0x320   : >> { %v6624_v37 = vld [vmem:[#allocation198_spill] sm:$0xff]  ;;  %v6629_v9 = vld [vmem:[#allocation60_spill] sm:$0xff]  ;;  %v6639_v56 = vld [vmem:[#allocation27_spill] sm:$0xff] }
 0x321   : >> { %v6625_v25 = vld [vmem:[#allocation114_spill] sm:$0xff]  ;;  %v6630_v2 = vld [vmem:[#allocation72_spill] sm:$0xff]  ;;  %vm6640_vm7 = vcmp.eq.f32.partialorder %v6639_v56, %v6629_v9  ;;  %v6641_v19 = vld [vmem:[#allocation55_spill] sm:$0xff] }
 0x322   : >> { %v6627_v18 = vld [vmem:[#allocation102_spill] sm:$0xff]  ;;  %v1814_v21 = vld [vmem:[%s1813_s7] sm:$0x77]  ;;  %v6651_v57 = vld [vmem:[#allocation35_spill] sm:$0xff] }
 0x323   : >> { %v6628_v13 = vld [vmem:[#allocation54_spill] sm:$0xff]  ;;  %1906 = vst [vmem:[#allocation1] ss:$2 sm:$0xff] %v1814_v21  ;;  %vm6642_vm5 = vcmp.eq.f32.partialorder %v6641_v19, %v6627_v18  ;;  %v6643_v31 = vld [vmem:[#allocation56_spill] sm:$0xff]  ;;  %v6653_v10 = vld [vmem:[#allocation67_spill] sm:$0xff] }
 0x324   : >> { %v6633_v53 = vld [vmem:[#allocation22_spill] sm:$0xff]  ;;  %vm6636_vm3 = vcmp.eq.f32.partialorder %v6635_v63, %v6628_v13  ;;  %vm6644_vm4 = vcmp.eq.f32.partialorder %v6643_v31, %v6627_v18  ;;  %v6655_v61 = vld [vmem:[#allocation68_spill] sm:$0xff]  ;;  %v6659_v1 = vld [vmem:[#allocation39_spill] sm:$0xff] }
 0x325   : >> { %vm6634_vm2 = vcmp.eq.f32.partialorder %v6633_v53, %v6628_v13  ;;  %v6637_v35 = vld [vmem:[#allocation26_spill] sm:$0xff]  ;;  %v6661_v47 = vld [vmem:[#allocation73_spill] sm:$0xff]  ;;  %v6682_v12 = vld [vmem:[#allocation132_spill] sm:$0xff] }
 0x326   : >> { %vm6638_vm6 = vcmp.eq.f32.partialorder %v6637_v35, %v6629_v9  ;;  %v6649_v33 = vld [vmem:[#allocation34_spill] sm:$0xff]  ;;  %v6674_v9 = vld [vmem:[#allocation80_spill] sm:$0xff]  ;;  %v6786_v18 = vld [vmem:[#allocation109_spill] sm:$0xff] }
 0x327   : >> { %v6657_v58 = vld [vmem:[#allocation38_spill] sm:$0xff]  ;;  %v6791_v3 = vld [vmem:[#allocation151_spill] sm:$0xff]  ;;  %v6793_v17 = vld [vmem:[#allocation152_spill] sm:$0xff] }
 0x328   : >> { %v6777_v13 = vld [vmem:[#allocation150_spill] sm:$0xff]  ;;  %v6800_v29 = vld [vmem:[#allocation157_spill] sm:$0xff]  ;;  %v6809_v28 = vld [vmem:[#allocation163_spill] sm:$0xff] }
 0x329   : >> { %v6787_v19 = vld [vmem:[#allocation154_spill] sm:$0xff]  ;;  %v6811_v11 = vld [vmem:[#allocation164_spill] sm:$0xff]  ;;  %v6820_v38 = vld [vmem:[#allocation169_spill] sm:$0xff] }
 0x32a   : >> { %v1907_v5 = vld.sshfl [vmem:[#allocation1] sm:$0xff pattern:$0x75316420]  ;;  %v1908_v59 = vld.sshfl [vmem:[#allocation1 + $0x8] sm:$0xff pattern:$0x75316420] }
 0x32b   : >> { %1926 = vmatpush.xpose.msra.mxu0 %v1907_v5  ;;  %1991 = vmatpush.xpose.msra.mxu1 %v1908_v59  ;;  %2114 = vst [vmem:[#allocation1] ss:$2 sm:$0xff] %v1814_v21  ;;  %v6662_v59 = vld [vmem:[#allocation120_spill] sm:$0xff]  ;;  %v6802_v20 = vld [vmem:[#allocation158_spill] sm:$0xff]  ;;  %v6834_v39 = vld [vmem:[#allocation175_spill] sm:$0xff] }
 0x32c   : >> { %v5422_v32 = vld [vmem:[%s5373_s15 + $0x10] sm:$0xff]  ;;  %v6816_v35 = vld [vmem:[#allocation172_spill] sm:$0xff]  ;;  %v6849_v52 = vld [vmem:[#allocation181_spill] sm:$0xff] }
 0x32d   : >> { %v6822_v55 = vld [vmem:[#allocation170_spill] sm:$0xff]  ;;  %v6836_v26 = vld [vmem:[#allocation176_spill] sm:$0xff]  ;;  %v6857_v22 = vld [vmem:[#allocation145_spill] sm:$0xff] }
 0x32e   : >> { %3113 = vmatmul.msk.f32.vlgmr.msra.gmra.mxu0 %vm6634_vm2, %v6339_v44  ;;  %3129 = vmatmul.msk.f32.vlgmr.msra.gmra.mxu1 %vm6636_vm3, %v6339_v44  ;;  %vm6650_vm2 = vcmp.eq.f32.partialorder %v6649_v33, %v6630_v2  ;;  %vm6652_vm3 = vcmp.eq.f32.partialorder %v6651_v57, %v6630_v2  ;;  %v6672_v2 = vld [vmem:[#allocation126_spill] sm:$0xff]  ;;  %v6864_v42 = vld [vmem:[#allocation185_spill] sm:$0xff]  ;;  %v6887_v49 = vld [vmem:[#allocation155_spill] sm:$0xff] }
 0x32f   : >> { %v6851_v7 = vld [vmem:[#allocation182_spill] sm:$0xff]  ;;  %v6889_v34 = vld [vmem:[#allocation156_spill] sm:$0xff]  ;;  %v6899_v36 = vld [vmem:[#allocation165_spill] sm:$0xff] }
 0x330   : >> { %v6866_v24 = vld [vmem:[#allocation186_spill] sm:$0xff]  ;;  %v6901_v43 = vld [vmem:[#allocation119_spill] sm:$0xff] }
 0x331   : >> { %v5595_v8 = vld [vmem:[%s5373_s15 + $0x50] sm:$0xff] }
 0x332   : >> { %v2115_v30 = vld.sshfl [vmem:[#allocation1] sm:$0xff pattern:$0x75316420]  ;;  %v2116_v48 = vld.sshfl [vmem:[#allocation1 + $0x8] sm:$0xff pattern:$0x75316420] }
 0x333   : >> { %2134 = vmatpush.xpose.msra.mxu2 %v2115_v30  ;;  %2199 = vmatpush.xpose.msra.mxu3 %v2116_v48  ;;  %2322 = vst [vmem:[#allocation1] ss:$2 sm:$0xff] %v1814_v21 }
 0x336   : >> { %3114 = vmatmul.msk.f32.gmra.mxu0 %vm6638_vm6, %v6339_v44  ;;  %3130 = vmatmul.msk.f32.gmra.mxu1 %vm6640_vm7, %v6339_v44  ;;  %vm6658_vm6 = vcmp.eq.f32.partialorder %v6657_v58, %v6620_v45 }
 0x337   : >> { %3145 = vmatmul.msk.f32.vlgmr.msra.gmra.mxu2 %vm6642_vm5, %v6339_v44  ;;  %3161 = vmatmul.msk.f32.vlgmr.msra.gmra.mxu3 %vm6644_vm4, %v6339_v44  ;;  %vm6654_vm4 = vcmp.eq.f32.partialorder %v6653_v10, %v6625_v25  ;;  %vm6656_vm5 = vcmp.eq.f32.partialorder %v6655_v61, %v6625_v25  ;;  %v6677_v10 = vld [vmem:[#allocation90_spill] sm:$0xff] }
 0x33a   : >> { %v2323_v48 = vld.sshfl [vmem:[#allocation1] sm:$0xff pattern:$0x75316420]  ;;  %v2324_v5 = vld.sshfl [vmem:[#allocation1 + $0x8] sm:$0xff pattern:$0x75316420] }
 0x33b   : >> { %2530 = vst [vmem:[#allocation1] ss:$2 sm:$0xff] %v1814_v21  ;;  %2342 = vmatpush.xpose.msrb.mxu0 %v2323_v48  ;;  %2407 = vmatpush.xpose.msrb.mxu1 %v2324_v5  ;;  %v6664_v48 = vld [vmem:[#allocation74_spill] sm:$0xff] }
 0x33c   : >> { %v6666_v5 = vld [vmem:[#allocation42_spill] sm:$0xff] }
 0x33e   : >> { %3115 = vmatmul.msk.f32.gmra.mxu0 %vm1181_vm10, %v6339_v44  ;;  %3131 = vmatmul.msk.f32.gmra.mxu1 %vm1182_vm11, %v6339_v44 }
 0x33f   : >> { %3146 = vmatmul.msk.f32.gmra.mxu2 %vm1355_vm8, %v6339_v44  ;;  %3162 = vmatmul.msk.f32.gmra.mxu3 %vm1356_vm9, %v6339_v44 }
 0x342   : >> { %v2531_v21 = vld.sshfl [vmem:[#allocation1] sm:$0xff pattern:$0x75316420]  ;;  %v2532_v30 = vld.sshfl [vmem:[#allocation1 + $0x8] sm:$0xff pattern:$0x75316420] }
 0x343   : >> { %2550 = vmatpush.xpose.msrb.mxu2 %v2531_v21  ;;  %2615 = vmatpush.xpose.msrb.mxu3 %v2532_v30  ;;  %v6667_v21 = vld [vmem:[#allocation84_spill] sm:$0xff]  ;;  %v6669_v30 = vld [vmem:[#allocation43_spill] sm:$0xff] }
 0x346   : >> { %3116 = vmatmul.msk.f32.gmra.mxu0 %vm6650_vm2, %v6339_v44  ;;  %3132 = vmatmul.msk.f32.gmra.mxu1 %vm6652_vm3, %v6339_v44  ;;  %vm6660_vm2 = vcmp.eq.f32.partialorder %v6659_v1, %v6620_v45  ;;  %vm6663_vm3 = vcmp.eq.f32.partialorder %v6661_v47, %v6662_v59  ;;  %v6671_v1 = vld [vmem:[#allocation79_spill] sm:$0xff] }
 0x347   : >> { %3147 = vmatmul.msk.f32.gmra.mxu2 %vm6654_vm4, %v6339_v44  ;;  %3163 = vmatmul.msk.f32.gmra.mxu3 %vm6656_vm5, %v6339_v44  ;;  %vm6665_vm4 = vcmp.eq.f32.partialorder %v6664_v48, %v6662_v59  ;;  %vm6668_vm5 = vcmp.eq.f32.partialorder %v6666_v5, %v6667_v21  ;;  %v6676_v48 = vld [vmem:[#allocation46_spill] sm:$0xff]  ;;  %v6679_v5 = vld [vmem:[#allocation47_spill] sm:$0xff]  ;;  %v6884_v59 = vld [vmem:[#allocation113_spill] sm:$0xff] }
 0x34e   : >> { %3117 = vmatmul.msk.f32.gmra.mxu0 %vm6658_vm6, %v6339_v44  ;;  %3133 = vmatmul.msk.f32.gmra.mxu1 %vm6660_vm2, %v6339_v44  ;;  %vm6670_vm6 = vcmp.eq.f32.partialorder %v6669_v30, %v6667_v21  ;;  %vm6673_vm2 = vcmp.eq.f32.partialorder %v6671_v1, %v6672_v2  ;;  %v6681_v30 = vld [vmem:[#allocation85_spill] sm:$0xff]  ;;  %v6684_v1 = vld [vmem:[#allocation86_spill] sm:$0xff] }
 0x34f   : >> { %3148 = vmatmul.msk.f32.gmra.mxu2 %vm6663_vm3, %v6339_v44  ;;  %3164 = vmatmul.msk.f32.gmra.mxu3 %vm6665_vm4, %v6339_v44  ;;  %vm6675_vm3 = vcmp.eq.f32.partialorder %v6674_v9, %v6672_v2  ;;  %vm6678_vm4 = vcmp.eq.f32.partialorder %v6676_v48, %v6677_v10  ;;  %v6686_v9 = vld [vmem:[#allocation50_spill] sm:$0xff]  ;;  %v6687_v2 = vld [vmem:[#allocation96_spill] sm:$0xff]  ;;  %v6689_v48 = vld [vmem:[#allocation51_spill] sm:$0xff] }
 0x356   : >> { %3118 = vmatmul.msk.f32.gmra.mxu0 %vm6668_vm5, %v6339_v44  ;;  %3134 = vmatmul.msk.f32.gmra.mxu1 %vm6670_vm6, %v6339_v44  ;;  %vm6680_vm5 = vcmp.eq.f32.partialorder %v6679_v5, %v6677_v10  ;;  %vm6683_vm6 = vcmp.eq.f32.partialorder %v6681_v30, %v6682_v12  ;;  %v6691_v5 = vld [vmem:[#allocation91_spill] sm:$0xff]  ;;  %v6692_v10 = vld [vmem:[#allocation138_spill] sm:$0xff]  ;;  %v6694_v30 = vld [vmem:[#allocation92_spill] sm:$0xff] }
 0x357   : >> { %3149 = vmatmul.msk.f32.gmra.mxu2 %vm6673_vm2, %v6339_v44  ;;  %3165 = vmatmul.msk.f32.gmra.mxu3 %vm6675_vm3, %v6339_v44  ;;  %vm6685_vm2 = vcmp.eq.f32.partialorder %v6684_v1, %v6682_v12  ;;  %vm6688_vm3 = vcmp.eq.f32.partialorder %v6686_v9, %v6687_v2  ;;  %v6696_v1 = vld [vmem:[#allocation24_spill] sm:$0xff]  ;;  %v6697_v12 = vld [vmem:[#allocation57_spill] sm:$0xff] }
 0x358   : >> { %v6699_v9 = vld [vmem:[#allocation25_spill] sm:$0xff] }
 0x35e   : >> { %3119 = vmatmul.msk.f32.gmra.mxu0 %vm6678_vm4, %v6339_v44  ;;  %3135 = vmatmul.msk.f32.gmra.mxu1 %vm6680_vm5, %v6339_v44  ;;  %vm6690_vm4 = vcmp.eq.f32.partialorder %v6689_v48, %v6687_v2  ;;  %vm6693_vm5 = vcmp.eq.f32.partialorder %v6691_v5, %v6692_v10  ;;  %v6701_v48 = vld [vmem:[#allocation97_spill] sm:$0xff]  ;;  %v6702_v2 = vld [vmem:[#allocation144_spill] sm:$0xff]  ;;  %v6704_v5 = vld [vmem:[#allocation98_spill] sm:$0xff] }
 0x35f   : >> { %3150 = vmatmul.msk.f32.gmra.mxu2 %vm6683_vm6, %v6339_v44  ;;  %3166 = vmatmul.msk.f32.gmra.mxu3 %vm6685_vm2, %v6339_v44  ;;  %vm6695_vm6 = vcmp.eq.f32.partialorder %v6694_v30, %v6692_v10  ;;  %vm6698_vm2 = vcmp.eq.f32.partialorder %v6696_v1, %v6697_v12  ;;  %v6706_v30 = vld [vmem:[#allocation28_spill] sm:$0xff]  ;;  %v6707_v10 = vld [vmem:[#allocation63_spill] sm:$0xff]  ;;  %v6709_v1 = vld [vmem:[#allocation29_spill] sm:$0xff] }
 0x366   : >> { %3120 = vmatmul.msk.f32.gmra.mxu0 %vm6688_vm3, %v6339_v44  ;;  %3136 = vmatmul.msk.f32.gmra.mxu1 %vm6690_vm4, %v6339_v44  ;;  %vm6700_vm3 = vcmp.eq.f32.partialorder %v6699_v9, %v6697_v12  ;;  %vm6703_vm4 = vcmp.eq.f32.partialorder %v6701_v48, %v6702_v2  ;;  %v6711_v9 = vld [vmem:[#allocation58_spill] sm:$0xff]  ;;  %v6712_v12 = vld [vmem:[#allocation105_spill] sm:$0xff]  ;;  %v6714_v48 = vld [vmem:[#allocation59_spill] sm:$0xff] }
 0x367   : >> { %3151 = vmatmul.msk.f32.gmra.mxu2 %vm6693_vm5, %v6339_v44  ;;  %3167 = vmatmul.msk.f32.gmra.mxu3 %vm6695_vm6, %v6339_v44  ;;  %vm6705_vm5 = vcmp.eq.f32.partialorder %v6704_v5, %v6702_v2  ;;  %vm6708_vm6 = vcmp.eq.f32.partialorder %v6706_v30, %v6707_v10  ;;  %v6716_v5 = vld [vmem:[#allocation32_spill] sm:$0xff]  ;;  %v6717_v2 = vld [vmem:[#allocation69_spill] sm:$0xff] }
 0x368   : >> { %v6719_v30 = vld [vmem:[#allocation33_spill] sm:$0xff] }
 0x36e   : >> { %3121 = vmatmul.msk.f32.gmra.mxu0 %vm6698_vm2, %v6339_v44  ;;  %3137 = vmatmul.msk.f32.gmra.mxu1 %vm6700_vm3, %v6339_v44  ;;  %vm6710_vm2 = vcmp.eq.f32.partialorder %v6709_v1, %v6707_v10  ;;  %vm6713_vm3 = vcmp.eq.f32.partialorder %v6711_v9, %v6712_v12  ;;  %v6721_v1 = vld [vmem:[#allocation64_spill] sm:$0xff]  ;;  %v6722_v10 = vld [vmem:[#allocation111_spill] sm:$0xff]  ;;  %v6724_v9 = vld [vmem:[#allocation65_spill] sm:$0xff] }
 0x36f   : >> { %3152 = vmatmul.msk.f32.gmra.mxu2 %vm6703_vm4, %v6339_v44  ;;  %3168 = vmatmul.msk.f32.gmra.mxu3 %vm6705_vm5, %v6339_v44  ;;  %vm6715_vm4 = vcmp.eq.f32.partialorder %v6714_v48, %v6712_v12  ;;  %vm6718_vm5 = vcmp.eq.f32.partialorder %v6716_v5, %v6717_v2  ;;  %v6726_v48 = vld [vmem:[#allocation36_spill] sm:$0xff]  ;;  %v6727_v12 = vld [vmem:[#allocation75_spill] sm:$0xff]  ;;  %v6729_v5 = vld [vmem:[#allocation37_spill] sm:$0xff] }
 0x376   : >> { %3122 = vmatmul.msk.f32.gmra.mxu0 %vm6708_vm6, %v6339_v44  ;;  %3138 = vmatmul.msk.f32.gmra.mxu1 %vm6710_vm2, %v6339_v44  ;;  %vm6720_vm6 = vcmp.eq.f32.partialorder %v6719_v30, %v6717_v2  ;;  %vm6723_vm2 = vcmp.eq.f32.partialorder %v6721_v1, %v6722_v10  ;;  %v6731_v30 = vld [vmem:[#allocation70_spill] sm:$0xff]  ;;  %v6732_v2 = vld [vmem:[#allocation117_spill] sm:$0xff]  ;;  %v6734_v1 = vld [vmem:[#allocation71_spill] sm:$0xff] }
 0x377   : >> { %3153 = vmatmul.msk.f32.gmra.mxu2 %vm6713_vm3, %v6339_v44  ;;  %3169 = vmatmul.msk.f32.gmra.mxu3 %vm6715_vm4, %v6339_v44  ;;  %vm6725_vm3 = vcmp.eq.f32.partialorder %v6724_v9, %v6722_v10  ;;  %vm6728_vm4 = vcmp.eq.f32.partialorder %v6726_v48, %v6727_v12  ;;  %v6736_v9 = vld [vmem:[#allocation40_spill] sm:$0xff]  ;;  %v6737_v10 = vld [vmem:[#allocation81_spill] sm:$0xff] }
 0x378   : >> { %v6739_v48 = vld [vmem:[#allocation41_spill] sm:$0xff] }
 0x37e   : >> { %3123 = vmatmul.msk.f32.gmra.mxu0 %vm6718_vm5, %v6339_v44  ;;  %3139 = vmatmul.msk.f32.gmra.mxu1 %vm6720_vm6, %v6339_v44  ;;  %vm6730_vm5 = vcmp.eq.f32.partialorder %v6729_v5, %v6727_v12  ;;  %vm6733_vm6 = vcmp.eq.f32.partialorder %v6731_v30, %v6732_v2  ;;  %v6741_v5 = vld [vmem:[#allocation76_spill] sm:$0xff]  ;;  %v6742_v12 = vld [vmem:[#allocation123_spill] sm:$0xff]  ;;  %v6744_v30 = vld [vmem:[#allocation77_spill] sm:$0xff] }
 0x37f   : >> { %3154 = vmatmul.msk.f32.gmra.mxu2 %vm6723_vm2, %v6339_v44  ;;  %3170 = vmatmul.msk.f32.gmra.mxu3 %vm6725_vm3, %v6339_v44  ;;  %vm6735_vm2 = vcmp.eq.f32.partialorder %v6734_v1, %v6732_v2  ;;  %vm6738_vm3 = vcmp.eq.f32.partialorder %v6736_v9, %v6737_v10  ;;  %v6746_v1 = vld [vmem:[#allocation44_spill] sm:$0xff]  ;;  %v6747_v2 = vld [vmem:[#allocation87_spill] sm:$0xff]  ;;  %v6749_v9 = vld [vmem:[#allocation45_spill] sm:$0xff] }
 0x386   : >> { %3124 = vmatmul.msk.f32.gmra.mxu0 %vm6728_vm4, %v6339_v44  ;;  %3140 = vmatmul.msk.f32.gmra.mxu1 %vm6730_vm5, %v6339_v44  ;;  %vm6740_vm4 = vcmp.eq.f32.partialorder %v6739_v48, %v6737_v10  ;;  %vm6743_vm5 = vcmp.eq.f32.partialorder %v6741_v5, %v6742_v12  ;;  %v6751_v48 = vld [vmem:[#allocation82_spill] sm:$0xff]  ;;  %v6752_v10 = vld [vmem:[#allocation129_spill] sm:$0xff]  ;;  %v6754_v5 = vld [vmem:[#allocation83_spill] sm:$0xff] }
 0x387   : >> { %3155 = vmatmul.msk.f32.gmra.mxu2 %vm6733_vm6, %v6339_v44  ;;  %3171 = vmatmul.msk.f32.gmra.mxu3 %vm6735_vm2, %v6339_v44  ;;  %vm6745_vm6 = vcmp.eq.f32.partialorder %v6744_v30, %v6742_v12  ;;  %vm6748_vm2 = vcmp.eq.f32.partialorder %v6746_v1, %v6747_v2  ;;  %v6756_v30 = vld [vmem:[#allocation48_spill] sm:$0xff]  ;;  %v6757_v12 = vld [vmem:[#allocation93_spill] sm:$0xff] }
 0x388   : >> { %v6759_v1 = vld [vmem:[#allocation49_spill] sm:$0xff] }
 0x38e   : >> { %3125 = vmatmul.msk.f32.gmra.mxu0 %vm6738_vm3, %v6339_v44  ;;  %3141 = vmatmul.msk.f32.gmra.mxu1 %vm6740_vm4, %v6339_v44  ;;  %vm6750_vm3 = vcmp.eq.f32.partialorder %v6749_v9, %v6747_v2  ;;  %vm6753_vm4 = vcmp.eq.f32.partialorder %v6751_v48, %v6752_v10  ;;  %v6761_v9 = vld [vmem:[#allocation88_spill] sm:$0xff]  ;;  %v6762_v2 = vld [vmem:[#allocation135_spill] sm:$0xff]  ;;  %v6764_v48 = vld [vmem:[#allocation89_spill] sm:$0xff] }
 0x38f   : >> { %3156 = vmatmul.msk.f32.gmra.mxu2 %vm6743_vm5, %v6339_v44  ;;  %3172 = vmatmul.msk.f32.gmra.mxu3 %vm6745_vm6, %v6339_v44  ;;  %vm6755_vm5 = vcmp.eq.f32.partialorder %v6754_v5, %v6752_v10  ;;  %vm6758_vm6 = vcmp.eq.f32.partialorder %v6756_v30, %v6757_v12  ;;  %v6766_v5 = vld [vmem:[#allocation52_spill] sm:$0xff]  ;;  %v6767_v10 = vld [vmem:[#allocation99_spill] sm:$0xff]  ;;  %v6769_v30 = vld [vmem:[#allocation53_spill] sm:$0xff] }
 0x396   : >> { %3126 = vmatmul.msk.f32.gmra.mxu0 %vm6748_vm2, %v6339_v44  ;;  %3142 = vmatmul.msk.f32.gmra.mxu1 %vm6750_vm3, %v6339_v44  ;;  %vm6760_vm2 = vcmp.eq.f32.partialorder %v6759_v1, %v6757_v12  ;;  %vm6763_vm3 = vcmp.eq.f32.partialorder %v6761_v9, %v6762_v2  ;;  %v6771_v1 = vld [vmem:[#allocation94_spill] sm:$0xff]  ;;  %v6772_v9 = vld [vmem:[#allocation141_spill] sm:$0xff]  ;;  %v6774_v12 = vld [vmem:[#allocation95_spill] sm:$0xff] }
 0x397   : >> { %3157 = vmatmul.msk.f32.gmra.mxu2 %vm6753_vm4, %v6339_v44  ;;  %3173 = vmatmul.msk.f32.gmra.mxu3 %vm6755_vm5, %v6339_v44  ;;  %vm6765_vm4 = vcmp.eq.f32.partialorder %v6764_v48, %v6762_v2  ;;  %vm6768_vm5 = vcmp.eq.f32.partialorder %v6766_v5, %v6767_v10  ;;  %v6776_v2 = vld [vmem:[#allocation103_spill] sm:$0xff] }
 0x39e   : >> { %3127 = vmatmul.msk.f32.gmra.mxu0 %vm6758_vm6, %v6339_v44  ;;  %3143 = vmatmul.msk.f32.gmra.mxu1 %vm6760_vm2, %v6339_v44  ;;  %vm6770_vm6 = vcmp.eq.f32.partialorder %v6769_v30, %v6767_v10  ;;  %vm6773_vm2 = vcmp.eq.f32.partialorder %v6771_v1, %v6772_v9  ;;  %v6779_v30 = vld [vmem:[#allocation104_spill] sm:$0xff]  ;;  %v6782_v10 = vld [vmem:[#allocation147_spill] sm:$0xff] }
 0x39f   : >> { %3158 = vmatmul.msk.f32.gmra.mxu2 %vm6763_vm3, %v6339_v44  ;;  %3174 = vmatmul.msk.f32.gmra.mxu3 %vm6765_vm4, %v6339_v44  ;;  %vm6775_vm3 = vcmp.eq.f32.partialorder %v6774_v12, %v6772_v9  ;;  %vm6778_vm4 = vcmp.eq.f32.partialorder %v6776_v2, %v6777_v13  ;;  %v6781_v1 = vld [vmem:[#allocation100_spill] sm:$0xff]  ;;  %v6784_v12 = vld [vmem:[#allocation101_spill] sm:$0xff] }
 0x3a6   : >> { %3128 = vmatmul.msk.f32.gmra.mxu0 %vm6768_vm5, %v6339_v44  ;;  %3144 = vmatmul.msk.f32.gmra.mxu1 %vm6770_vm6, %v6339_v44  ;;  %vm6780_vm5 = vcmp.eq.f32.partialorder %v6779_v30, %v6777_v13  ;;  %vm6783_vm6 = vcmp.eq.f32.partialorder %v6781_v1, %v6782_v10  ;;  %v6789_v30 = vld [vmem:[#allocation110_spill] sm:$0xff] }
 0x3a7   : >> { %3159 = vmatmul.msk.f32.gmra.mxu2 %vm6773_vm2, %v6339_v44  ;;  %3175 = vmatmul.msk.f32.gmra.mxu3 %vm6775_vm3, %v6339_v44  ;;  %vm6785_vm2 = vcmp.eq.f32.partialorder %v6784_v12, %v6782_v10  ;;  %vm6788_vm3 = vcmp.eq.f32.partialorder %v6786_v18, %v6787_v19 }
 0x3ab   : >> { %v5326_v48 = vpop.f32.mrf.mxu0  ;;  %v5328_v5 = vpop.f32.mrf.mxu1 }
 0x3ae   : >> { %3177 = vmatmul.msk.f32.vlgmr.msrb.gmra.mxu0 %vm6778_vm4, %v6339_v44  ;;  %3193 = vmatmul.msk.f32.vlgmr.msrb.gmra.mxu1 %vm6780_vm5, %v6339_v44  ;;  %vm6790_vm4 = vcmp.eq.f32.partialorder %v6789_v30, %v6787_v19  ;;  %vm6792_vm5 = vcmp.eq.f32.partialorder %v6791_v3, %v6624_v37  ;;  %v6795_v30 = vld [vmem:[#allocation115_spill] sm:$0xff]  ;;  %v6796_v3 = vld [vmem:[#allocation160_spill] sm:$0xff] }
 0x3af   : >> { %3160 = vmatmul.msk.f32.gmra.mxu2 %vm6783_vm6, %v6339_v44  ;;  %3176 = vmatmul.msk.f32.gmra.mxu3 %vm6785_vm2, %v6339_v44  ;;  %vm6794_vm6 = vcmp.eq.f32.partialorder %v6793_v17, %v6624_v37  ;;  %vm6797_vm2 = vcmp.eq.f32.partialorder %v6795_v30, %v6796_v3  ;;  %v6798_v17 = vld [vmem:[#allocation116_spill] sm:$0xff]  ;;  %v5453_v37 = vld [vmem:[%s5373_s15 + $0x18] sm:$0xff] }
 0x3b3   : >> { %v5346_v9 = vpop.f32.mrf.mxu0  ;;  %v5348_v2 = vpop.f32.mrf.mxu1 }
 0x3b6   : >> { %3178 = vmatmul.msk.f32.gmra.mxu0 %vm6788_vm3, %v6339_v44  ;;  %3194 = vmatmul.msk.f32.gmra.mxu1 %vm6790_vm4, %v6339_v44  ;;  %vm6799_vm3 = vcmp.eq.f32.partialorder %v6798_v17, %v6796_v3  ;;  %vm6801_vm4 = vcmp.eq.f32.partialorder %v6800_v29, %v6621_v41  ;;  %v5400_v3 = vld [vmem:[%s5373_s15 + $0x8] sm:$0xff]  ;;  %v6805_v29 = vld [vmem:[#allocation166_spill] sm:$0xff] }
 0x3b7   : >> { %3209 = vmatmul.msk.f32.vlgmr.msrb.gmra.mxu2 %vm6792_vm5, %v6339_v44  ;;  %3225 = vmatmul.msk.f32.vlgmr.msrb.gmra.mxu3 %vm6794_vm6, %v6339_v44  ;;  %vm6803_vm5 = vcmp.eq.f32.partialorder %v6802_v20, %v6621_v41  ;;  %v6804_v20 = vld [vmem:[#allocation121_spill] sm:$0xff] }
 0x3b8   : >> { %vm6806_vm6 = vcmp.eq.f32.partialorder %v6804_v20, %v6805_v29 }
 0x3ba   : >> { %v2136_v1 = vpop.f32.mrf.mxu2  ;;  %v2201_v12 = vpop.f32.mrf.mxu3 }
 0x3bb   : >> { %v2202_v18 = vadd.f32 %v2201_v12, %v2136_v1  ;;  %v5367_v10 = vpop.f32.mrf.mxu0  ;;  %v5369_v13 = vpop.f32.mrf.mxu1  ;;  %v5392_v1 = vld [vmem:[%s5373_s15] sm:$0xff] }
 0x3bd   : >> { %v2249_v12 = vsub.f32 %v5392_v1, %v2202_v18  ;;  %v6807_v18 = vld [vmem:[#allocation122_spill] sm:$0xff] }
 0x3be   : >> { %3179 = vmatmul.msk.f32.gmra.mxu0 %vm6797_vm2, %v6339_v44  ;;  %3195 = vmatmul.msk.f32.gmra.mxu1 %vm6799_vm3, %v6339_v44  ;;  %vm6808_vm2 = vcmp.eq.f32.partialorder %v6807_v18, %v6805_v29  ;;  %vm6810_vm3 = vcmp.eq.f32.partialorder %v6809_v28, %v6622_v40 }
 0x3bf   : >> { %3210 = vmatmul.msk.f32.gmra.mxu2 %vm6801_vm4, %v6339_v44  ;;  %3226 = vmatmul.msk.f32.gmra.mxu3 %vm6803_vm5, %v6339_v44  ;;  %v2265_v25 = vand.u32 2147483647, %v2249_v12  ;;  %vm6812_vm4 = vcmp.eq.f32.partialorder %v6811_v11, %v6622_v40  ;;  %vm6813_vm5 = vcmask 23552   ;;  %v6815_v11 = vld [vmem:[#allocation127_spill] sm:$0xff]  ;;  %v6829_v40 = vld [vmem:[#allocation178_spill] sm:$0xff] }
 0x3c0   : >> { %vm6814_vm7 = vmmov %vm6813_vm5 }
 0x3c2   : >> { %v2139_v30 = vpop.f32.mrf.mxu2  ;;  %v2204_v19 = vpop.f32.mrf.mxu3 }
 0x3c3   : >> { %v2205_v21 = vadd.f32 %v2204_v19, %v2139_v30  ;;  %v5395_v23 = vpop.f32.mrf.mxu0  ;;  %v5397_v17 = vpop.f32.mrf.mxu1 }
 0x3c5   : >> { %v2250_v27 = vsub.f32 %v5400_v3, %v2205_v21  ;;  %v2281_v21 = vsel %vm6813_vm5, %v2265_v25, 0.0  ;;  %v6818_v25 = vld [vmem:[#allocation128_spill] sm:$0xff] }
 0x3c6   : >> { %3180 = vmatmul.msk.f32.gmra.mxu0 %vm6806_vm6, %v6339_v44  ;;  %3196 = vmatmul.msk.f32.gmra.mxu1 %vm6808_vm2, %v6339_v44  ;;  %vm6817_vm6 = vcmp.eq.f32.partialorder %v6815_v11, %v6816_v35  ;;  %vm6821_vm2 = vcmp.eq.f32.partialorder %v6820_v38, %v6623_v14  ;;  %v6825_v11 = vld [vmem:[#allocation5_spill] sm:$0xff] }
 0x3c7   : >> { %v2266_v19 = vand.u32 2147483647, %v2250_v27  ;;  %3211 = vmatmul.msk.f32.gmra.mxu2 %vm6810_vm3, %v6339_v44  ;;  %3227 = vmatmul.msk.f32.gmra.mxu3 %vm6812_vm4, %v6339_v44  ;;  %vm6823_vm3 = vcmp.eq.f32.partialorder %v6822_v55, %v6623_v14  ;;  %vm6824_vm4 = vmmov %vm6813_vm5  ;;  %v6828_v38 = vld [vmem:[#allocation133_spill] sm:$0xff]  ;;  %v6880_v55 = vld [vmem:[#allocation15_spill] sm:$0xff] }
 0x3c8   : >> { %vm6830_vm5 = vcmp.eq.f32.partialorder %v6828_v38, %v6829_v40  ;;  %v1843_v56 = vsub.f32 %v5595_v8, %v6880_v55  ;;  %v6891_v55 = vld [vmem:[#allocation16_spill] sm:$0xff] }
 0x3c9   : >> { %v2282_v20 = vsel %vm6814_vm7, %v2266_v19, 0.0  ;;  %vm6819_vm7 = vcmp.eq.f32.partialorder %v6818_v25, %v6816_v35  ;;  %v1833_v19 = vsub.f32 %v5392_v1, %v6825_v11  ;;  %v6833_v11 = vld [vmem:[#allocation7_spill] sm:$0xff] }
 0x3ca   : >> { %v2283_v12 = vadd.f32 %v2282_v20, %v2281_v21  ;;  %v2142_v30 = vpop.f32.mrf.mxu2  ;;  %v2207_v31 = vpop.f32.mrf.mxu3 }
 0x3cb   : >> { %v2208_v18 = vadd.f32 %v2207_v31, %v2142_v30  ;;  %v1940_v29 = vpop.f32.mrf.mxu0  ;;  %v2005_v27 = vpop.f32.mrf.mxu1  ;;  %v1849_v14 = vand.u32 2147483647, %v1833_v19 }
 0x3cc   : >> { %v5424_v33 = vadd.f32 %v2005_v27, %v1940_v29 }
 0x3cd   : >> { %v2251_v28 = vsub.f32 %v5422_v32, %v2208_v18  ;;  %v6826_v18 = vld [vmem:[#allocation6_spill] sm:$0xff] }
 0x3ce   : >> { %3181 = vmatmul.msk.f32.gmra.mxu0 %vm6817_vm6, %v6339_v44  ;;  %3197 = vmatmul.msk.f32.gmra.mxu1 %vm6819_vm7, %v6339_v44  ;;  %vm6835_vm7 = vcmp.eq.f32.partialorder %v6834_v39, %v6619_v4 }
 0x3cf   : >> { %v2267_v31 = vand.u32 2147483647, %v2251_v28  ;;  %3212 = vmatmul.msk.f32.gmra.mxu2 %vm6821_vm2, %v6339_v44  ;;  %3228 = vmatmul.msk.f32.gmra.mxu3 %vm6823_vm3, %v6339_v44  ;;  %v1834_v28 = vsub.f32 %v5400_v3, %v6826_v18  ;;  %vm6837_vm2 = vcmp.eq.f32.partialorder %v6836_v26, %v6619_v4  ;;  %vm6838_vm3 = vmmov %vm6824_vm4  ;;  %v5484_v4 = vld [vmem:[%s5373_s15 + $0x20] sm:$0xff] }
 0x3d1   : >> { %v2284_v29 = vsel %vm6824_vm4, %v2267_v31, 0.0  ;;  %v6827_v31 = vmov 1.0   ;;  %vm6839_vm4 = vmmov %vm6838_vm3 }
 0x3d2   : >> { %v2285_v21 = vadd.f32 %v2284_v29, %v2283_v12  ;;  %v2145_v20 = vpop.f32.mrf.mxu2  ;;  %v2210_v30 = vpop.f32.mrf.mxu3  ;;  %v6831_v12 = vld [vmem:[#allocation134_spill] sm:$0xff]  ;;  %v1850_v29 = vand.u32 2147483647, %v1834_v28  ;;  %v1865_v19 = vsel %vm6839_vm4, %v1849_v14, 0.0  ;;  %vm6852_vm4 = vcmp.eq.f32.partialorder %v6851_v7, %v6615_v60 }
 0x3d3   : >> { %v2211_v27 = vadd.f32 %v2210_v30, %v2145_v20  ;;  %v5448_v25 = vpop.f32.mrf.mxu0  ;;  %v5450_v35 = vpop.f32.mrf.mxu1  ;;  %vm6832_vm6 = vcmp.eq.f32.partialorder %v6831_v12, %v6829_v40  ;;  %v1835_v20 = vsub.f32 %v5422_v32, %v6833_v11  ;;  %v6841_v11 = vld [vmem:[#allocation8_spill] sm:$0xff] }
 0x3d4   : >> { %v1836_v40 = vsub.f32 %v5453_v37, %v6841_v11 }
 0x3d5   : >> { %v2252_v44 = vsub.f32 %v5453_v37, %v2211_v27 }
 0x3d6   : >> { %3182 = vmatmul.msk.f32.gmra.mxu0 %vm6830_vm5, %v6827_v31  ;;  %3198 = vmatmul.msk.f32.gmra.mxu1 %vm6832_vm6, %v6827_v31  ;;  %vm6840_vm5 = vmmov %vm6838_vm3 }
 0x3d7   : >> { %v2268_v30 = vand.u32 2147483647, %v2252_v44  ;;  %3213 = vmatmul.msk.f32.gmra.mxu2 %vm6835_vm7, %v6827_v31  ;;  %3229 = vmatmul.msk.f32.gmra.mxu3 %vm6837_vm2, %v6827_v31  ;;  %v1866_v12 = vsel %vm6840_vm5, %v1850_v29, 0.0  ;;  %v1851_v44 = vand.u32 2147483647, %v1835_v20  ;;  %v6845_v29 = vld [vmem:[#allocation140_spill] sm:$0xff]  ;;  %vm6847_vm2 = vmmov %vm6838_vm3 }
 0x3d8   : >> { %v1867_v14 = vadd.f32 %v1866_v12, %v1865_v19  ;;  %vm6853_vm5 = vmmov %vm6847_vm2  ;;  %v5508_v12 = vld [vmem:[%s5373_s15 + $0x28] sm:$0xff] }
 0x3d9   : >> { %v2286_v38 = vsel %vm6838_vm3, %v2268_v30, 0.0  ;;  %v1868_v20 = vsel %vm6847_vm2, %v1851_v44, 0.0  ;;  %vm6850_vm3 = vcmp.eq.f32.partialorder %v6849_v52, %v6615_v60  ;;  %v6875_v52 = vld [vmem:[#allocation13_spill] sm:$0xff] }
 0x3da   : >> { %v2287_v18 = vadd.f32 %v2286_v38, %v2285_v21  ;;  %v2148_v28 = vpop.f32.mrf.mxu2  ;;  %v2213_v27 = vpop.f32.mrf.mxu3  ;;  %v6842_v21 = vld [vmem:[#allocation139_spill] sm:$0xff]  ;;  %v6843_v38 = vld [vmem:[#allocation184_spill] sm:$0xff]  ;;  %v1869_v19 = vadd.f32 %v1868_v20, %v1867_v14  ;;  %v5524_v14 = vld [vmem:[%s5373_s15 + $0x30] sm:$0xff] }
 0x3db   : >> { %v2214_v39 = vadd.f32 %v2213_v27, %v2148_v28  ;;  %v5479_v41 = vpop.f32.mrf.mxu0  ;;  %v5481_v45 = vpop.f32.mrf.mxu1  ;;  %vm6844_vm6 = vcmp.eq.f32.partialorder %v6842_v21, %v6843_v38  ;;  %vm6846_vm7 = vcmp.eq.f32.partialorder %v6845_v29, %v6843_v38  ;;  %v1852_v28 = vand.u32 2147483647, %v1836_v40  ;;  %v6848_v27 = vld [vmem:[#allocation9_spill] sm:$0xff]  ;;  %v6860_v20 = vld [vmem:[#allocation146_spill] sm:$0xff] }
 0x3dc   : >> { %v1837_v11 = vsub.f32 %v5484_v4, %v6848_v27  ;;  %v6856_v27 = vld [vmem:[#allocation10_spill] sm:$0xff] }
 0x3dd   : >> { %v2253_v30 = vsub.f32 %v5484_v4, %v2214_v39  ;;  %v1838_v38 = vsub.f32 %v5508_v12, %v6856_v27 }
 0x3de   : >> { %3183 = vmatmul.msk.f32.gmra.mxu0 %vm6844_vm6, %v6827_v31  ;;  %3199 = vmatmul.msk.f32.gmra.mxu1 %vm6846_vm7, %v6827_v31  ;;  %vm6855_vm6 = vmmov %vm6847_vm2  ;;  %v1853_v29 = vand.u32 2147483647, %v1837_v11 }
 0x3df   : >> { %v2269_v26 = vand.u32 2147483647, %v2253_v30  ;;  %3214 = vmatmul.msk.f32.gmra.mxu2 %vm6850_vm3, %v6827_v31  ;;  %3230 = vmatmul.msk.f32.gmra.mxu3 %vm6852_vm4, %v6827_v31  ;;  %v1870_v21 = vsel %vm6855_vm6, %v1852_v28, 0.0  ;;  %vm6862_vm3 = vmmov %vm6853_vm5  ;;  %v1854_v11 = vand.u32 2147483647, %v1838_v38  ;;  %vm6865_vm4 = vcmp.eq.f32.partialorder %v6864_v42, %v6617_v50  ;;  %v6869_v42 = vld [vmem:[#allocation12_spill] sm:$0xff] }
 0x3e0   : >> { %v1872_v28 = vsel %vm6862_vm3, %v1853_v29, 0.0  ;;  %vm6868_vm6 = vmmov %vm6862_vm3 }
 0x3e1   : >> { %v2288_v39 = vsel %vm6853_vm5, %v2269_v26, 0.0  ;;  %v1871_v26 = vadd.f32 %v1870_v21, %v1869_v19  ;;  %vm6867_vm5 = vcmp.eq.f32.partialorder %v6866_v24, %v6617_v50  ;;  %v1874_v38 = vsel %vm6868_vm6, %v1854_v11, 0.0  ;;  %v5560_v50 = vld [vmem:[%s5373_s15 + $0x40] sm:$0xff]  ;;  %v6873_v11 = vld [vmem:[#allocation107_spill] sm:$0xff] }
 0x3e2   : >> { %v5510_v40 = vadd.f32 %v2288_v39, %v2287_v18  ;;  %v5512_v44 = vpop.f32.mrf.mxu2  ;;  %v5514_v30 = vpop.f32.mrf.mxu3  ;;  %v6858_v18 = vld [vmem:[#allocation188_spill] sm:$0xff]  ;;  %v6863_v39 = vld [vmem:[#allocation11_spill] sm:$0xff]  ;;  %v1841_v53 = vsub.f32 %v5560_v50, %v6875_v52 }
 0x3e3   : >> { %v5519_v47 = vpop.f32.mrf.mxu0  ;;  %v5521_v7 = vpop.f32.mrf.mxu1  ;;  %vm6859_vm7 = vcmp.eq.f32.partialorder %v6857_v22, %v6858_v18  ;;  %vm6861_vm2 = vcmp.eq.f32.partialorder %v6860_v20, %v6858_v18  ;;  %v1839_v27 = vsub.f32 %v5524_v14, %v6863_v39  ;;  %v1873_v19 = vadd.f32 %v1872_v28, %v1871_v26  ;;  %v5551_v39 = vld [vmem:[%s5373_s15 + $0x38] sm:$0xff]  ;;  %v6870_v26 = vld [vmem:[#allocation106_spill] sm:$0xff]  ;;  %v6871_v28 = vld [vmem:[#allocation153_spill] sm:$0xff] }
 0x3e4   : >> { %6854 = vst [vmem:[#allocation216_spill] sm:$0xff] %v5510_v40  ;;  %v1840_v51 = vsub.f32 %v5551_v39, %v6869_v42  ;;  %v1857_v54 = vand.u32 2147483647, %v1841_v53  ;;  %v5609_v53 = vld [vmem:[%s5373_s15 + $0x58] sm:$0xff] }
 0x3e5   : >> { %v1855_v29 = vand.u32 2147483647, %v1839_v27  ;;  %v1875_v24 = vadd.f32 %v1874_v38, %v1873_v19 }
 0x3e6   : >> { %3184 = vmatmul.msk.f32.gmra.mxu0 %vm6859_vm7, %v6827_v31  ;;  %3200 = vmatmul.msk.f32.gmra.mxu1 %vm6861_vm2, %v6827_v31  ;;  %vm6872_vm7 = vcmp.eq.f32.partialorder %v6870_v26, %v6871_v28  ;;  %vm6874_vm2 = vcmp.eq.f32.partialorder %v6873_v11, %v6871_v28  ;;  %v1856_v42 = vand.u32 2147483647, %v1840_v51  ;;  %v6878_v28 = vld [vmem:[#allocation14_spill] sm:$0xff] }
 0x3e7   : >> { %3215 = vmatmul.msk.f32.gmra.mxu2 %vm6865_vm4, %v6827_v31  ;;  %3231 = vmatmul.msk.f32.gmra.mxu3 %vm6867_vm5, %v6827_v31  ;;  %v1876_v27 = vsel %vm6862_vm3, %v1855_v29, 0.0  ;;  %v5586_v29 = vld [vmem:[%s5373_s15 + $0x48] sm:$0xff]  ;;  %vm6879_vm4 = vmmov %vm6862_vm3 }
 0x3e8   : >> { %v1877_v26 = vadd.f32 %v1876_v27, %v1875_v24  ;;  %v1842_v46 = vsub.f32 %v5586_v29, %v6878_v28  ;;  %v1878_v51 = vsel %vm6879_vm4, %v1856_v42, 0.0  ;;  %v6881_v24 = vld [vmem:[#allocation112_spill] sm:$0xff]  ;;  %v6882_v27 = vld [vmem:[#allocation159_spill] sm:$0xff] }
 0x3e9   : >> { %vm6883_vm5 = vcmp.eq.f32.partialorder %v6881_v24, %v6882_v27  ;;  %vm6885_vm6 = vcmp.eq.f32.partialorder %v6884_v59, %v6882_v27  ;;  %v1859_v59 = vand.u32 2147483647, %v1843_v56 }
 0x3ea   : >> { %v5545_v21 = vpop.f32.mrf.mxu2  ;;  %v5547_v20 = vpop.f32.mrf.mxu3  ;;  %v1858_v57 = vand.u32 2147483647, %v1842_v46  ;;  %v1879_v58 = vadd.f32 %v1878_v51, %v1877_v26  ;;  %v1844_v46 = vsub.f32 %v5609_v53, %v6891_v55  ;;  %v5623_v26 = vld [vmem:[%s5373_s15 + $0x60] sm:$0xff]  ;;  %v6892_v51 = vld [vmem:[#allocation17_spill] sm:$0xff] }
 0x3eb   : >> { %v5553_v18 = vpop.f32.mrf.mxu0  ;;  %v5555_v22 = vpop.f32.mrf.mxu1  ;;  %v1845_v24 = vsub.f32 %v5623_v26, %v6892_v51  ;;  %v5643_v51 = vld [vmem:[%s5373_s15 + $0x70] sm:$0xff] }
 0x3ec   : >> { %v1860_v27 = vand.u32 2147483647, %v1844_v46 }
 0x3ed   : >> { %v1861_v61 = vand.u32 2147483647, %v1845_v24  ;;  %v5658_v24 = vld [vmem:[%s5373_s15 + $0x78] sm:$0xff] }
 0x3ee   : >> { %3185 = vmatmul.msk.f32.gmra.mxu0 %vm6872_vm7, %v6827_v31  ;;  %3201 = vmatmul.msk.f32.gmra.mxu1 %vm6874_vm2, %v6827_v31  ;;  %vm6886_vm7 = vmmov %vm6862_vm3  ;;  %vm6888_vm2 = vcmp.eq.f32.partialorder %v6887_v49, %v6614_v15  ;;  %vm6890_vm3 = vcmp.eq.f32.partialorder %v6889_v34, %v6614_v15  ;;  %v5633_v34 = vld [vmem:[%s5373_s15 + $0x68] sm:$0xff] }
 0x3ef   : >> { %3216 = vmatmul.msk.f32.gmra.mxu2 %vm1719_vm12, %v6827_v31  ;;  %3232 = vmatmul.msk.f32.gmra.mxu3 %vm1720_vm15, %v6827_v31  ;;  %v1880_v28 = vsel %vm6886_vm7, %v1857_v54, 0.0  ;;  %v1882_v54 = vsel %vm6879_vm4, %v1858_v57, 0.0  ;;  %vm6897_vm7 = vmmov %vm6879_vm4 }
 0x3f0   : >> { %v1881_v42 = vadd.f32 %v1880_v28, %v1879_v58  ;;  %v6894_v28 = vld [vmem:[#allocation18_spill] sm:$0xff]  ;;  %v1888_v40 = vsel %vm6897_vm7, %v1861_v61, 0.0 }
 0x3f1   : >> { %v1846_v57 = vsub.f32 %v5633_v34, %v6894_v28  ;;  %v6905_v61 = vld [vmem:[#allocation162_spill] sm:$0xff]  ;;  %v6907_v28 = vld [vmem:[#allocation20_spill] sm:$0xff] }
 0x3f2   : >> { %v5581_v19 = vpop.f32.mrf.mxu2  ;;  %v5583_v38 = vpop.f32.mrf.mxu3  ;;  %v1883_v49 = vadd.f32 %v1882_v54, %v1881_v42  ;;  %v6896_v54 = vld [vmem:[#allocation19_spill] sm:$0xff] }
 0x3f3   : >> { %v5588_v52 = vpop.f32.mrf.mxu0  ;;  %v5590_v11 = vpop.f32.mrf.mxu1  ;;  %v1847_v62 = vsub.f32 %v5643_v51, %v6896_v54  ;;  %v1862_v63 = vand.u32 2147483647, %v1846_v57 }
 0x3f5   : >> { %v1863_v57 = vand.u32 2147483647, %v1847_v62 }
 0x3f6   : >> { %3186 = vmatmul.msk.f32.gmra.mxu0 %vm6883_vm5, %v6827_v31  ;;  %3202 = vmatmul.msk.f32.gmra.mxu1 %vm6885_vm6, %v6827_v31  ;;  %vm6893_vm5 = vmmov %vm6879_vm4 }
 0x3f7   : >> { %3217 = vmatmul.msk.f32.gmra.mxu2 %vm6888_vm2, %v6827_v31  ;;  %3233 = vmatmul.msk.f32.gmra.mxu3 %vm6890_vm3, %v6827_v31  ;;  %v1884_v55 = vsel %vm6893_vm5, %v1859_v59, 0.0  ;;  %vm6895_vm6 = vmmov %vm6879_vm4  ;;  %v6898_v59 = vld [vmem:[#allocation118_spill] sm:$0xff]  ;;  %vm6902_vm3 = vcmp.eq.f32.partialorder %v6901_v43, %v6899_v36  ;;  %vm6906_vm5 = vcmp.eq.f32.partialorder %v6905_v61, %v6613_v16  ;;  %v1848_v43 = vsub.f32 %v5658_v24, %v6907_v28 }
 0x3f8   : >> { %v1885_v46 = vadd.f32 %v1884_v55, %v1883_v49  ;;  %v1886_v42 = vsel %vm6895_vm6, %v1860_v27, 0.0  ;;  %vm6900_vm2 = vcmp.eq.f32.partialorder %v6898_v59, %v6899_v36  ;;  %v1994_v27 = vadd.f32 %v5328_v5, %v5326_v48  ;;  %v6903_v55 = vld [vmem:[#allocation161_spill] sm:$0xff]  ;;  %vm6908_vm7 = vmmov %vm6895_vm6 }
 0x3f9   : >> { %vm6904_vm4 = vcmp.eq.f32.partialorder %v6903_v55, %v6613_v16  ;;  %v1890_v54 = vsel %vm6895_vm6, %v1862_v63, 0.0  ;;  %v1864_v5 = vand.u32 2147483647, %v1848_v43  ;;  %v2000_v59 = vadd.f32 %v5369_v13, %v5367_v10  ;;  %v6910_v13 = vld [vmem:[#allocation124_spill] sm:$0xff]  ;;  %v6911_v10 = vld [vmem:[#allocation171_spill] sm:$0xff]  ;;  %v6913_v43 = vld [vmem:[#allocation125_spill] sm:$0xff] }
 0x3fa   : >> { %v5628_v60 = vpop.f32.mrf.mxu2  ;;  %v5630_v15 = vpop.f32.mrf.mxu3  ;;  %v1887_v49 = vadd.f32 %v1886_v42, %v1885_v46  ;;  %v1997_v46 = vadd.f32 %v5348_v2, %v5346_v9  ;;  %v1892_v42 = vsel %vm6908_vm7, %v1863_v57, 0.0  ;;  %v2041_v28 = vsub.f32 %v5392_v1, %v1994_v27 }
 0x3fb   : >> { %v5636_v56 = vpop.f32.mrf.mxu0  ;;  %v5638_v58 = vpop.f32.mrf.mxu1  ;;  %v2003_v2 = vadd.f32 %v5397_v17, %v5395_v23  ;;  %v6917_v23 = vld [vmem:[#allocation168_spill] sm:$0xff] }
 0x3fc   : >> { %v1889_v48 = vadd.f32 %v1888_v40, %v1887_v49  ;;  %v2042_v9 = vsub.f32 %v5400_v3, %v1997_v46  ;;  %v2043_v49 = vsub.f32 %v5422_v32, %v2000_v59  ;;  %v2057_v57 = vand.u32 2147483647, %v2041_v28 }
 0x3fd   : >> { %v2044_v17 = vsub.f32 %v5453_v37, %v2003_v2  ;;  %v2009_v46 = vadd.f32 %v5450_v35, %v5448_v25  ;;  %v2015_v25 = vadd.f32 %v5521_v7, %v5519_v47  ;;  %v6926_v47 = vld [vmem:[#allocation173_spill] sm:$0xff]  ;;  %v6928_v7 = vld [vmem:[#allocation174_spill] sm:$0xff] }
 0x3fe   : >> { %3187 = vmatmul.msk.f32.gmra.mxu0 %vm6900_vm2, %v6827_v31  ;;  %3203 = vmatmul.msk.f32.gmra.mxu1 %vm6902_vm3, %v6827_v31  ;;  %v1891_v16 = vadd.f32 %v1890_v54, %v1889_v48  ;;  %vm6909_vm2 = vmmov %vm6895_vm6  ;;  %vm6912_vm3 = vcmp.eq.f32.partialorder %v6910_v13, %v6911_v10  ;;  %v6915_v54 = vld [vmem:[#allocation167_spill] sm:$0xff]  ;;  %vm6918_vm6 = vcmp.eq.f32.partialorder %v6917_v23, %v6612_v0  ;;  %v2059_v48 = vand.u32 2147483647, %v2043_v49 }
 0x3ff   : >> { %3218 = vmatmul.msk.f32.gmra.mxu2 %vm6904_vm4, %v6827_v31  ;;  %3234 = vmatmul.msk.f32.gmra.mxu3 %vm6906_vm5, %v6827_v31  ;;  %v1894_v63 = vsel %vm6909_vm2, %v1864_v5, 0.0  ;;  %vm6914_vm4 = vcmp.eq.f32.partialorder %v6913_v43, %v6911_v10  ;;  %vm6916_vm5 = vcmp.eq.f32.partialorder %v6915_v54, %v6612_v0  ;;  %v2045_v5 = vsub.f32 %v5484_v4, %v5424_v33  ;;  %vm6919_vm7 = vmmov %vm6909_vm2  ;;  %v6921_v43 = vld [vmem:[#allocation130_spill] sm:$0xff] }
 0x400   : >> { %v1893_v40 = vadd.f32 %v1892_v42, %v1891_v16  ;;  %v2058_v16 = vand.u32 2147483647, %v2042_v9  ;;  %v2012_v42 = vadd.f32 %v5481_v45, %v5479_v41  ;;  %v2060_v13 = vand.u32 2147483647, %v2044_v17 }
 0x401   : >> { %v2046_v35 = vsub.f32 %v5508_v12, %v2009_v46  ;;  %v2061_v49 = vand.u32 2147483647, %v2045_v5  ;;  %v2018_v41 = vadd.f32 %v5555_v22, %v5553_v18  ;;  %v2048_v23 = vsub.f32 %v5551_v39, %v2015_v25 }
 0x402   : >> { %v5678_v55 = vpop.f32.mrf.mxu2  ;;  %v5680_v61 = vpop.f32.mrf.mxu3  ;;  %v1895_v27 = vadd.f32 %v1894_v63, %v1893_v40  ;;  %v2073_v63 = vsel %vm6919_vm7, %v2057_v57, 0.0  ;;  %v2074_v2 = vsel %vm6909_vm2, %v2058_v16, 0.0  ;;  %v2047_v45 = vsub.f32 %v5524_v14, %v2012_v42  ;;  %v6924_v57 = vld [vmem:[#allocation131_spill] sm:$0xff] }
 0x403   : >> { %v1961_v62 = vpop.f32.mrf.mxu0  ;;  %v2026_v36 = vpop.f32.mrf.mxu1  ;;  %v2075_v54 = vadd.f32 %v2074_v2, %v2073_v63  ;;  %vm6929_vm7 = vcmp.eq.f32.partialorder %v6928_v7, %v6611_v6  ;;  %v2078_v22 = vsel %vm6909_vm2, %v2060_v13, 0.0  ;;  %v2062_v18 = vand.u32 2147483647, %v2046_v35 }
 0x404   : >> { %1896 = vadd.xlane.f32.xlu0 %v1895_v27  ;;  %v6922_v27 = vld [vmem:[#allocation177_spill] sm:$0xff]  ;;  %v2021_v16 = vadd.f32 %v5590_v11, %v5588_v52  ;;  %v2049_v5 = vsub.f32 %v5560_v50, %v2018_v41  ;;  %v2024_v42 = vadd.f32 %v5638_v58, %v5636_v56  ;;  %v2027_v11 = vadd.f32 %v2026_v36, %v1961_v62  ;;  %v6933_v58 = vld [vmem:[#allocation136_spill] sm:$0xff] }
 0x405   : >> { %v2217_v36 = vadd.f32 %v5514_v30, %v5512_v44  ;;  %v2220_v62 = vadd.f32 %v5547_v20, %v5545_v21 }
 0x406   : >> { %3188 = vmatmul.msk.f32.gmra.mxu0 %vm6912_vm3, %v6827_v31  ;;  %3204 = vmatmul.msk.f32.gmra.mxu1 %vm6914_vm4, %v6827_v31  ;;  %vm6920_vm3 = vmmov %vm6909_vm2  ;;  %vm6923_vm4 = vcmp.eq.f32.partialorder %v6921_v43, %v6922_v27  ;;  %v2050_v52 = vsub.f32 %v5586_v29, %v2021_v16  ;;  %v2051_v41 = vsub.f32 %v5595_v8, %v2024_v42 }
 0x407   : >> { %3219 = vmatmul.msk.f32.gmra.mxu2 %vm6916_vm5, %v6827_v31  ;;  %3235 = vmatmul.msk.f32.gmra.mxu3 %vm6918_vm6, %v6827_v31  ;;  %v2076_v33 = vsel %vm6920_vm3, %v2059_v48, 0.0  ;;  %vm6925_vm5 = vcmp.eq.f32.partialorder %v6924_v57, %v6922_v27  ;;  %vm6927_vm6 = vcmp.eq.f32.partialorder %v6926_v47, %v6611_v6  ;;  %vm6930_vm3 = vmmov %vm6909_vm2  ;;  %v2063_v48 = vand.u32 2147483647, %v2047_v45  ;;  %v6936_v47 = vld [vmem:[#allocation137_spill] sm:$0xff] }
 0x408   : >> { %v2077_v17 = vadd.f32 %v2076_v33, %v2075_v54  ;;  %v2080_v46 = vsel %vm6930_vm3, %v2061_v49, 0.0  ;;  %v2064_v57 = vand.u32 2147483647, %v2048_v23  ;;  %v2065_v45 = vand.u32 2147483647, %v2049_v5  ;;  %v6934_v54 = vld [vmem:[#allocation183_spill] sm:$0xff] }
 0x409   : >> { %v2066_v23 = vand.u32 2147483647, %v2050_v52  ;;  %v2052_v16 = vsub.f32 %v5609_v53, %v2027_v11  ;;  %v2067_v21 = vand.u32 2147483647, %v2051_v41  ;;  %v2254_v5 = vsub.f32 %v5508_v12, %v2217_v36 }
 0x40a   : >> { %v5711_v59 = vpop.f32.mrf.mxu2  ;;  %v5713_v28 = vpop.f32.mrf.mxu3  ;;  %v2079_v13 = vadd.f32 %v2078_v22, %v2077_v17  ;;  %v6938_v22 = vld [vmem:[#allocation179_spill] sm:$0xff] }
 0x40b   : >> { %v1964_v9 = vpop.f32.mrf.mxu0  ;;  %v2029_v40 = vpop.f32.mrf.mxu1  ;;  %v2270_v36 = vand.u32 2147483647, %v2254_v5 }
 0x40c   : >> { %v2081_v33 = vadd.f32 %v2080_v46, %v2079_v13  ;;  %v2030_v56 = vadd.f32 %v2029_v40, %v1964_v9  ;;  %v6939_v9 = vld [vmem:[#allocation207_spill] sm:$0xff]  ;;  %v6941_v40 = vld [vmem:[#allocation180_spill] sm:$0xff]  ;;  %v2255_v13 = vsub.f32 %v5524_v14, %v2220_v62  ;;  %v6967_v62 = vld [vmem:[#allocation210_spill] sm:$0xff] }
 0x40d   : >> { %vm6942_vm3 = vcmp.eq.f32.partialorder %v6941_v40, %v6939_v9 }
 0x40e   : >> { %3189 = vmatmul.msk.f32.gmra.mxu0 %vm6923_vm4, %v6827_v31  ;;  %3205 = vmatmul.msk.f32.gmra.mxu1 %vm6925_vm5, %v6827_v31  ;;  %vm6931_vm4 = vmmov %vm6909_vm2  ;;  %v2053_v20 = vsub.f32 %v5623_v26, %v2030_v56  ;;  %v2229_v56 = vadd.f32 %v5680_v61, %v5678_v55  ;;  %v6969_v61 = vld [vmem:[#allocation190_spill] sm:$0xff] }
 0x40f   : >> { %3220 = vmatmul.msk.f32.gmra.mxu2 %vm6927_vm6, %v6827_v31  ;;  %3236 = vmatmul.msk.f32.gmra.mxu3 %vm6929_vm7, %v6827_v31  ;;  %v2082_v25 = vsel %vm6931_vm4, %v2062_v18, 0.0  ;;  %vm6932_vm5 = vmmov %vm6909_vm2  ;;  %vm6935_vm6 = vcmp.eq.f32.partialorder %v6933_v58, %v6934_v54  ;;  %vm6937_vm7 = vcmp.eq.f32.partialorder %v6936_v47, %v6934_v54  ;;  %vm6940_vm2 = vcmp.eq.f32.partialorder %v6938_v22, %v6939_v9  ;;  %v6947_v47 = vld [vmem:[#allocation187_spill] sm:$0xff] }
 0x410   : >> { %v2084_v49 = vsel %vm6932_vm5, %v2063_v48, 0.0  ;;  %v2083_v7 = vadd.f32 %v2082_v25, %v2081_v33  ;;  %v2086_v18 = vsel %vm6931_vm4, %v2064_v57, 0.0  ;;  %vm6943_vm5 = vmmov %vm6931_vm4  ;;  %v2223_v25 = vadd.f32 %v5583_v38, %v5581_v19  ;;  %v6946_v38 = vld [vmem:[#allocation142_spill] sm:$0xff] }
 0x411   : >> { %v2088_v30 = vsel %vm6943_vm5, %v2065_v45, 0.0  ;;  %v2226_v45 = vadd.f32 %v5630_v15, %v5628_v60  ;;  %v2069_v58 = vand.u32 2147483647, %v2053_v20  ;;  %v2271_v22 = vand.u32 2147483647, %v2255_v13  ;;  %vm6954_vm5 = vmmov %vm6931_vm4 }
 0x412   : >> { %v5748_v63 = vpop.f32.mrf.mxu2  ;;  %v5750_v2 = vpop.f32.mrf.mxu3  ;;  %v2085_v44 = vadd.f32 %v2084_v49, %v2083_v7  ;;  %v6949_v7 = vld [vmem:[#allocation143_spill] sm:$0xff]  ;;  %v2256_v60 = vsub.f32 %v5551_v39, %v2223_v25 }
 0x413   : >> { %v1967_v35 = vpop.f32.mrf.mxu0  ;;  %v2032_v43 = vpop.f32.mrf.mxu1 }
 0x414   : >> { %v2033_v17 = vadd.f32 %v2032_v43, %v1967_v35  ;;  %v2087_v42 = vadd.f32 %v2086_v18, %v2085_v44  ;;  %v2068_v43 = vand.u32 2147483647, %v2052_v16  ;;  %v2258_v44 = vsub.f32 %v5586_v29, %v2229_v56 }
 0x415   : >> { %v2272_v25 = vand.u32 2147483647, %v2256_v60 }
 0x416   : >> { %3190 = vmatmul.msk.f32.gmra.mxu0 %vm6935_vm6, %v6827_v31  ;;  %3206 = vmatmul.msk.f32.gmra.mxu1 %vm6937_vm7, %v6827_v31  ;;  %vm6944_vm6 = vmmov %vm6931_vm4  ;;  %v2054_v11 = vsub.f32 %v5633_v34, %v2033_v17  ;;  %v2089_v49 = vadd.f32 %v2088_v30, %v2087_v42  ;;  %v2094_v40 = vsel %vm6931_vm4, %v2068_v43, 0.0  ;;  %v2232_v17 = vadd.f32 %v5713_v28, %v5711_v59 }
 0x417   : >> { %3221 = vmatmul.msk.f32.gmra.mxu2 %vm6940_vm2, %v6827_v31  ;;  %3237 = vmatmul.msk.f32.gmra.mxu3 %vm6942_vm3, %v6827_v31  ;;  %v2090_v35 = vsel %vm6944_vm6, %v2066_v23, 0.0  ;;  %vm6945_vm7 = vmmov %vm6931_vm4  ;;  %vm6948_vm2 = vcmp.eq.f32.partialorder %v6946_v38, %v6947_v47  ;;  %vm6950_vm3 = vcmp.eq.f32.partialorder %v6949_v7, %v6947_v47  ;;  %v2257_v23 = vsub.f32 %v5560_v50, %v2226_v45  ;;  %v6963_v7 = vld [vmem:[#allocation149_spill] sm:$0xff] }
 0x418   : >> { %v2092_v41 = vsel %vm6945_vm7, %v2067_v21, 0.0  ;;  %v2091_v15 = vadd.f32 %v2090_v35, %v2089_v49  ;;  %v2070_v18 = vand.u32 2147483647, %v2054_v11  ;;  %v2096_v30 = vsel %vm6954_vm5, %v2069_v58, 0.0  ;;  %vm6955_vm6 = vmmov %vm6931_vm4 }
 0x419   : >> { %v2290_v42 = vsel %vm6955_vm6, %v2270_v36, 0.0  ;;  %vm6956_vm7 = vmmov %vm6931_vm4  ;;  %v2273_v11 = vand.u32 2147483647, %v2257_v23  ;;  %v2274_v58 = vand.u32 2147483647, %v2258_v44 }
 0x41a   : >> { %v2172_v46 = vpop.f32.mrf.mxu2  ;;  %v2237_v48 = vpop.f32.mrf.mxu3  ;;  %v2093_v16 = vadd.f32 %v2092_v41, %v2091_v15  ;;  %v2292_v43 = vsel %vm6956_vm7, %v2271_v22, 0.0  ;;  %v6958_v41 = vld [vmem:[#allocation216_spill] sm:$0xff]  ;;  %v6966_v15 = vld [vmem:[#allocation189_spill] sm:$0xff] }
 0x41b   : >> { %v1970_v57 = vpop.f32.mrf.mxu0  ;;  %v2035_v52 = vpop.f32.mrf.mxu1  ;;  %v2238_v45 = vadd.f32 %v2237_v48, %v2172_v46  ;;  %v2291_v56 = vadd.f32 %v2290_v42, %v6958_v41  ;;  %vm6968_vm7 = vcmp.eq.f32.partialorder %v6966_v15, %v6967_v62 }
 0x41c   : >> { %v2036_v33 = vadd.f32 %v2035_v52, %v1970_v57  ;;  %v2095_v13 = vadd.f32 %v2094_v40, %v2093_v16  ;;  %v2235_v57 = vadd.f32 %v5750_v2, %v5748_v63  ;;  %v6960_v63 = vld [vmem:[#allocation148_spill] sm:$0xff]  ;;  %v6961_v2 = vld [vmem:[#allocation193_spill] sm:$0xff] }
 0x41d   : >> { %vm6964_vm5 = vcmp.eq.f32.partialorder %v6963_v7, %v6961_v2  ;;  %v2293_v22 = vadd.f32 %v2292_v43, %v2291_v56  ;;  %v2261_v16 = vsub.f32 %v5623_v26, %v2238_v45 }
 0x41e   : >> { %v2055_v19 = vsub.f32 %v5643_v51, %v2036_v33  ;;  %3191 = vmatmul.msk.f32.gmra.mxu0 %vm6948_vm2, %v6827_v31  ;;  %3207 = vmatmul.msk.f32.gmra.mxu1 %vm6950_vm3, %v6827_v31  ;;  %vm6957_vm2 = vmmov %vm6931_vm4  ;;  %v2259_v33 = vsub.f32 %v5595_v8, %v2232_v17  ;;  %v2097_v49 = vadd.f32 %v2096_v30, %v2095_v13 }
 0x41f   : >> { %3222 = vmatmul.msk.f32.gmra.mxu2 %vm1731_vm13, %v6827_v31  ;;  %3238 = vmatmul.msk.f32.gmra.mxu3 %vm1732_vm0, %v6827_v31  ;;  %v2098_v59 = vsel %vm6957_vm2, %v2070_v18, 0.0  ;;  %vm6959_vm3 = vmmov %vm6957_vm2  ;;  %vm6962_vm4 = vcmp.eq.f32.partialorder %v6960_v63, %v6961_v2  ;;  %v2260_v46 = vsub.f32 %v5609_v53, %v2235_v57 }
 0x420   : >> { %v2071_v21 = vand.u32 2147483647, %v2055_v19  ;;  %vm6965_vm6 = vmmov %vm6957_vm2  ;;  %v2099_v48 = vadd.f32 %v2098_v59, %v2097_v49  ;;  %vm6970_vm2 = vcmp.eq.f32.partialorder %v6969_v61, %v6967_v62  ;;  %v2296_v18 = vsel %vm6959_vm3, %v2273_v11, 0.0 }
 0x421   : >> { %v2294_v36 = vsel %vm6965_vm6, %v2272_v25, 0.0  ;;  %v2275_v23 = vand.u32 2147483647, %v2259_v33  ;;  %v2276_v42 = vand.u32 2147483647, %v2260_v46  ;;  %vm6973_vm6 = vmmov %vm6959_vm3 }
 0x422   : >> { %v2175_v20 = vpop.f32.mrf.mxu2  ;;  %v2240_v5 = vpop.f32.mrf.mxu3  ;;  %v2100_v19 = vsel %vm6959_vm3, %v2071_v21, 0.0  ;;  %v2295_v44 = vadd.f32 %v2294_v36, %v2293_v22  ;;  %v2277_v11 = vand.u32 2147483647, %v2261_v16 }
 0x423   : >> { %v1973_v52 = vpop.f32.mrf.mxu0  ;;  %v2038_v35 = vpop.f32.mrf.mxu1  ;;  %v2241_v60 = vadd.f32 %v2240_v5, %v2175_v20  ;;  %v2101_v17 = vadd.f32 %v2100_v19, %v2099_v48 }
 0x424   : >> { %v2039_v28 = vadd.f32 %v2038_v35, %v1973_v52  ;;  %v2297_v43 = vadd.f32 %v2296_v18, %v2295_v44 }
 0x425   : >> { %v2262_v25 = vsub.f32 %v5633_v34, %v2241_v60 }
 0x426   : >> { %v2056_v38 = vsub.f32 %v5658_v24, %v2039_v28  ;;  %3192 = vmatmul.msk.f32.gmra.mxu0 %vm6962_vm4, %v6827_v31  ;;  %3208 = vmatmul.msk.f32.gmra.mxu1 %vm6964_vm5, %v6827_v31  ;;  %vm6971_vm4 = vmmov %vm6959_vm3  ;;  %v2300_v28 = vsel %vm6973_vm6, %v2275_v23, 0.0 }
 0x427   : >> { %3223 = vmatmul.msk.f32.gmra.mxu2 %vm6968_vm7, %v6827_v31  ;;  %3239 = vmatmul.msk.f32.gmra.mxu3 %vm6970_vm2, %v6827_v31  ;;  %v2298_v30 = vsel %vm6971_vm4, %v2274_v58, 0.0  ;;  %vm6972_vm5 = vmmov %vm6959_vm3  ;;  %v2278_v41 = vand.u32 2147483647, %v2262_v25 }
 0x428   : >> { %v2072_v40 = vand.u32 2147483647, %v2056_v38  ;;  %v2299_v49 = vadd.f32 %v2298_v30, %v2297_v43  ;;  %vm6974_vm7 = vmmov %vm6959_vm3 }
 0x429   : >> { %v2302_v45 = vsel %vm6974_vm7, %v2276_v42, 0.0  ;;  %vm6978_vm2 = vmmov %vm6959_vm3 }
 0x42a   : >> { %v2178_v21 = vpop.f32.mrf.mxu2  ;;  %v2243_v20 = vpop.f32.mrf.mxu3  ;;  %v2102_v5 = vsel %vm6972_vm5, %v2072_v40, 0.0  ;;  %v2301_v38 = vadd.f32 %v2300_v28, %v2299_v49  ;;  %v2304_v7 = vsel %vm6978_vm2, %v2277_v11, 0.0  ;;  %vm6979_vm3 = vmmov %vm6978_vm2 }
 0x42b   : >> { %v2244_v13 = vadd.f32 %v2243_v20, %v2178_v21  ;;  %v2344_v57 = vpop.f32.mrf.mxu0  ;;  %v2409_v52 = vpop.f32.mrf.mxu1  ;;  %v2103_v35 = vadd.f32 %v2102_v5, %v2101_v17  ;;  %v2306_v15 = vsel %vm6979_vm3, %v2278_v41, 0.0  ;;  %vm6980_vm4 = vmmov %vm6978_vm2 }
 0x42c   : >> { %v2410_v59 = vadd.f32 %v2409_v52, %v2344_v57  ;;  %v2303_v46 = vadd.f32 %v2302_v45, %v2301_v38  ;;  %vm6981_vm5 = vmmov %vm6978_vm2 }
 0x42d   : >> { %v2263_v33 = vsub.f32 %v5643_v51, %v2244_v13  ;;  %2104 = vadd.xlane.f32.xlu0 %v2103_v35  ;;  %vm6982_vm6 = vmmov %vm6978_vm2 }
 0x42e   : >> { %v2457_v63 = vsub.f32 %v5392_v1, %v2410_v59  ;;  %v2305_v18 = vadd.f32 %v2304_v7, %v2303_v46  ;;  %vm6983_vm7 = vmmov %vm6978_vm2 }
 0x42f   : >> { %3224 = vmatmul.msk.f32.gmra.mxu2 %vm1735_vm1, %v6827_v31  ;;  %3240 = vmatmul.msk.f32.gmra.mxu3 %vm1736_vm14, %v6827_v31  ;;  %v2279_v36 = vand.u32 2147483647, %v2263_v33  ;;  %vm6984_vm3 = vmmov %vm6978_vm2 }
 0x430   : >> { %v2473_v23 = vand.u32 2147483647, %v2457_v63  ;;  %v2307_v30 = vadd.f32 %v2306_v15, %v2305_v18 }
 0x431   : >> { %v2308_v31 = vsel %vm6980_vm4, %v2279_v36, 0.0  ;;  %vm6985_vm4 = vmmov %vm6978_vm2 }
 0x432   : >> { %v2181_v48 = vpop.f32.mrf.mxu2  ;;  %v2246_v60 = vpop.f32.mrf.mxu3  ;;  %v2489_v20 = vsel %vm6981_vm5, %v2473_v23, 0.0  ;;  %v2309_v42 = vadd.f32 %v2308_v31, %v2307_v30  ;;  %vm6986_vm5 = vmmov %vm6978_vm2 }
 0x433   : >> { %v2247_v61 = vadd.f32 %v2246_v60, %v2181_v48  ;;  %v2347_v22 = vpop.f32.mrf.mxu0  ;;  %v2412_v40 = vpop.f32.mrf.mxu1 }
 0x434   : >> { %v2413_v16 = vadd.f32 %v2412_v40, %v2347_v22 }
 0x435   : >> { %v2264_v17 = vsub.f32 %v5658_v24, %v2247_v61 }
 0x436   : >> { %v2458_v44 = vsub.f32 %v5400_v3, %v2413_v16 }
 0x437   : >> { %v2280_v21 = vand.u32 2147483647, %v2264_v17 }
 0x438   : >> { %v2474_v5 = vand.u32 2147483647, %v2458_v44 }
 0x439   : >> { %v2310_v25 = vsel %vm6982_vm6, %v2280_v21, 0.0  ;;  %vm6987_vm6 = vmmov %vm6978_vm2 }
 0x43a   : >> { %v2490_v13 = vsel %vm6983_vm7, %v2474_v5, 0.0  ;;  %v2552_v57 = vpop.f32.mrf.mxu2  ;;  %v2617_v52 = vpop.f32.mrf.mxu3  ;;  %v2311_v35 = vadd.f32 %v2310_v25, %v2309_v42  ;;  %vm6988_vm7 = vmmov %vm6978_vm2 }
 0x43b   : >> { %v2491_v43 = vadd.f32 %v2490_v13, %v2489_v20  ;;  %v2618_v59 = vadd.f32 %v2617_v52, %v2552_v57  ;;  %v2415_v28 = vpop.f32.mrf.mxu1  ;;  %v2350_v11 = vpop.f32.mrf.mxu0 }
 0x43c   : >> { %2312 = vadd.xlane.f32.xlu1 %v2311_v35  ;;  %v2416_v33 = vadd.f32 %v2415_v28, %v2350_v11 }
 0x43d   : >> { %v2665_v41 = vsub.f32 %v5392_v1, %v2618_v59 }
 0x43e   : >> { %v2459_v49 = vsub.f32 %v5422_v32, %v2416_v33 }
 0x43f   : >> { %v2681_v60 = vand.u32 2147483647, %v2665_v41 }
 0x440   : >> { %v2475_v45 = vand.u32 2147483647, %v2459_v49 }
 0x441   : >> { %v2697_v18 = vsel %vm6984_vm3, %v2681_v60, 0.0  ;;  %vm6989_vm3 = vmmov %vm6978_vm2 }
 0x442   : >> { %v2492_v56 = vsel %vm6978_vm2, %v2475_v45, 0.0  ;;  %v2555_v19 = vpop.f32.mrf.mxu2  ;;  %v2620_v38 = vpop.f32.mrf.mxu3 }
 0x443   : >> { %v2493_v63 = vadd.f32 %v2492_v56, %v2491_v43  ;;  %v2621_v7 = vadd.f32 %v2620_v38, %v2555_v19  ;;  %v2353_v36 = vpop.f32.mrf.mxu0  ;;  %v2418_v46 = vpop.f32.mrf.mxu1 }
 0x444   : >> { %v2419_v48 = vadd.f32 %v2418_v46, %v2353_v36 }
 0x445   : >> { %v2666_v15 = vsub.f32 %v5400_v3, %v2621_v7 }
 0x446   : >> { %v2460_v61 = vsub.f32 %v5453_v37, %v2419_v48 }
 0x447   : >> { %v2682_v22 = vand.u32 2147483647, %v2666_v15 }
 0x448   : >> { %v2476_v40 = vand.u32 2147483647, %v2460_v61 }
 0x449   : >> { %v2698_v1 = vsel %vm6985_vm4, %v2682_v22, 0.0  ;;  %vm6990_vm4 = vmmov %vm6978_vm2 }
 0x44a   : >> { %v2699_v23 = vadd.f32 %v2698_v1, %v2697_v18  ;;  %v2494_v16 = vsel %vm6986_vm5, %v2476_v40, 0.0  ;;  %v2558_v17 = vpop.f32.mrf.mxu2  ;;  %v2623_v31 = vpop.f32.mrf.mxu3  ;;  %vm6991_vm5 = vmmov %vm6978_vm2 }
 0x44b   : >> { %v2495_v44 = vadd.f32 %v2494_v16, %v2493_v63  ;;  %v2624_v30 = vadd.f32 %v2623_v31, %v2558_v17  ;;  %v2356_v21 = vpop.f32.mrf.mxu0  ;;  %v2421_v20 = vpop.f32.mrf.mxu1 }
 0x44c   : >> { %v2422_v5 = vadd.f32 %v2421_v20, %v2356_v21 }
 0x44d   : >> { %v2667_v3 = vsub.f32 %v5422_v32, %v2624_v30 }
 0x44e   : >> { %v2461_v42 = vsub.f32 %v5484_v4, %v2422_v5 }
 0x44f   : >> { %v2683_v25 = vand.u32 2147483647, %v2667_v3 }
 0x450   : >> { %v2477_v13 = vand.u32 2147483647, %v2461_v42 }
 0x451   : >> { %v2700_v57 = vsel %vm6987_vm6, %v2683_v25, 0.0  ;;  %vm6992_vm6 = vmmov %vm6978_vm2 }
 0x452   : >> { %v2701_v52 = vadd.f32 %v2700_v57, %v2699_v23  ;;  %v2496_v35 = vsel %vm6988_vm7, %v2477_v13, 0.0  ;;  %v2561_v43 = vpop.f32.mrf.mxu2  ;;  %v2626_v59 = vpop.f32.mrf.mxu3  ;;  %vm6993_vm7 = vmmov %vm6978_vm2 }
 0x453   : >> { %v5879_v28 = vadd.f32 %v2496_v35, %v2495_v44  ;;  %v2627_v11 = vadd.f32 %v2626_v59, %v2561_v43  ;;  %v2359_v33 = vpop.f32.mrf.mxu0  ;;  %v2424_v49 = vpop.f32.mrf.mxu1 }
 0x454   : >> { %v2425_v59 = vadd.f32 %v2424_v49, %v2359_v33 }
 0x455   : >> { %v2668_v45 = vsub.f32 %v5453_v37, %v2627_v11 }
 0x457   : >> { %v2684_v41 = vand.u32 2147483647, %v2668_v45 }
 0x459   : >> { %v2702_v32 = vsel %vm6978_vm2, %v2684_v41, 0.0 }
 0x45a   : >> { %v2703_v56 = vadd.f32 %v2702_v32, %v2701_v52  ;;  %v2564_v19 = vpop.f32.mrf.mxu2  ;;  %v2629_v38 = vpop.f32.mrf.mxu3 }
 0x45b   : >> { %v2630_v63 = vadd.f32 %v2629_v38, %v2564_v19  ;;  %v2362_v7 = vpop.f32.mrf.mxu0  ;;  %v2427_v36 = vpop.f32.mrf.mxu1 }
 0x45c   : >> { %v2428_v45 = vadd.f32 %v2427_v36, %v2362_v7 }
 0x45d   : >> { %v2669_v46 = vsub.f32 %v5484_v4, %v2630_v63  ;;  %v2462_v63 = vsub.f32 %v5508_v12, %v2425_v59 }
 0x45f   : >> { %v2685_v48 = vand.u32 2147483647, %v2669_v46  ;;  %v2478_v0 = vand.u32 2147483647, %v2462_v63 }
 0x461   : >> { %v2704_v60 = vsel %vm6989_vm3, %v2685_v48, 0.0  ;;  %vm6994_vm3 = vmmov %vm6978_vm2 }
 0x462   : >> { %v5885_v15 = vadd.f32 %v2704_v60, %v2703_v56  ;;  %v2567_v61 = vpop.f32.mrf.mxu2  ;;  %v2632_v22 = vpop.f32.mrf.mxu3  ;;  %v2463_v60 = vsub.f32 %v5524_v14, %v2428_v45 }
 0x463   : >> { %v2365_v40 = vpop.f32.mrf.mxu0  ;;  %v2430_v37 = vpop.f32.mrf.mxu1  ;;  %v2633_v7 = vadd.f32 %v2632_v22, %v2567_v61 }
 0x464   : >> { %v2431_v46 = vadd.f32 %v2430_v37, %v2365_v40  ;;  %v2479_v49 = vand.u32 2147483647, %v2463_v60  ;;  %v2498_v37 = vsel %vm6990_vm4, %v2478_v0, 0.0  ;;  %vm6995_vm4 = vmmov %vm6978_vm2 }
 0x466   : >> { %v2464_v33 = vsub.f32 %v5551_v39, %v2431_v46 }
 0x46a   : >> { %v2570_v18 = vpop.f32.mrf.mxu2  ;;  %v2635_v1 = vpop.f32.mrf.mxu3 }
 0x46b   : >> { %v2368_v23 = vpop.f32.mrf.mxu0  ;;  %v2433_v16 = vpop.f32.mrf.mxu1 }
 0x472   : >> { %v5887_v17 = vpop.f32.mrf.mxu2  ;;  %v5889_v31 = vpop.f32.mrf.mxu3 }
 0x473   : >> { %v2371_v44 = vpop.f32.mrf.mxu0  ;;  %v2436_v30 = vpop.f32.mrf.mxu1 }
 0x477   : >> { %v1897_v3 = vpop.xlane.xlu0 %1896 }
 0x478   : >> { %v1898_v42 = vrot.slane %v1897_v3, 4 }
 0x47a   : >> { %v5891_v4 = vpop.f32.mrf.mxu2  ;;  %v5893_v21 = vpop.f32.mrf.mxu3  ;;  %v1899_v25 = vadd.f32 %v1898_v42, %v1897_v3  ;;  %v2434_v3 = vadd.f32 %v2433_v16, %v2368_v23  ;;  %v2437_v42 = vadd.f32 %v2436_v30, %v2371_v44  ;;  %v2500_v16 = vsel %vm6991_vm5, %v2479_v49, 0.0  ;;  %vm6996_vm5 = vmmov %vm6978_vm2 }
 0x47b   : >> { %v2374_v20 = vpop.f32.mrf.mxu0  ;;  %v2439_v5 = vpop.f32.mrf.mxu1  ;;  %v2670_v44 = vsub.f32 %v5508_v12, %v2633_v7 }
 0x47c   : >> { %v1900_v43 = vrot.slane %v1899_v25, 2  ;;  %v2465_v36 = vsub.f32 %v5560_v50, %v2434_v3  ;;  %v2466_v6 = vsub.f32 %v5586_v29, %v2437_v42 }
 0x47e   : >> { %v1901_v11 = vadd.f32 %v1900_v43, %v1899_v25  ;;  %v2440_v25 = vadd.f32 %v2439_v5, %v2374_v20  ;;  %v2481_v30 = vand.u32 2147483647, %v2465_v36  ;;  %v2499_v20 = vadd.f32 %v2498_v37, %v5879_v28 }
 0x47f   : >> { %v2636_v5 = vadd.f32 %v2635_v1, %v2570_v18  ;;  %v2482_v45 = vand.u32 2147483647, %v2466_v6  ;;  %v2639_v6 = vadd.f32 %v5889_v31, %v5887_v17 }
 0x480   : >> { %v1902_v56 = vrot.slane %v1901_v11, 1  ;;  %v2467_v61 = vsub.f32 %v5595_v8, %v2440_v25  ;;  %v2501_v0 = vadd.f32 %v2500_v16, %v2499_v20 }
 0x481   : >> { %v2506_v28 = vsel %vm6978_vm2, %v2482_v45, 0.0 }
 0x482   : >> { %v5895_v13 = vpop.f32.mrf.mxu2  ;;  %v5897_v57 = vpop.f32.mrf.mxu3  ;;  %v1903_v48 = vadd.f32 %v1902_v56, %v1901_v11  ;;  %v2480_v11 = vand.u32 2147483647, %v2464_v33 }
 0x483   : >> { %v2377_v52 = vpop.f32.mrf.mxu0  ;;  %v2442_v35 = vpop.f32.mrf.mxu1 }
 0x484   : >> { %3249 = vpush %v1903_v48  ;;  %v2443_v23 = vadd.f32 %v2442_v35, %v2377_v52  ;;  %v2502_v56 = vsel %vm6992_vm6, %v2480_v11, 0.0  ;;  %v2686_v48 = vand.u32 2147483647, %v2670_v44  ;;  %v2504_v52 = vsel %vm6993_vm7, %v2481_v30, 0.0  ;;  %vm6997_vm6 = vmmov %vm6978_vm2 }
 0x485   : >> { %v2483_v35 = vand.u32 2147483647, %v2467_v61  ;;  %v2503_v42 = vadd.f32 %v2502_v56, %v2501_v0  ;;  %vm6998_vm7 = vmmov %vm6978_vm2 }
 0x486   : >> { %v2468_v63 = vsub.f32 %v5609_v53, %v2443_v23  ;;  %v2706_v31 = vsel %vm6995_vm4, %v2686_v48, 0.0  ;;  %vm7000_vm4 = vmmov %vm6978_vm2 }
 0x487   : >> { %v2505_v36 = vadd.f32 %v2504_v52, %v2503_v42  ;;  %v2508_v25 = vsel %vm6994_vm3, %v2483_v35, 0.0  ;;  %v2707_v45 = vadd.f32 %v2706_v31, %v5885_v15  ;;  %vm6999_vm3 = vmmov %vm6978_vm2 }
 0x488   : >> { %v2484_v33 = vand.u32 2147483647, %v2468_v63 }
 0x489   : >> { %v2507_v37 = vadd.f32 %v2506_v28, %v2505_v36 }
 0x48a   : >> { %v5899_v41 = vpop.f32.mrf.mxu2  ;;  %v5901_v32 = vpop.f32.mrf.mxu3 }
 0x48b   : >> { %v2380_v19 = vpop.f32.mrf.mxu0  ;;  %v2445_v38 = vpop.f32.mrf.mxu1  ;;  %v2509_v44 = vadd.f32 %v2508_v25, %v2507_v37  ;;  %v2648_v30 = vadd.f32 %v5901_v32, %v5899_v41 }
 0x48c   : >> { %v2446_v22 = vadd.f32 %v2445_v38, %v2380_v19  ;;  %v2671_v19 = vsub.f32 %v5524_v14, %v2636_v5  ;;  %v2642_v38 = vadd.f32 %v5893_v21, %v5891_v4  ;;  %v2645_v14 = vadd.f32 %v5897_v57, %v5895_v13 }
 0x48d   : >> { %v2510_v21 = vsel %vm6996_vm5, %v2484_v33, 0.0  ;;  %vm7001_vm5 = vmmov %vm6978_vm2 }
 0x48e   : >> { %v2469_v12 = vsub.f32 %v5623_v26, %v2446_v22  ;;  %v2687_v11 = vand.u32 2147483647, %v2671_v19  ;;  %v2673_v4 = vsub.f32 %v5560_v50, %v2642_v38  ;;  %v2674_v57 = vsub.f32 %v5586_v29, %v2645_v14 }
 0x48f   : >> { %v2511_v56 = vadd.f32 %v2510_v21, %v2509_v44  ;;  %v2675_v29 = vsub.f32 %v5595_v8, %v2648_v30 }
 0x490   : >> { %v2708_v48 = vsel %vm6998_vm7, %v2687_v11, 0.0  ;;  %v2689_v52 = vand.u32 2147483647, %v2673_v4  ;;  %vm7003_vm7 = vmmov %vm6978_vm2 }
 0x491   : >> { %v2709_v38 = vadd.f32 %v2708_v48, %v2707_v45  ;;  %v2691_v8 = vand.u32 2147483647, %v2675_v29 }
 0x492   : >> { %v2585_v43 = vpop.f32.mrf.mxu2  ;;  %v2650_v2 = vpop.f32.mrf.mxu3  ;;  %v2712_v33 = vsel %vm7001_vm5, %v2689_v52, 0.0  ;;  %vm7006_vm5 = vmmov %vm6978_vm2 }
 0x493   : >> { %v2383_v59 = vpop.f32.mrf.mxu0  ;;  %v2448_v40 = vpop.f32.mrf.mxu1  ;;  %v2651_v22 = vadd.f32 %v2650_v2, %v2585_v43  ;;  %v2716_v21 = vsel %vm6978_vm2, %v2691_v8, 0.0 }
 0x494   : >> { %v2449_v46 = vadd.f32 %v2448_v40, %v2383_v59  ;;  %v2485_v59 = vand.u32 2147483647, %v2469_v12  ;;  %v2672_v40 = vsub.f32 %v5551_v39, %v2639_v6  ;;  %v2690_v12 = vand.u32 2147483647, %v2674_v57 }
 0x495   : >> { %v2676_v42 = vsub.f32 %v5609_v53, %v2651_v22 }
 0x496   : >> { %v2470_v49 = vsub.f32 %v5633_v34, %v2449_v46  ;;  %v2512_v61 = vsel %vm6997_vm6, %v2485_v59, 0.0  ;;  %v2688_v50 = vand.u32 2147483647, %v2672_v40  ;;  %vm7002_vm6 = vmmov %vm6978_vm2 }
 0x497   : >> { %v2513_v35 = vadd.f32 %v2512_v61, %v2511_v56  ;;  %v2714_v53 = vsel %vm7002_vm6, %v2690_v12, 0.0  ;;  %v2692_v25 = vand.u32 2147483647, %v2676_v42  ;;  %vm7007_vm6 = vmmov %vm6978_vm2  ;;  %v2738_v12 = vstv %s3450_s18  ;;  %v7009_v42 = vld [vmem:[#allocation21_spill] sm:$0xff]  ;;  %s1808_s18 = sadd.s32 1, %s3450_s18  }
 0x498   : >> { %v2486_v23 = vand.u32 2147483647, %v2470_v49  ;;  %v2710_v6 = vsel %vm7000_vm4, %v2688_v50, 0.0  ;;  %vm7005_vm4 = vmmov %vm6978_vm2  ;;  %p1805_p2 = scmp.ge.s32.totalorder %s1808_s18, 2  }
 0x499   : >> { %v2711_v36 = vadd.f32 %v2710_v6, %v2709_v38 }
 0x49a   : >> { %v2588_v60 = vpop.f32.mrf.mxu2  ;;  %v2653_v3 = vpop.f32.mrf.mxu3  ;;  %v2514_v41 = vsel %vm6978_vm2, %v2486_v23, 0.0 }
 0x49b   : >> { %v2386_v18 = vpop.f32.mrf.mxu0  ;;  %v2451_v1 = vpop.f32.mrf.mxu1  ;;  %v2654_v2 = vadd.f32 %v2653_v3, %v2588_v60  ;;  %v2515_v28 = vadd.f32 %v2514_v41, %v2513_v35  ;;  %v2713_v4 = vadd.f32 %v2712_v33, %v2711_v36 }
 0x49c   : >> { %v2452_v7 = vadd.f32 %v2451_v1, %v2386_v18 }
 0x49d   : >> { %v2677_v60 = vsub.f32 %v5623_v26, %v2654_v2 }
 0x49e   : >> { %v2471_v17 = vsub.f32 %v5643_v51, %v2452_v7 }
 0x49f   : >> { %v2693_v23 = vand.u32 2147483647, %v2677_v60 }
 0x4a0   : >> { %v2105_v16 = vpop.xlane.xlu0 %2104  ;;  %v2487_v20 = vand.u32 2147483647, %v2471_v17 }
 0x4a1   : >> { %v2106_v13 = vrot.slane %v2105_v16, 4 }
 0x4a2   : >> { %v2591_v39 = vpop.f32.mrf.mxu2  ;;  %v2656_v5 = vpop.f32.mrf.mxu3  ;;  %v2516_v15 = vsel %vm6999_vm3, %v2487_v20, 0.0  ;;  %vm7004_vm3 = vmmov %vm6978_vm2 }
 0x4a3   : >> { %v2107_v63 = vadd.f32 %v2106_v13, %v2105_v16  ;;  %v2389_v46 = vpop.f32.mrf.mxu0  ;;  %v2454_v0 = vpop.f32.mrf.mxu1  ;;  %v2657_v1 = vadd.f32 %v2656_v5, %v2591_v39  ;;  %v2517_v3 = vadd.f32 %v2516_v15, %v2515_v28  ;;  %v2715_v16 = vadd.f32 %v2714_v53, %v2713_v4 }
 0x4a4   : >> { %v2455_v32 = vadd.f32 %v2454_v0, %v2389_v46  ;;  %v2718_v44 = vsel %vm7004_vm3, %v2692_v25, 0.0 }
 0x4a5   : >> { %v2108_v43 = vrot.slane %v2107_v63, 2  ;;  %v2678_v31 = vsub.f32 %v5633_v34, %v2657_v1  ;;  %v2717_v57 = vadd.f32 %v2716_v21, %v2715_v16  ;;  %v2720_v34 = vsel %vm7005_vm4, %v2693_v23, 0.0 }
 0x4a6   : >> { %v2472_v19 = vsub.f32 %v5658_v24, %v2455_v32 }
 0x4a7   : >> { %v2109_v18 = vadd.f32 %v2108_v43, %v2107_v63  ;;  %v2694_v30 = vand.u32 2147483647, %v2678_v31  ;;  %v2719_v20 = vadd.f32 %v2718_v44, %v2717_v57 }
 0x4a8   : >> { %v2488_v49 = vand.u32 2147483647, %v2472_v19  ;;  %v7012_v19 = vld [vmem:[#allocation215_spill] sm:$0xff] }
 0x4a9   : >> { %v2110_v7 = vrot.slane %v2109_v18, 1  ;;  %v2722_v50 = vsel %vm7006_vm5, %v2694_v30, 0.0  ;;  %v2721_v56 = vadd.f32 %v2720_v34, %v2719_v20 }
 0x4aa   : >> { %v2594_v14 = vpop.f32.mrf.mxu2  ;;  %v2659_v59 = vpop.f32.mrf.mxu3  ;;  %v2518_v17 = vsel %vm7003_vm7, %v2488_v49, 0.0  ;;  %vm7008_vm7 = vmmov %vm6978_vm2  ;;  %vm5959_vm2 = vcmp.eq.s32.totalorder %v7009_v42, %v2738_v12 }
 0x4ab   : >> { %v2660_v40 = vadd.f32 %v2659_v59, %v2594_v14  ;;  %v2519_v37 = vadd.f32 %v2518_v17, %v2517_v3  ;;  %v2111_v11 = vadd.f32 %v2110_v7, %v2109_v18  ;;  %v2723_v48 = vadd.f32 %v2722_v50, %v2721_v56  ;;  %v7013_v17 = vld [vmem:[#allocation214_spill] sm:$0xff] }
 0x4ad   : >> { %v2679_v26 = vsub.f32 %v5643_v51, %v2660_v40  ;;  %2520 = vadd.xlane.f32.xlu1 %v2519_v37  ;;  %3251 = vpush %v2111_v11 }
 0x4af   : >> { %v2313_v13 = vpop.xlane.xlu1 %2312  ;;  %v2695_v22 = vand.u32 2147483647, %v2679_v26 }
 0x4b0   : >> { %v2314_v61 = vrot.slane %v2313_v13, 4 }
 0x4b1   : >> { %v2724_v0 = vsel %vm7007_vm6, %v2695_v22, 0.0 }
 0x4b2   : >> { %v2315_v39 = vadd.f32 %v2314_v61, %v2313_v13  ;;  %v2597_v5 = vpop.f32.mrf.mxu2  ;;  %v2662_v45 = vpop.f32.mrf.mxu3  ;;  %v2725_v32 = vadd.f32 %v2724_v0, %v2723_v48 }
 0x4b3   : >> { %v2663_v51 = vadd.f32 %v2662_v45, %v2597_v5 }
 0x4b4   : >> { %v2316_v63 = vrot.slane %v2315_v39, 2 }
 0x4b5   : >> { %v2680_v46 = vsub.f32 %v5658_v24, %v2663_v51  ;;  %s3250_s29 = spop %3249 }
 0x4b6   : >> { %v2317_v52 = vadd.f32 %v2316_v63, %v2315_v39  ;;  %v2740_v24 = vstv %s3250_s29 }
 0x4b7   : >> { %v2696_v41 = vand.u32 2147483647, %v2680_v46  ;;  %v2741_v6 = vsel %vm5959_vm2, %v2740_v24, %v7012_v19  }
 0x4b8   : >> { %v2318_v29 = vrot.slane %v2317_v52, 1  ;;  %v7015_v48 = vmov %v2741_v6  ;;  %2744 = vst [vmem:[%s3701_s16] sm:$0xff] (%p1805_p2), %v2741_v6 }
 0x4b9   : >> { %v2726_v35 = vsel %vm7008_vm7, %v2696_v41, 0.0 }
 0x4ba   : >> { %v2727_v2 = vadd.f32 %v2726_v35, %v2725_v32  ;;  %v2319_v43 = vadd.f32 %v2318_v29, %v2317_v52 }
 0x4bc   : >> { %2728 = vadd.xlane.f32.xlu2 %v2727_v2  ;;  %3253 = vpush %v2319_v43 }
 0x4de   : >> { %s3252_s8 = spop %3251 }
 0x4ed   : >> { %s3254_s23 = spop %3253 }
 0x4ee   : >> { %s2321_s10 = sadd.f32 %s3254_s23, %s3252_s8 }
 0x520   : >> { %v2521_v28 = vpop.xlane.xlu1 %2520 }
 0x521   : >> { %v2522_v18 = vrot.slane %v2521_v28, 4 }
 0x523   : >> { %v2523_v1 = vadd.f32 %v2522_v18, %v2521_v28 }
 0x525   : >> { %v2524_v38 = vrot.slane %v2523_v1, 2 }
 0x527   : >> { %v2525_v33 = vadd.f32 %v2524_v38, %v2523_v1 }
 0x529   : >> { %v2526_v49 = vrot.slane %v2525_v33, 1 }
 0x52b   : >> { %v2527_v8 = vadd.f32 %v2526_v49, %v2525_v33 }
 0x52d   : >> { %3255 = vpush %v2527_v8 }
 0x52f   : >> { %v2729_v60 = vpop.xlane.xlu2 %2728 }
 0x530   : >> { %v2730_v3 = vrot.slane %v2729_v60, 4 }
 0x532   : >> { %v2731_v7 = vadd.f32 %v2730_v3, %v2729_v60 }
 0x534   : >> { %v2732_v36 = vrot.slane %v2731_v7, 2 }
 0x536   : >> { %v2733_v53 = vadd.f32 %v2732_v36, %v2731_v7 }
 0x538   : >> { %v2734_v25 = vrot.slane %v2733_v53, 1 }
 0x53a   : >> { %v2735_v14 = vadd.f32 %v2734_v25, %v2733_v53 }
 0x53c   : >> { %3257 = vpush %v2735_v14 }
 0x55e   : >> { %s3256_s9 = spop %3255 }
 0x55f   : >> { %s2529_s22 = sadd.f32 %s3256_s9, %s2321_s10 }
 0x56d   : >> { %s3258_s13 = spop %3257 }
 0x56e   : >> { %s2737_s17 = sadd.f32 %s3258_s13, %s2529_s22  ;;  %1807 = sbr.rel (!%p1805_p2) target bundleno = 796 (0x31c), region = 178 }
 0x570   : >> { %v2742_v59 = vstv %s2737_s17 }
 0x571   : >> { %v2743_v31 = vsel %vm5959_vm2, %v2742_v59, %v7013_v17  }
 0x572   : >> { %v7014_v30 = vmov %v2743_v31  ;;  %3241 = vst [vmem:[%s3701_s16 + $0x8] sm:$0xff] (%p1805_p2), %v2743_v31 }
 0x573 PF: > { %s15_s26 = sadd.s32 1, %s3438_s26   ;;  %s7016_s7 = sld [smem:[#allocation4_spill]] }
 0x574   : > { %p12_p3 = scmp.ge.s32.totalorder %s15_s26, 6   ;;  %s7017_s18 = smov %s3410_s19 }
 0x575   : > { %s7018_s19 = smov %s3558_s12  ;;  %s7019_s20 = smov %s3418_s21 }
 0x576   : > { %s7020_s21 = smov %s3555_s11  ;;  %s7021_s22 = smov %s3430_s24 }
 0x577   : > { %s7022_s23 = smov %s3434_s25  ;;  %s7023_s24 = smov %s7026_s27 }
 0x578   :  { %14 = sbr.rel (!%p12_p3) target bundleno = 5 (0x5), region = 189 }
 0x579   : > { %s7024_s25 = smov %s7016_s7 }

</bundles_post_ra>
